<compile_context>
chip_gen: v7x
topology: tpu7x:2x2x1
jax: 0.10.0
libtpu: 0.0.40
codegen_flags: <defaults>
</compile_context>

<pallas_src>
import functools

import jax
import jax.numpy as jnp
from jax import lax
from jax.experimental import pallas as pl
from jax.experimental.pallas import tpu as pltpu

EPS = 1e-5          # torch.nn.InstanceNorm2d default eps
NEG_SLOPE = 0.2     # LeakyReLU(0.2)
KSIZE = 4


def _round_up(x, m):
    return (x + m - 1) // m * m


# --------------------------------------------------------------------------
# Pallas kernel 1: tiled conv-as-matmul with fused bias + activation
# --------------------------------------------------------------------------
def _conv_matmul_kernel(p_ref, w_ref, b_ref, o_ref, acc_ref, *, act):
    k = pl.program_id(2)

    @pl.when(k == 0)
    def _():
        acc_ref[...] = jnp.zeros_like(acc_ref)

    # bf16 x bf16 -> f32 accumulate on the MXU
    acc_ref[...] += jnp.dot(p_ref[...], w_ref[...],
                            preferred_element_type=jnp.float32)

    @pl.when(k == pl.num_programs(2) - 1)
    def _():
        acc = acc_ref[...] + b_ref[...]          # (1, tn) broadcast over rows
        if act == "leaky":
            acc = jnp.where(acc >= 0, acc, NEG_SLOPE * acc)
        elif act == "sigmoid":
            # numerically stable sigmoid, f32 epilogue on the accumulator
            ez = jnp.exp(-jnp.abs(acc))
            acc = jnp.where(acc >= 0, 1.0 / (1.0 + ez), ez / (1.0 + ez))
        o_ref[...] = acc.astype(o_ref.dtype)


def conv_matmul(patches, w, b, act):
    """(M,K) @ (K,N) + b with fused activation.  Operands cast to bf16, f32 acc."""
    M, K = patches.shape
    _, N = w.shape

    # Tile sizes: MXU-friendly, lane-dense, bounded VMEM (few hundred KiB / step).
    tm = min(256, _round_up(M, 8))
    tn = min(256, _round_up(N, 128))     # pads Cout=1 final layer up to 128 lanes
    tk = min(512, _round_up(K, 128))
    Mp, Np, Kp = _round_up(M, tm), _round_up(N, tn), _round_up(K, tk)

    p = jnp.pad(patches.astype(jnp.bfloat16), ((0, Mp - M), (0, Kp - K)))
    wp = jnp.pad(w.astype(jnp.bfloat16), ((0, Kp - K), (0, Np - N)))
    bp = jnp.pad(b.reshape(1, N).astype(jnp.float32), ((0, 0), (0, Np - N)))

    kern = functools.partial(_conv_matmul_kernel, act=act)
    cost = pl.CostEstimate(
        flops=2 * Mp * Kp * Np,
        transcendentals=Mp * Np if act == "sigmoid" else 0,
        bytes_accessed=Mp * Kp * 2 + Kp * Np * 2 + Np * 4 + Mp * Np * 4,
    )

    out = pl.pallas_call(
        kern,
        out_shape=jax.ShapeDtypeStruct((Mp, Np), jnp.float32),
        grid_spec=pltpu.PrefetchScalarGridSpec(
            num_scalar_prefetch=0,
            grid=(Mp // tm, Np // tn, Kp // tk),
            in_specs=[
                pl.BlockSpec((tm, tk), lambda i, j, k: (i, k)),
                pl.BlockSpec((tk, tn), lambda i, j, k: (k, j)),
                pl.BlockSpec((1, tn), lambda i, j, k: (0, j)),
            ],
            out_specs=pl.BlockSpec((tm, tn), lambda i, j, k: (i, j)),
            scratch_shapes=[pltpu.VMEM((tm, tn), jnp.float32)],
        ),
        compiler_params=pltpu.CompilerParams(
            dimension_semantics=("parallel", "parallel", "arbitrary")),
        cost_estimate=cost,
    )(p, wp, bp)
    return out[:M, :N]


# --------------------------------------------------------------------------
# Pallas kernel 2: InstanceNorm2d (affine=False, biased var) + LeakyReLU(0.2)
# --------------------------------------------------------------------------
def _inorm_lrelu_kernel(x_ref, o_ref):
    x = x_ref[...]                                       # (1, HW, tc) f32
    mean = jnp.mean(x, axis=1, keepdims=True)
    var = jnp.mean(jnp.square(x - mean), axis=1, keepdims=True)
    y = (x - mean) * lax.rsqrt(var + EPS)
    o_ref[...] = jnp.where(y >= 0, y, NEG_SLOPE * y)


def instance_norm_lrelu(x_bhwc):
    B, H, W, C = x_bhwc.shape
    HW = H * W
    x = x_bhwc.reshape(B, HW, C)
    tc = min(128, C)                 # all IN layers here have C in {128,256,512}
    assert C % tc == 0
    y = pl.pallas_call(
        _inorm_lrelu_kernel,
        out_shape=jax.ShapeDtypeStruct((B, HW, C), jnp.float32),
        grid=(B, C // tc),
        in_specs=[pl.BlockSpec((1, HW, tc), lambda b, c: (b, 0, c))],
        out_specs=pl.BlockSpec((1, HW, tc), lambda b, c: (b, 0, c)),
        compiler_params=pltpu.CompilerParams(
            dimension_semantics=("parallel", "parallel")),
    )(x)
    return y.reshape(B, H, W, C)


# --------------------------------------------------------------------------
# Glue (reflect pad / im2col / parameter setup) — plain JAX
# --------------------------------------------------------------------------
def im2col_reflect(x_nhwc, stride):
    """Reflect-pad by 1 (PyTorch 'reflect'), extract 4x4 patches (bf16)."""
    # TODO(synk): fuse im2col into the matmul kernel (shifted manual DMAs from the
    # padded activation) to avoid materializing the 16x-expanded patches in HBM.
    xb = x_nhwc.astype(jnp.bfloat16)
    xp = jnp.pad(xb, ((0, 0), (1, 1), (1, 1), (0, 0)), mode="reflect")
    B, Hp, Wp, C = xp.shape
    Ho = (Hp - KSIZE) // stride + 1
    Wo = (Wp - KSIZE) // stride + 1
    cols = []
    for kh in range(KSIZE):
        for kw in range(KSIZE):
            cols.append(
                xp[:, kh:kh + stride * (Ho - 1) + 1:stride,
                      kw:kw + stride * (Wo - 1) + 1:stride, :]
            )
    patches = jnp.stack(cols, axis=3)                     # (B,Ho,Wo,Kh*Kw,C)
    return patches.reshape(B * Ho * Wo, KSIZE * KSIZE * C), (B, Ho, Wo)


def init_params(key, in_channels=3, features=(64, 128, 256, 512)):
    """Deterministic synthetic weights, PyTorch conv layout (Cout,Cin,Kh,Kw)."""
    chans = [(in_channels, features[0])]
    chans += list(zip(features[:-1], features[1:]))
    chans += [(features[-1], 1)]
    params = []
    for cin, cout in chans:
        key, k1, k2 = jax.random.split(key, 3)
        fan_in = cin * KSIZE * KSIZE
        w = jax.random.normal(k1, (cout, cin, KSIZE, KSIZE), jnp.float32)
        w = w * (1.0 / jnp.sqrt(fan_in))
        b = 0.01 * jax.random.normal(k2, (cout,), jnp.float32)
        params.append((w, b))
    return params


def discriminator_forward(x_nchw, params):
    """Matches DiscriminatorModel.forward (default features [64,128,256,512])."""
    x = jnp.transpose(x_nchw, (0, 2, 3, 1)).astype(jnp.float32)   # NCHW -> NHWC
    # layer strides: initial(2), ConvBlock128(2), ConvBlock256(2),
    # ConvBlock512(1), final conv(1)
    strides = (2, 2, 2, 1, 1)
    n = len(params)
    for idx, ((w, b), s) in enumerate(zip(params, strides)):
        cout = w.shape[0]
        patches, (B, Ho, Wo) = im2col_reflect(x, s)
        # (Cout,Cin,Kh,Kw) -> (Kh,Kw,Cin,Cout) -> (Kh*Kw*Cin, Cout) to match patches
        w2 = jnp.transpose(w, (2, 3, 1, 0)).reshape(-1, cout)
        if idx == 0:
            act = "leaky"        # initial: conv + LeakyReLU
        elif idx == n - 1:
            act = "sigmoid"      # final: conv + sigmoid
        else:
            act = "none"         # ConvBlocks: IN + LeakyReLU applied after
        y = conv_matmul(patches, w2, b, act)
        y = y.reshape(B, Ho, Wo, cout)
        if 0 < idx < n - 1:
            y = instance_norm_lrelu(y)
        x = y
    return jnp.transpose(x, (0, 3, 1, 2))                         # NHWC -> NCHW


# --------------------------------------------------------------------------
if __name__ == "__main__":
    key = jax.random.PRNGKey(0)
    kx, kp = jax.random.split(key)
    # Smallest spatial size that survives the downsizing layers + reflect pads.
    x = jax.random.normal(kx, (2, 3, 32, 32), jnp.float32)        # NCHW
    params = init_params(kp, in_channels=3, features=(64, 128, 256, 512))

    out = jax.jit(discriminator_forward)(x, params)
    out = jax.block_until_ready(out)

    assert out.shape == (2, 1, 2, 2), out.shape
    assert bool(jnp.all(jnp.isfinite(out)))
    assert bool(jnp.all((out >= 0.0) & (out <= 1.0)))             # sigmoid range
    print("KERNEL_OK")
</pallas_src>

<mosaic_0001>
module attributes {stable_mosaic.version = 11 : i64} {
  func.func @_conv_matmul_kernel(%arg0: i32, %arg1: i32, %arg2: i32, %arg3: memref<256x128xbf16, #tpu.memory_space<vmem>>, %arg4: memref<128x128xbf16, #tpu.memory_space<vmem>>, %arg5: memref<1x128xf32, #tpu.memory_space<vmem>>, %arg6: memref<256x128xf32, #tpu.memory_space<vmem>>, %arg7: memref<256x128xf32, #tpu.memory_space<vmem>>) attributes {dimension_semantics = [#tpu.dimension_semantics<parallel>, #tpu.dimension_semantics<parallel>, #tpu.dimension_semantics<arbitrary>], iteration_bounds = array<i64: 2, 1, 1>, scalar_prefetch = 0 : i64, scratch_operands = 1 : i64, tpu.core_type = #tpu.core_type<tc>, window_params = [{transform_indices = @transform_0, window_bounds = array<i64: 256, 128>}, {transform_indices = @transform_1, window_bounds = array<i64: 128, 128>}, {transform_indices = @transform_2, window_bounds = array<i64: 1, 128>}, {transform_indices = @transform_3, window_bounds = array<i64: 256, 128>}]} {
    %c0_i32 = arith.constant 0 : i32
    %0 = arith.cmpi eq, %arg2, %c0_i32 : i32
    %1 = arith.extui %0 : i1 to i32
    %c0_i32_0 = arith.constant 0 : i32
    %2 = arith.cmpi ne, %1, %c0_i32_0 : i32
    scf.if %2 {
      %cst_10 = arith.constant 0.000000e+00 : f32
      %12 = vector.broadcast %cst_10 : f32 to vector<256x128xf32>
      %c0_11 = arith.constant 0 : index
      %c0_12 = arith.constant 0 : index
      %13 = vector.load %arg7[%c0_11, %c0_12] : memref<256x128xf32, #tpu.memory_space<vmem>>, vector<256x128xf32>
      tpu.vector_store %arg7[%c0_11, %c0_12], %12 {strides = array<i32>} : memref<256x128xf32, #tpu.memory_space<vmem>>, vector<256x128xf32>,
    } else {
    }
    %c0 = arith.constant 0 : index
    %c0_1 = arith.constant 0 : index
    %3 = vector.load %arg7[%c0, %c0_1] : memref<256x128xf32, #tpu.memory_space<vmem>>, vector<256x128xf32>
    %c0_2 = arith.constant 0 : index
    %c0_3 = arith.constant 0 : index
    %4 = vector.load %arg3[%c0_2, %c0_3] : memref<256x128xbf16, #tpu.memory_space<vmem>>, vector<256x128xbf16>
    %c0_4 = arith.constant 0 : index
    %c0_5 = arith.constant 0 : index
    %5 = vector.load %arg4[%c0_4, %c0_5] : memref<128x128xbf16, #tpu.memory_space<vmem>>, vector<128x128xbf16>
    %cst = arith.constant dense<0.000000e+00> : vector<256x128xf32>
    %6 = tpu.matmul %4, %5, %cst {dimension_numbers = #tpu.dot_dimension_numbers<[1], [0], [0], [1], [0, 0, 1, 1], [], []>} : vector<256x128xbf16>, vector<128x128xbf16>, vector<256x128xf32> -> vector<256x128xf32>
    %7 = arith.addf %3, %6 : vector<256x128xf32>
    %c0_6 = arith.constant 0 : index
    %c0_7 = arith.constant 0 : index
    %8 = vector.load %arg7[%c0_6, %c0_7] : memref<256x128xf32, #tpu.memory_space<vmem>>, vector<256x128xf32>
    tpu.vector_store %arg7[%c0_6, %c0_7], %7 {strides = array<i32>} : memref<256x128xf32, #tpu.memory_space<vmem>>, vector<256x128xf32>,
    %c0_i32_8 = arith.constant 0 : i32
    %9 = arith.cmpi eq, %arg2, %c0_i32_8 : i32
    %10 = arith.extui %9 : i1 to i32
    %c0_i32_9 = arith.constant 0 : i32
    %11 = arith.cmpi ne, %10, %c0_i32_9 : i32
    scf.if %11 {
      %c0_10 = arith.constant 0 : index
      %c0_11 = arith.constant 0 : index
      %12 = vector.load %arg7[%c0_10, %c0_11] : memref<256x128xf32, #tpu.memory_space<vmem>>, vector<256x128xf32>
      %c0_12 = arith.constant 0 : index
      %c0_13 = arith.constant 0 : index
      %13 = vector.load %arg5[%c0_12, %c0_13] : memref<1x128xf32, #tpu.memory_space<vmem>>, vector<1x128xf32>
      %14 = vector.broadcast %13 : vector<1x128xf32> to vector<256x128xf32>
      %15 = arith.addf %12, %14 : vector<256x128xf32>
      %cst_14 = arith.constant 0.000000e+00 : f32
      %16 = vector.broadcast %cst_14 : f32 to vector<256x128xf32>
      %17 = arith.cmpf oge, %15, %16 : vector<256x128xf32>
      %cst_15 = arith.constant 2.000000e-01 : f32
      %18 = vector.broadcast %cst_15 : f32 to vector<256x128xf32>
      %19 = arith.mulf %18, %15 : vector<256x128xf32>
      %20 = arith.select %17, %15, %19 : vector<256x128xi1>, vector<256x128xf32>
      %c0_16 = arith.constant 0 : index
      %c0_17 = arith.constant 0 : index
      %21 = vector.load %arg6[%c0_16, %c0_17] : memref<256x128xf32, #tpu.memory_space<vmem>>, vector<256x128xf32>
      tpu.vector_store %arg6[%c0_16, %c0_17], %20 {strides = array<i32>} : memref<256x128xf32, #tpu.memory_space<vmem>>, vector<256x128xf32>,
    } else {
    }
    return
  }
  func.func @transform_0(%arg0: i32, %arg1: i32, %arg2: i32) -> (i32, i32) {
    %c0_i32 = arith.constant 0 : i32
    return %arg0, %arg2 : i32, i32
  }
  func.func @transform_1(%arg0: i32, %arg1: i32, %arg2: i32) -> (i32, i32) {
    %c0_i32 = arith.constant 0 : i32
    return %arg2, %arg1 : i32, i32
  }
  func.func @transform_2(%arg0: i32, %arg1: i32, %arg2: i32) -> (i32, i32) {
    %c0_i32 = arith.constant 0 : i32
    %c0_i32_0 = arith.constant 0 : i32
    return %c0_i32, %arg1 : i32, i32
  }
  func.func @transform_3(%arg0: i32, %arg1: i32, %arg2: i32) -> (i32, i32) {
    %c0_i32 = arith.constant 0 : i32
    return %arg0, %arg1 : i32, i32
  }
}

module attributes {stable_mosaic.version = 11 : i64} {
  func.func @_conv_matmul_kernel(%arg0: i32, %arg1: i32, %arg2: i32, %arg3: memref<128x512xbf16, #tpu.memory_space<vmem>>, %arg4: memref<512x128xbf16, #tpu.memory_space<vmem>>, %arg5: memref<1x128xf32, #tpu.memory_space<vmem>>, %arg6: memref<128x128xf32, #tpu.memory_space<vmem>>, %arg7: memref<128x128xf32, #tpu.memory_space<vmem>>) attributes {dimension_semantics = [#tpu.dimension_semantics<parallel>, #tpu.dimension_semantics<parallel>, #tpu.dimension_semantics<arbitrary>], iteration_bounds = array<i64: 1, 1, 2>, scalar_prefetch = 0 : i64, scratch_operands = 1 : i64, tpu.core_type = #tpu.core_type<tc>, window_params = [{transform_indices = @transform_0, window_bounds = array<i64: 128, 512>}, {transform_indices = @transform_1, window_bounds = array<i64: 512, 128>}, {transform_indices = @transform_2, window_bounds = array<i64: 1, 128>}, {transform_indices = @transform_3, window_bounds = array<i64: 128, 128>}]} {
    %c0_i32 = arith.constant 0 : i32
    %0 = arith.cmpi eq, %arg2, %c0_i32 : i32
    %1 = arith.extui %0 : i1 to i32
    %c0_i32_0 = arith.constant 0 : i32
    %2 = arith.cmpi ne, %1, %c0_i32_0 : i32
    scf.if %2 {
      %cst_9 = arith.constant 0.000000e+00 : f32
      %12 = vector.broadcast %cst_9 : f32 to vector<128x128xf32>
      %c0_10 = arith.constant 0 : index
      %c0_11 = arith.constant 0 : index
      %13 = vector.load %arg7[%c0_10, %c0_11] : memref<128x128xf32, #tpu.memory_space<vmem>>, vector<128x128xf32>
      tpu.vector_store %arg7[%c0_10, %c0_11], %12 {strides = array<i32>} : memref<128x128xf32, #tpu.memory_space<vmem>>, vector<128x128xf32>,
    } else {
    }
    %c0 = arith.constant 0 : index
    %c0_1 = arith.constant 0 : index
    %3 = vector.load %arg7[%c0, %c0_1] : memref<128x128xf32, #tpu.memory_space<vmem>>, vector<128x128xf32>
    %c0_2 = arith.constant 0 : index
    %c0_3 = arith.constant 0 : index
    %4 = vector.load %arg3[%c0_2, %c0_3] : memref<128x512xbf16, #tpu.memory_space<vmem>>, vector<128x512xbf16>
    %c0_4 = arith.constant 0 : index
    %c0_5 = arith.constant 0 : index
    %5 = vector.load %arg4[%c0_4, %c0_5] : memref<512x128xbf16, #tpu.memory_space<vmem>>, vector<512x128xbf16>
    %cst = arith.constant dense<0.000000e+00> : vector<128x128xf32>
    %6 = tpu.matmul %4, %5, %cst {dimension_numbers = #tpu.dot_dimension_numbers<[1], [0], [0], [1], [0, 0, 1, 1], [], []>} : vector<128x512xbf16>, vector<512x128xbf16>, vector<128x128xf32> -> vector<128x128xf32>
    %7 = arith.addf %3, %6 : vector<128x128xf32>
    %c0_6 = arith.constant 0 : index
    %c0_7 = arith.constant 0 : index
    %8 = vector.load %arg7[%c0_6, %c0_7] : memref<128x128xf32, #tpu.memory_space<vmem>>, vector<128x128xf32>
    tpu.vector_store %arg7[%c0_6, %c0_7], %7 {strides = array<i32>} : memref<128x128xf32, #tpu.memory_space<vmem>>, vector<128x128xf32>,
    %c1_i32 = arith.constant 1 : i32
    %9 = arith.cmpi eq, %arg2, %c1_i32 : i32
    %10 = arith.extui %9 : i1 to i32
    %c0_i32_8 = arith.constant 0 : i32
    %11 = arith.cmpi ne, %10, %c0_i32_8 : i32
    scf.if %11 {
      %c0_9 = arith.constant 0 : index
      %c0_10 = arith.constant 0 : index
      %12 = vector.load %arg7[%c0_9, %c0_10] : memref<128x128xf32, #tpu.memory_space<vmem>>, vector<128x128xf32>
      %c0_11 = arith.constant 0 : index
      %c0_12 = arith.constant 0 : index
      %13 = vector.load %arg5[%c0_11, %c0_12] : memref<1x128xf32, #tpu.memory_space<vmem>>, vector<1x128xf32>
      %14 = vector.broadcast %13 : vector<1x128xf32> to vector<128x128xf32>
      %15 = arith.addf %12, %14 : vector<128x128xf32>
      %c0_13 = arith.constant 0 : index
      %c0_14 = arith.constant 0 : index
      %16 = vector.load %arg6[%c0_13, %c0_14] : memref<128x128xf32, #tpu.memory_space<vmem>>, vector<128x128xf32>
      tpu.vector_store %arg6[%c0_13, %c0_14], %15 {strides = array<i32>} : memref<128x128xf32, #tpu.memory_space<vmem>>, vector<128x128xf32>,
    } else {
    }
    return
  }
  func.func @transform_0(%arg0: i32, %arg1: i32, %arg2: i32) -> (i32, i32) {
    %c0_i32 = arith.constant 0 : i32
    return %arg0, %arg2 : i32, i32
  }
  func.func @transform_1(%arg0: i32, %arg1: i32, %arg2: i32) -> (i32, i32) {
    %c0_i32 = arith.constant 0 : i32
    return %arg2, %arg1 : i32, i32
  }
  func.func @transform_2(%arg0: i32, %arg1: i32, %arg2: i32) -> (i32, i32) {
    %c0_i32 = arith.constant 0 : i32
    %c0_i32_0 = arith.constant 0 : i32
    return %c0_i32, %arg1 : i32, i32
  }
  func.func @transform_3(%arg0: i32, %arg1: i32, %arg2: i32) -> (i32, i32) {
    %c0_i32 = arith.constant 0 : i32
    return %arg0, %arg1 : i32, i32
  }
}

module attributes {stable_mosaic.version = 11 : i64} {
  func.func @_inorm_lrelu_kernel(%arg0: i32, %arg1: i32, %arg2: memref<1x64x128xf32, #tpu.memory_space<vmem>>, %arg3: memref<1x64x128xf32, #tpu.memory_space<vmem>>) attributes {dimension_semantics = [#tpu.dimension_semantics<parallel>, #tpu.dimension_semantics<parallel>], iteration_bounds = array<i64: 2, 1>, scalar_prefetch = 0 : i64, scratch_operands = 0 : i64, tpu.core_type = #tpu.core_type<tc>, window_params = [{transform_indices = @transform_0, window_bounds = array<i64: 1, 64, 128>}, {transform_indices = @transform_1, window_bounds = array<i64: 1, 64, 128>}]} {
    %c0 = arith.constant 0 : index
    %c0_0 = arith.constant 0 : index
    %c0_1 = arith.constant 0 : index
    %0 = vector.load %arg2[%c0, %c0_0, %c0_1] : memref<1x64x128xf32, #tpu.memory_space<vmem>>, vector<1x64x128xf32>
    %cst = arith.constant dense<0.000000e+00> : vector<1x128xf32>
    %1 = vector.multi_reduction <add>, %0, %cst [1] : vector<1x64x128xf32> to vector<1x128xf32>
    %2 = vector.shape_cast %1 : vector<1x128xf32> to vector<1x1x128xf32>
    %cst_2 = arith.constant 6.400000e+01 : f32
    %3 = vector.broadcast %cst_2 : f32 to vector<1x1x128xf32>
    %4 = arith.divf %2, %3 : vector<1x1x128xf32>
    %5 = vector.broadcast %4 : vector<1x1x128xf32> to vector<1x64x128xf32>
    %6 = arith.subf %0, %5 : vector<1x64x128xf32>
    %7 = arith.mulf %6, %6 : vector<1x64x128xf32>
    %cst_3 = arith.constant dense<0.000000e+00> : vector<1x128xf32>
    %8 = vector.multi_reduction <add>, %7, %cst_3 [1] : vector<1x64x128xf32> to vector<1x128xf32>
    %9 = vector.shape_cast %8 : vector<1x128xf32> to vector<1x1x128xf32>
    %cst_4 = arith.constant 6.400000e+01 : f32
    %10 = vector.broadcast %cst_4 : f32 to vector<1x1x128xf32>
    %11 = arith.divf %9, %10 : vector<1x1x128xf32>
    %12 = vector.broadcast %4 : vector<1x1x128xf32> to vector<1x64x128xf32>
    %13 = arith.subf %0, %12 : vector<1x64x128xf32>
    %cst_5 = arith.constant 9.99999974E-6 : f32
    %14 = vector.broadcast %cst_5 : f32 to vector<1x1x128xf32>
    %15 = arith.addf %11, %14 : vector<1x1x128xf32>
    %16 = math.rsqrt %15 : vector<1x1x128xf32>
    %17 = vector.broadcast %16 : vector<1x1x128xf32> to vector<1x64x128xf32>
    %18 = arith.mulf %13, %17 : vector<1x64x128xf32>
    %cst_6 = arith.constant 0.000000e+00 : f32
    %19 = vector.broadcast %cst_6 : f32 to vector<1x64x128xf32>
    %20 = arith.cmpf oge, %18, %19 : vector<1x64x128xf32>
    %cst_7 = arith.constant 2.000000e-01 : f32
    %21 = vector.broadcast %cst_7 : f32 to vector<1x64x128xf32>
    %22 = arith.mulf %21, %18 : vector<1x64x128xf32>
    %23 = arith.select %20, %18, %22 : vector<1x64x128xi1>, vector<1x64x128xf32>
    %c0_8 = arith.constant 0 : index
    %c0_9 = arith.constant 0 : index
    %c0_10 = arith.constant 0 : index
    %24 = vector.load %arg3[%c0_8, %c0_9, %c0_10] : memref<1x64x128xf32, #tpu.memory_space<vmem>>, vector<1x64x128xf32>
    tpu.vector_store %arg3[%c0_8, %c0_9, %c0_10], %23 {strides = array<i32>} : memref<1x64x128xf32, #tpu.memory_space<vmem>>, vector<1x64x128xf32>,
    return
  }
  func.func @transform_0(%arg0: i32, %arg1: i32) -> (i32, i32, i32) {
    %c0_i32 = arith.constant 0 : i32
    %c0_i32_0 = arith.constant 0 : i32
    return %arg0, %c0_i32, %arg1 : i32, i32, i32
  }
  func.func @transform_1(%arg0: i32, %arg1: i32) -> (i32, i32, i32) {
    %c0_i32 = arith.constant 0 : i32
    %c0_i32_0 = arith.constant 0 : i32
    return %arg0, %c0_i32, %arg1 : i32, i32, i32
  }
}

module attributes {stable_mosaic.version = 11 : i64} {
  func.func @_conv_matmul_kernel(%arg0: i32, %arg1: i32, %arg2: i32, %arg3: memref<32x512xbf16, #tpu.memory_space<vmem>>, %arg4: memref<512x256xbf16, #tpu.memory_space<vmem>>, %arg5: memref<1x256xf32, #tpu.memory_space<vmem>>, %arg6: memref<32x256xf32, #tpu.memory_space<vmem>>, %arg7: memref<32x256xf32, #tpu.memory_space<vmem>>) attributes {dimension_semantics = [#tpu.dimension_semantics<parallel>, #tpu.dimension_semantics<parallel>, #tpu.dimension_semantics<arbitrary>], iteration_bounds = array<i64: 1, 1, 4>, scalar_prefetch = 0 : i64, scratch_operands = 1 : i64, tpu.core_type = #tpu.core_type<tc>, window_params = [{transform_indices = @transform_0, window_bounds = array<i64: 32, 512>}, {transform_indices = @transform_1, window_bounds = array<i64: 512, 256>}, {transform_indices = @transform_2, window_bounds = array<i64: 1, 256>}, {transform_indices = @transform_3, window_bounds = array<i64: 32, 256>}]} {
    %c0_i32 = arith.constant 0 : i32
    %0 = arith.cmpi eq, %arg2, %c0_i32 : i32
    %1 = arith.extui %0 : i1 to i32
    %c0_i32_0 = arith.constant 0 : i32
    %2 = arith.cmpi ne, %1, %c0_i32_0 : i32
    scf.if %2 {
      %cst_9 = arith.constant 0.000000e+00 : f32
      %12 = vector.broadcast %cst_9 : f32 to vector<32x256xf32>
      %c0_10 = arith.constant 0 : index
      %c0_11 = arith.constant 0 : index
      %13 = vector.load %arg7[%c0_10, %c0_11] : memref<32x256xf32, #tpu.memory_space<vmem>>, vector<32x256xf32>
      tpu.vector_store %arg7[%c0_10, %c0_11], %12 {strides = array<i32>} : memref<32x256xf32, #tpu.memory_space<vmem>>, vector<32x256xf32>,
    } else {
    }
    %c0 = arith.constant 0 : index
    %c0_1 = arith.constant 0 : index
    %3 = vector.load %arg7[%c0, %c0_1] : memref<32x256xf32, #tpu.memory_space<vmem>>, vector<32x256xf32>
    %c0_2 = arith.constant 0 : index
    %c0_3 = arith.constant 0 : index
    %4 = vector.load %arg3[%c0_2, %c0_3] : memref<32x512xbf16, #tpu.memory_space<vmem>>, vector<32x512xbf16>
    %c0_4 = arith.constant 0 : index
    %c0_5 = arith.constant 0 : index
    %5 = vector.load %arg4[%c0_4, %c0_5] : memref<512x256xbf16, #tpu.memory_space<vmem>>, vector<512x256xbf16>
    %cst = arith.constant dense<0.000000e+00> : vector<32x256xf32>
    %6 = tpu.matmul %4, %5, %cst {dimension_numbers = #tpu.dot_dimension_numbers<[1], [0], [0], [1], [0, 0, 1, 1], [], []>} : vector<32x512xbf16>, vector<512x256xbf16>, vector<32x256xf32> -> vector<32x256xf32>
    %7 = arith.addf %3, %6 : vector<32x256xf32>
    %c0_6 = arith.constant 0 : index
    %c0_7 = arith.constant 0 : index
    %8 = vector.load %arg7[%c0_6, %c0_7] : memref<32x256xf32, #tpu.memory_space<vmem>>, vector<32x256xf32>
    tpu.vector_store %arg7[%c0_6, %c0_7], %7 {strides = array<i32>} : memref<32x256xf32, #tpu.memory_space<vmem>>, vector<32x256xf32>,
    %c3_i32 = arith.constant 3 : i32
    %9 = arith.cmpi eq, %arg2, %c3_i32 : i32
    %10 = arith.extui %9 : i1 to i32
    %c0_i32_8 = arith.constant 0 : i32
    %11 = arith.cmpi ne, %10, %c0_i32_8 : i32
    scf.if %11 {
      %c0_9 = arith.constant 0 : index
      %c0_10 = arith.constant 0 : index
      %12 = vector.load %arg7[%c0_9, %c0_10] : memref<32x256xf32, #tpu.memory_space<vmem>>, vector<32x256xf32>
      %c0_11 = arith.constant 0 : index
      %c0_12 = arith.constant 0 : index
      %13 = vector.load %arg5[%c0_11, %c0_12] : memref<1x256xf32, #tpu.memory_space<vmem>>, vector<1x256xf32>
      %14 = vector.broadcast %13 : vector<1x256xf32> to vector<32x256xf32>
      %15 = arith.addf %12, %14 : vector<32x256xf32>
      %c0_13 = arith.constant 0 : index
      %c0_14 = arith.constant 0 : index
      %16 = vector.load %arg6[%c0_13, %c0_14] : memref<32x256xf32, #tpu.memory_space<vmem>>, vector<32x256xf32>
      tpu.vector_store %arg6[%c0_13, %c0_14], %15 {strides = array<i32>} : memref<32x256xf32, #tpu.memory_space<vmem>>, vector<32x256xf32>,
    } else {
    }
    return
  }
  func.func @transform_0(%arg0: i32, %arg1: i32, %arg2: i32) -> (i32, i32) {
    %c0_i32 = arith.constant 0 : i32
    return %arg0, %arg2 : i32, i32
  }
  func.func @transform_1(%arg0: i32, %arg1: i32, %arg2: i32) -> (i32, i32) {
    %c0_i32 = arith.constant 0 : i32
    return %arg2, %arg1 : i32, i32
  }
  func.func @transform_2(%arg0: i32, %arg1: i32, %arg2: i32) -> (i32, i32) {
    %c0_i32 = arith.constant 0 : i32
    %c0_i32_0 = arith.constant 0 : i32
    return %c0_i32, %arg1 : i32, i32
  }
  func.func @transform_3(%arg0: i32, %arg1: i32, %arg2: i32) -> (i32, i32) {
    %c0_i32 = arith.constant 0 : i32
    return %arg0, %arg1 : i32, i32
  }
}

module attributes {stable_mosaic.version = 11 : i64} {
  func.func @_inorm_lrelu_kernel(%arg0: i32, %arg1: i32, %arg2: memref<1x16x128xf32, #tpu.memory_space<vmem>>, %arg3: memref<1x16x128xf32, #tpu.memory_space<vmem>>) attributes {dimension_semantics = [#tpu.dimension_semantics<parallel>, #tpu.dimension_semantics<parallel>], iteration_bounds = array<i64: 2, 2>, scalar_prefetch = 0 : i64, scratch_operands = 0 : i64, tpu.core_type = #tpu.core_type<tc>, window_params = [{transform_indices = @transform_0, window_bounds = array<i64: 1, 16, 128>}, {transform_indices = @transform_1, window_bounds = array<i64: 1, 16, 128>}]} {
    %c0 = arith.constant 0 : index
    %c0_0 = arith.constant 0 : index
    %c0_1 = arith.constant 0 : index
    %0 = vector.load %arg2[%c0, %c0_0, %c0_1] : memref<1x16x128xf32, #tpu.memory_space<vmem>>, vector<1x16x128xf32>
    %cst = arith.constant dense<0.000000e+00> : vector<1x128xf32>
    %1 = vector.multi_reduction <add>, %0, %cst [1] : vector<1x16x128xf32> to vector<1x128xf32>
    %2 = vector.shape_cast %1 : vector<1x128xf32> to vector<1x1x128xf32>
    %cst_2 = arith.constant 1.600000e+01 : f32
    %3 = vector.broadcast %cst_2 : f32 to vector<1x1x128xf32>
    %4 = arith.divf %2, %3 : vector<1x1x128xf32>
    %5 = vector.broadcast %4 : vector<1x1x128xf32> to vector<1x16x128xf32>
    %6 = arith.subf %0, %5 : vector<1x16x128xf32>
    %7 = arith.mulf %6, %6 : vector<1x16x128xf32>
    %cst_3 = arith.constant dense<0.000000e+00> : vector<1x128xf32>
    %8 = vector.multi_reduction <add>, %7, %cst_3 [1] : vector<1x16x128xf32> to vector<1x128xf32>
    %9 = vector.shape_cast %8 : vector<1x128xf32> to vector<1x1x128xf32>
    %cst_4 = arith.constant 1.600000e+01 : f32
    %10 = vector.broadcast %cst_4 : f32 to vector<1x1x128xf32>
    %11 = arith.divf %9, %10 : vector<1x1x128xf32>
    %12 = vector.broadcast %4 : vector<1x1x128xf32> to vector<1x16x128xf32>
    %13 = arith.subf %0, %12 : vector<1x16x128xf32>
    %cst_5 = arith.constant 9.99999974E-6 : f32
    %14 = vector.broadcast %cst_5 : f32 to vector<1x1x128xf32>
    %15 = arith.addf %11, %14 : vector<1x1x128xf32>
    %16 = math.rsqrt %15 : vector<1x1x128xf32>
    %17 = vector.broadcast %16 : vector<1x1x128xf32> to vector<1x16x128xf32>
    %18 = arith.mulf %13, %17 : vector<1x16x128xf32>
    %cst_6 = arith.constant 0.000000e+00 : f32
    %19 = vector.broadcast %cst_6 : f32 to vector<1x16x128xf32>
    %20 = arith.cmpf oge, %18, %19 : vector<1x16x128xf32>
    %cst_7 = arith.constant 2.000000e-01 : f32
    %21 = vector.broadcast %cst_7 : f32 to vector<1x16x128xf32>
    %22 = arith.mulf %21, %18 : vector<1x16x128xf32>
    %23 = arith.select %20, %18, %22 : vector<1x16x128xi1>, vector<1x16x128xf32>
    %c0_8 = arith.constant 0 : index
    %c0_9 = arith.constant 0 : index
    %c0_10 = arith.constant 0 : index
    %24 = vector.load %arg3[%c0_8, %c0_9, %c0_10] : memref<1x16x128xf32, #tpu.memory_space<vmem>>, vector<1x16x128xf32>
    tpu.vector_store %arg3[%c0_8, %c0_9, %c0_10], %23 {strides = array<i32>} : memref<1x16x128xf32, #tpu.memory_space<vmem>>, vector<1x16x128xf32>,
    return
  }
  func.func @transform_0(%arg0: i32, %arg1: i32) -> (i32, i32, i32) {
    %c0_i32 = arith.constant 0 : i32
    %c0_i32_0 = arith.constant 0 : i32
    return %arg0, %c0_i32, %arg1 : i32, i32, i32
  }
  func.func @transform_1(%arg0: i32, %arg1: i32) -> (i32, i32, i32) {
    %c0_i32 = arith.constant 0 : i32
    %c0_i32_0 = arith.constant 0 : i32
    return %arg0, %c0_i32, %arg1 : i32, i32, i32
  }
}

module attributes {stable_mosaic.version = 11 : i64} {
  func.func @_conv_matmul_kernel(%arg0: i32, %arg1: i32, %arg2: i32, %arg3: memref<24x512xbf16, #tpu.memory_space<vmem>>, %arg4: memref<512x256xbf16, #tpu.memory_space<vmem>>, %arg5: memref<1x256xf32, #tpu.memory_space<vmem>>, %arg6: memref<24x256xf32, #tpu.memory_space<vmem>>, %arg7: memref<24x256xf32, #tpu.memory_space<vmem>>) attributes {dimension_semantics = [#tpu.dimension_semantics<parallel>, #tpu.dimension_semantics<parallel>, #tpu.dimension_semantics<arbitrary>], iteration_bounds = array<i64: 1, 2, 8>, scalar_prefetch = 0 : i64, scratch_operands = 1 : i64, tpu.core_type = #tpu.core_type<tc>, window_params = [{transform_indices = @transform_0, window_bounds = array<i64: 24, 512>}, {transform_indices = @transform_1, window_bounds = array<i64: 512, 256>}, {transform_indices = @transform_2, window_bounds = array<i64: 1, 256>}, {transform_indices = @transform_3, window_bounds = array<i64: 24, 256>}]} {
    %c0_i32 = arith.constant 0 : i32
    %0 = arith.cmpi eq, %arg2, %c0_i32 : i32
    %1 = arith.extui %0 : i1 to i32
    %c0_i32_0 = arith.constant 0 : i32
    %2 = arith.cmpi ne, %1, %c0_i32_0 : i32
    scf.if %2 {
      %cst_9 = arith.constant 0.000000e+00 : f32
      %12 = vector.broadcast %cst_9 : f32 to vector<24x256xf32>
      %c0_10 = arith.constant 0 : index
      %c0_11 = arith.constant 0 : index
      %13 = vector.load %arg7[%c0_10, %c0_11] : memref<24x256xf32, #tpu.memory_space<vmem>>, vector<24x256xf32>
      tpu.vector_store %arg7[%c0_10, %c0_11], %12 {strides = array<i32>} : memref<24x256xf32, #tpu.memory_space<vmem>>, vector<24x256xf32>,
    } else {
    }
    %c0 = arith.constant 0 : index
    %c0_1 = arith.constant 0 : index
    %3 = vector.load %arg7[%c0, %c0_1] : memref<24x256xf32, #tpu.memory_space<vmem>>, vector<24x256xf32>
    %c0_2 = arith.constant 0 : index
    %c0_3 = arith.constant 0 : index
    %4 = vector.load %arg3[%c0_2, %c0_3] : memref<24x512xbf16, #tpu.memory_space<vmem>>, vector<24x512xbf16>
    %c0_4 = arith.constant 0 : index
    %c0_5 = arith.constant 0 : index
    %5 = vector.load %arg4[%c0_4, %c0_5] : memref<512x256xbf16, #tpu.memory_space<vmem>>, vector<512x256xbf16>
    %cst = arith.constant dense<0.000000e+00> : vector<24x256xf32>
    %6 = tpu.matmul %4, %5, %cst {dimension_numbers = #tpu.dot_dimension_numbers<[1], [0], [0], [1], [0, 0, 1, 1], [], []>} : vector<24x512xbf16>, vector<512x256xbf16>, vector<24x256xf32> -> vector<24x256xf32>
    %7 = arith.addf %3, %6 : vector<24x256xf32>
    %c0_6 = arith.constant 0 : index
    %c0_7 = arith.constant 0 : index
    %8 = vector.load %arg7[%c0_6, %c0_7] : memref<24x256xf32, #tpu.memory_space<vmem>>, vector<24x256xf32>
    tpu.vector_store %arg7[%c0_6, %c0_7], %7 {strides = array<i32>} : memref<24x256xf32, #tpu.memory_space<vmem>>, vector<24x256xf32>,
    %c7_i32 = arith.constant 7 : i32
    %9 = arith.cmpi eq, %arg2, %c7_i32 : i32
    %10 = arith.extui %9 : i1 to i32
    %c0_i32_8 = arith.constant 0 : i32
    %11 = arith.cmpi ne, %10, %c0_i32_8 : i32
    scf.if %11 {
      %c0_9 = arith.constant 0 : index
      %c0_10 = arith.constant 0 : index
      %12 = vector.load %arg7[%c0_9, %c0_10] : memref<24x256xf32, #tpu.memory_space<vmem>>, vector<24x256xf32>
      %c0_11 = arith.constant 0 : index
      %c0_12 = arith.constant 0 : index
      %13 = vector.load %arg5[%c0_11, %c0_12] : memref<1x256xf32, #tpu.memory_space<vmem>>, vector<1x256xf32>
      %14 = vector.broadcast %13 : vector<1x256xf32> to vector<24x256xf32>
      %15 = arith.addf %12, %14 : vector<24x256xf32>
      %c0_13 = arith.constant 0 : index
      %c0_14 = arith.constant 0 : index
      %16 = vector.load %arg6[%c0_13, %c0_14] : memref<24x256xf32, #tpu.memory_space<vmem>>, vector<24x256xf32>
      tpu.vector_store %arg6[%c0_13, %c0_14], %15 {strides = array<i32>} : memref<24x256xf32, #tpu.memory_space<vmem>>, vector<24x256xf32>,
    } else {
    }
    return
  }
  func.func @transform_0(%arg0: i32, %arg1: i32, %arg2: i32) -> (i32, i32) {
    %c0_i32 = arith.constant 0 : i32
    return %arg0, %arg2 : i32, i32
  }
  func.func @transform_1(%arg0: i32, %arg1: i32, %arg2: i32) -> (i32, i32) {
    %c0_i32 = arith.constant 0 : i32
    return %arg2, %arg1 : i32, i32
  }
  func.func @transform_2(%arg0: i32, %arg1: i32, %arg2: i32) -> (i32, i32) {
    %c0_i32 = arith.constant 0 : i32
    %c0_i32_0 = arith.constant 0 : i32
    return %c0_i32, %arg1 : i32, i32
  }
  func.func @transform_3(%arg0: i32, %arg1: i32, %arg2: i32) -> (i32, i32) {
    %c0_i32 = arith.constant 0 : i32
    return %arg0, %arg1 : i32, i32
  }
}

module attributes {stable_mosaic.version = 11 : i64} {
  func.func @_inorm_lrelu_kernel(%arg0: i32, %arg1: i32, %arg2: memref<1x9x128xf32, #tpu.memory_space<vmem>>, %arg3: memref<1x9x128xf32, #tpu.memory_space<vmem>>) attributes {dimension_semantics = [#tpu.dimension_semantics<parallel>, #tpu.dimension_semantics<parallel>], iteration_bounds = array<i64: 2, 4>, scalar_prefetch = 0 : i64, scratch_operands = 0 : i64, tpu.core_type = #tpu.core_type<tc>, window_params = [{transform_indices = @transform_0, window_bounds = array<i64: 1, 9, 128>}, {transform_indices = @transform_1, window_bounds = array<i64: 1, 9, 128>}]} {
    %c0 = arith.constant 0 : index
    %c0_0 = arith.constant 0 : index
    %c0_1 = arith.constant 0 : index
    %0 = vector.load %arg2[%c0, %c0_0, %c0_1] : memref<1x9x128xf32, #tpu.memory_space<vmem>>, vector<1x9x128xf32>
    %cst = arith.constant dense<0.000000e+00> : vector<1x128xf32>
    %1 = vector.multi_reduction <add>, %0, %cst [1] : vector<1x9x128xf32> to vector<1x128xf32>
    %2 = vector.shape_cast %1 : vector<1x128xf32> to vector<1x1x128xf32>
    %cst_2 = arith.constant 9.000000e+00 : f32
    %3 = vector.broadcast %cst_2 : f32 to vector<1x1x128xf32>
    %4 = arith.divf %2, %3 : vector<1x1x128xf32>
    %5 = vector.broadcast %4 : vector<1x1x128xf32> to vector<1x9x128xf32>
    %6 = arith.subf %0, %5 : vector<1x9x128xf32>
    %7 = arith.mulf %6, %6 : vector<1x9x128xf32>
    %cst_3 = arith.constant dense<0.000000e+00> : vector<1x128xf32>
    %8 = vector.multi_reduction <add>, %7, %cst_3 [1] : vector<1x9x128xf32> to vector<1x128xf32>
    %9 = vector.shape_cast %8 : vector<1x128xf32> to vector<1x1x128xf32>
    %cst_4 = arith.constant 9.000000e+00 : f32
    %10 = vector.broadcast %cst_4 : f32 to vector<1x1x128xf32>
    %11 = arith.divf %9, %10 : vector<1x1x128xf32>
    %12 = vector.broadcast %4 : vector<1x1x128xf32> to vector<1x9x128xf32>
    %13 = arith.subf %0, %12 : vector<1x9x128xf32>
    %cst_5 = arith.constant 9.99999974E-6 : f32
    %14 = vector.broadcast %cst_5 : f32 to vector<1x1x128xf32>
    %15 = arith.addf %11, %14 : vector<1x1x128xf32>
    %16 = math.rsqrt %15 : vector<1x1x128xf32>
    %17 = vector.broadcast %16 : vector<1x1x128xf32> to vector<1x9x128xf32>
    %18 = arith.mulf %13, %17 : vector<1x9x128xf32>
    %cst_6 = arith.constant 0.000000e+00 : f32
    %19 = vector.broadcast %cst_6 : f32 to vector<1x9x128xf32>
    %20 = arith.cmpf oge, %18, %19 : vector<1x9x128xf32>
    %cst_7 = arith.constant 2.000000e-01 : f32
    %21 = vector.broadcast %cst_7 : f32 to vector<1x9x128xf32>
    %22 = arith.mulf %21, %18 : vector<1x9x128xf32>
    %23 = arith.select %20, %18, %22 : vector<1x9x128xi1>, vector<1x9x128xf32>
    %c0_8 = arith.constant 0 : index
    %c0_9 = arith.constant 0 : index
    %c0_10 = arith.constant 0 : index
    %24 = vector.load %arg3[%c0_8, %c0_9, %c0_10] : memref<1x9x128xf32, #tpu.memory_space<vmem>>, vector<1x9x128xf32>
    tpu.vector_store %arg3[%c0_8, %c0_9, %c0_10], %23 {strides = array<i32>} : memref<1x9x128xf32, #tpu.memory_space<vmem>>, vector<1x9x128xf32>,
    return
  }
  func.func @transform_0(%arg0: i32, %arg1: i32) -> (i32, i32, i32) {
    %c0_i32 = arith.constant 0 : i32
    %c0_i32_0 = arith.constant 0 : i32
    return %arg0, %c0_i32, %arg1 : i32, i32, i32
  }
  func.func @transform_1(%arg0: i32, %arg1: i32) -> (i32, i32, i32) {
    %c0_i32 = arith.constant 0 : i32
    %c0_i32_0 = arith.constant 0 : i32
    return %arg0, %c0_i32, %arg1 : i32, i32, i32
  }
}

module attributes {stable_mosaic.version = 11 : i64} {
  func.func @_conv_matmul_kernel(%arg0: i32, %arg1: i32, %arg2: i32, %arg3: memref<8x512xbf16, #tpu.memory_space<vmem>>, %arg4: memref<512x128xbf16, #tpu.memory_space<vmem>>, %arg5: memref<1x128xf32, #tpu.memory_space<vmem>>, %arg6: memref<8x128xf32, #tpu.memory_space<vmem>>, %arg7: memref<8x128xf32, #tpu.memory_space<vmem>>) attributes {dimension_semantics = [#tpu.dimension_semantics<parallel>, #tpu.dimension_semantics<parallel>, #tpu.dimension_semantics<arbitrary>], iteration_bounds = array<i64: 1, 1, 16>, scalar_prefetch = 0 : i64, scratch_operands = 1 : i64, tpu.core_type = #tpu.core_type<tc>, window_params = [{transform_indices = @transform_0, window_bounds = array<i64: 8, 512>}, {transform_indices = @transform_1, window_bounds = array<i64: 512, 128>}, {transform_indices = @transform_2, window_bounds = array<i64: 1, 128>}, {transform_indices = @transform_3, window_bounds = array<i64: 8, 128>}]} {
    %c0_i32 = arith.constant 0 : i32
    %0 = arith.cmpi eq, %arg2, %c0_i32 : i32
    %1 = arith.extui %0 : i1 to i32
    %c0_i32_0 = arith.constant 0 : i32
    %2 = arith.cmpi ne, %1, %c0_i32_0 : i32
    scf.if %2 {
      %cst_9 = arith.constant 0.000000e+00 : f32
      %12 = vector.broadcast %cst_9 : f32 to vector<8x128xf32>
      %c0_10 = arith.constant 0 : index
      %c0_11 = arith.constant 0 : index
      %13 = vector.load %arg7[%c0_10, %c0_11] : memref<8x128xf32, #tpu.memory_space<vmem>>, vector<8x128xf32>
      tpu.vector_store %arg7[%c0_10, %c0_11], %12 {strides = array<i32>} : memref<8x128xf32, #tpu.memory_space<vmem>>, vector<8x128xf32>,
    } else {
    }
    %c0 = arith.constant 0 : index
    %c0_1 = arith.constant 0 : index
    %3 = vector.load %arg7[%c0, %c0_1] : memref<8x128xf32, #tpu.memory_space<vmem>>, vector<8x128xf32>
    %c0_2 = arith.constant 0 : index
    %c0_3 = arith.constant 0 : index
    %4 = vector.load %arg3[%c0_2, %c0_3] : memref<8x512xbf16, #tpu.memory_space<vmem>>, vector<8x512xbf16>
    %c0_4 = arith.constant 0 : index
    %c0_5 = arith.constant 0 : index
    %5 = vector.load %arg4[%c0_4, %c0_5] : memref<512x128xbf16, #tpu.memory_space<vmem>>, vector<512x128xbf16>
    %cst = arith.constant dense<0.000000e+00> : vector<8x128xf32>
    %6 = tpu.matmul %4, %5, %cst {dimension_numbers = #tpu.dot_dimension_numbers<[1], [0], [0], [1], [0, 0, 1, 1], [], []>} : vector<8x512xbf16>, vector<512x128xbf16>, vector<8x128xf32> -> vector<8x128xf32>
    %7 = arith.addf %3, %6 : vector<8x128xf32>
    %c0_6 = arith.constant 0 : index
    %c0_7 = arith.constant 0 : index
    %8 = vector.load %arg7[%c0_6, %c0_7] : memref<8x128xf32, #tpu.memory_space<vmem>>, vector<8x128xf32>
    tpu.vector_store %arg7[%c0_6, %c0_7], %7 {strides = array<i32>} : memref<8x128xf32, #tpu.memory_space<vmem>>, vector<8x128xf32>,
    %c15_i32 = arith.constant 15 : i32
    %9 = arith.cmpi eq, %arg2, %c15_i32 : i32
    %10 = arith.extui %9 : i1 to i32
    %c0_i32_8 = arith.constant 0 : i32
    %11 = arith.cmpi ne, %10, %c0_i32_8 : i32
    scf.if %11 {
      %c0_9 = arith.constant 0 : index
      %c0_10 = arith.constant 0 : index
      %12 = vector.load %arg7[%c0_9, %c0_10] : memref<8x128xf32, #tpu.memory_space<vmem>>, vector<8x128xf32>
      %c0_11 = arith.constant 0 : index
      %c0_12 = arith.constant 0 : index
      %13 = vector.load %arg5[%c0_11, %c0_12] : memref<1x128xf32, #tpu.memory_space<vmem>>, vector<1x128xf32>
      %14 = vector.broadcast %13 : vector<1x128xf32> to vector<8x128xf32>
      %15 = arith.addf %12, %14 : vector<8x128xf32>
      %16 = math.absf %15 : vector<8x128xf32>
      %cst_13 = arith.constant 0.000000e+00 : f32
      %17 = vector.broadcast %cst_13 : f32 to vector<8x128xf32>
      %18 = arith.subf %17, %16 : vector<8x128xf32>
      %19 = math.exp %18 : vector<8x128xf32>
      %cst_14 = arith.constant 0.000000e+00 : f32
      %20 = vector.broadcast %cst_14 : f32 to vector<8x128xf32>
      %21 = arith.cmpf oge, %15, %20 : vector<8x128xf32>
      %cst_15 = arith.constant 1.000000e+00 : f32
      %22 = vector.broadcast %cst_15 : f32 to vector<8x128xf32>
      %23 = arith.addf %22, %19 : vector<8x128xf32>
      %cst_16 = arith.constant 1.000000e+00 : f32
      %24 = vector.broadcast %cst_16 : f32 to vector<8x128xf32>
      %25 = arith.divf %24, %23 : vector<8x128xf32>
      %cst_17 = arith.constant 1.000000e+00 : f32
      %26 = vector.broadcast %cst_17 : f32 to vector<8x128xf32>
      %27 = arith.addf %26, %19 : vector<8x128xf32>
      %28 = arith.divf %19, %27 : vector<8x128xf32>
      %29 = arith.select %21, %25, %28 : vector<8x128xi1>, vector<8x128xf32>
      %c0_18 = arith.constant 0 : index
      %c0_19 = arith.constant 0 : index
      %30 = vector.load %arg6[%c0_18, %c0_19] : memref<8x128xf32, #tpu.memory_space<vmem>>, vector<8x128xf32>
      tpu.vector_store %arg6[%c0_18, %c0_19], %29 {strides = array<i32>} : memref<8x128xf32, #tpu.memory_space<vmem>>, vector<8x128xf32>,
    } else {
    }
    return
  }
  func.func @transform_0(%arg0: i32, %arg1: i32, %arg2: i32) -> (i32, i32) {
    %c0_i32 = arith.constant 0 : i32
    return %arg0, %arg2 : i32, i32
  }
  func.func @transform_1(%arg0: i32, %arg1: i32, %arg2: i32) -> (i32, i32) {
    %c0_i32 = arith.constant 0 : i32
    return %arg2, %arg1 : i32, i32
  }
  func.func @transform_2(%arg0: i32, %arg1: i32, %arg2: i32) -> (i32, i32) {
    %c0_i32 = arith.constant 0 : i32
    %c0_i32_0 = arith.constant 0 : i32
    return %c0_i32, %arg1 : i32, i32
  }
  func.func @transform_3(%arg0: i32, %arg1: i32, %arg2: i32) -> (i32, i32) {
    %c0_i32 = arith.constant 0 : i32
    return %arg0, %arg1 : i32, i32
  }
}

</mosaic_0001>

<bundles_post_ra>
// kernel: discriminator_forward.8
= control target key start
LH: loop header
LB: loop body
LE: loop exit
PB: predicated region body
PF: predicated region fallthrough
CT: control target
= control target key end

     0   :  { %s1276_s12 = smov 0   ;;  %s1278_s13 = smov 0   ;;  %s1426_s0 = inlined_call_operand.vmem [shape: bf16[512,128], index: 0, kind: input, shape index: {}]   ;;  %s1427_s1 = inlined_call_operand.vmem [shape: bf16[128,128], index: 1, kind: input, shape index: {}]   ;;  %s1428_s2 = inlined_call_operand.vmem [shape: f32[1,128], index: 2, kind: input, shape index: {}]   ;;  %s1429_s3 = inlined_call_operand.vmem [shape: f32[512,128], index: 3, kind: output, shape index: {}]  }
   0x1   :  { %s1280_s14 = smov 0  }
   0x2 LB: > { %s32_s15 = sadd.s32 1, %s1250_s13  ;;  %p1064_p0 = scmp.ge.s32.totalorder %s1254_s14, 1  ;;  %s1254_s14 = sphi %s1280_s14, %s13_s14   ;;  %s1250_s13 = sphi %s1278_s13, %s1431_s13   ;;  %s1246_s12 = sphi %s1276_s12, %s1430_s12  }
   0x3   : > { %p34_p1 = scmp.ge.s32.totalorder %s32_s15, 2  ;;  %p188_p2 = scmp.lt.s32.totalorder %s1254_s14, 3 }
   0x5   : > { %s1433_s15 = smov (%p34_p1, %s32_s15), 0  ;;  %p189_p3 = pnand %p1064_p0, %p188_p2 }
   0x6   : > { %v1208_v0 = vld [vmem:[%s1427_s1] sm:$0xff] (!%p189_p3)   ;;  %s1065_s18 = sshll.u32 (!%p189_p3), %s1246_s12, 5  ;;  %v1209_v1 = vld [vmem:[%s1427_s1 + $0x8] sm:$0xff] (!%p189_p3)   ;;  %v1210_v2 = vld [vmem:[%s1427_s1 + $0x10] sm:$0xff] (!%p189_p3)  }
   0x7   : > { %192 = sbr.rel (%p189_p3) target bundleno = 288 (0x120), region = 32  ;;  %p230_p4 = scmp.lt.s32.totalorder (!%p189_p3), %s1065_s18, 63  ;;  %1120 = vmatprep.subr.bf16.mxu0 (!%p189_p3), %v1208_v0  ;;  %1168 = vmatprep.subr.bf16.mxu1 (!%p189_p3), %v1208_v0  ;;  %v1211_v3 = vld [vmem:[%s1427_s1 + $0x18] sm:$0xff] (!%p189_p3)   ;;  %v1212_v6 = vld [vmem:[%s1427_s1 + $0x20] sm:$0xff] (!%p189_p3)   ;;  %v1213_v7 = vld [vmem:[%s1427_s1 + $0x28] sm:$0xff] (!%p189_p3)  }
   0x8   : > { %1121 = vmatpush3.bf16.msra.mxu0 (!%p189_p3), %v1208_v0  ;;  %1176 = vmatpush3.bf16.msra.mxu1 (!%p189_p3), %v1208_v0  ;;  %v1214_v8 = vld [vmem:[%s1427_s1 + $0x30] sm:$0xff] (!%p189_p3)   ;;  %v1215_v9 = vld [vmem:[%s1427_s1 + $0x38] sm:$0xff] (!%p189_p3)   ;;  %v1345_v24 = vld [vmem:[%s1428_s2] ss:$0 sm:$0xff] (!%p189_p3) }
   0x9   : > { %1122 = vmatprep.subr.bf16.mxu0 (!%p189_p3), %v1209_v1  ;;  %1169 = vmatprep.subr.bf16.mxu1 (!%p189_p3), %v1209_v1 }
   0xc   : > { %1123 = vmatpush3.bf16.msra.mxu0 (!%p189_p3), %v1209_v1  ;;  %1177 = vmatpush3.bf16.msra.mxu1 (!%p189_p3), %v1209_v1 }
   0xd   : > { %1124 = vmatprep.subr.bf16.mxu0 (!%p189_p3), %v1210_v2  ;;  %1170 = vmatprep.subr.bf16.mxu1 (!%p189_p3), %v1210_v2 }
   0xe   : > { %s1435_s18 = smov (!%p230_p4, %s1065_s18), 63 }
   0xf   : > { %s1066_s23 = sshll.u32 %s1435_s18, 2  ;;  %s1068_s12 = sshll.u32 %s1435_s18, 3 }
  0x10   : > { %s1309_s26 = scalar_lea.vmem %s1426_s0, %s1066_s23  ;;  %1125 = vmatpush3.bf16.msra.mxu0 %v1210_v2  ;;  %1178 = vmatpush3.bf16.msra.mxu1 %v1210_v2  ;;  %s1355_s19 = scalar_lea.vmem %s1429_s3, %s1068_s12 }
  0x11   : > { %v1216_v4 = vld [vmem:[%s1309_s26] sm:$0xff]   ;;  %1126 = vmatprep.subr.bf16.mxu0 %v1211_v3  ;;  %1171 = vmatprep.subr.bf16.mxu1 %v1211_v3  ;;  %v1218_v10 = vld [vmem:[%s1309_s26 + $0x8] sm:$0xff]   ;;  %v1220_v12 = vld [vmem:[%s1309_s26 + $0x10] sm:$0xff]  }
  0x12   : > { %v1217_v5 = vld [vmem:[%s1309_s26 + $0x40] sm:$0xff]   ;;  %1136 = vmatprep.mubr.bf16.mxu0 %v1216_v4  ;;  %v1219_v11 = vld [vmem:[%s1309_s26 + $0x48] sm:$0xff]   ;;  %v1221_v13 = vld [vmem:[%s1309_s26 + $0x50] sm:$0xff]  }
  0x13   : > { %1152 = vmatprep.mubr.bf16.mxu1 %v1217_v5  ;;  %v1222_v14 = vld [vmem:[%s1309_s26 + $0x18] sm:$0xff]   ;;  %v1224_v16 = vld [vmem:[%s1309_s26 + $0x20] sm:$0xff]   ;;  %v1226_v18 = vld [vmem:[%s1309_s26 + $0x28] sm:$0xff]  }
  0x14   : > { %1127 = vmatpush3.bf16.msra.mxu0 %v1211_v3  ;;  %1179 = vmatpush3.bf16.msra.mxu1 %v1211_v3  ;;  %v1223_v15 = vld [vmem:[%s1309_s26 + $0x58] sm:$0xff]   ;;  %v1225_v17 = vld [vmem:[%s1309_s26 + $0x60] sm:$0xff]   ;;  %v1227_v19 = vld [vmem:[%s1309_s26 + $0x68] sm:$0xff]  }
  0x15   : > { %1128 = vmatprep.subr.bf16.mxu0 %v1212_v6  ;;  %1172 = vmatprep.subr.bf16.mxu1 %v1212_v6  ;;  %v1228_v20 = vld [vmem:[%s1309_s26 + $0x30] sm:$0xff]   ;;  %v1230_v22 = vld [vmem:[%s1309_s26 + $0x38] sm:$0xff]  }
  0x16   : > { %v1229_v21 = vld [vmem:[%s1309_s26 + $0x70] sm:$0xff]   ;;  %v1231_v23 = vld [vmem:[%s1309_s26 + $0x78] sm:$0xff]  }
  0x18   : > { %1129 = vmatpush3.bf16.msra.mxu0 %v1212_v6  ;;  %1180 = vmatpush3.bf16.msra.mxu1 %v1212_v6 }
  0x19   : > { %1130 = vmatprep.subr.bf16.mxu0 %v1213_v7  ;;  %1173 = vmatprep.subr.bf16.mxu1 %v1213_v7 }
  0x1c   : > { %1131 = vmatpush3.bf16.msra.mxu0 %v1213_v7  ;;  %1181 = vmatpush3.bf16.msra.mxu1 %v1213_v7 }
  0x1d   : > { %1132 = vmatprep.subr.bf16.mxu0 %v1214_v8  ;;  %1174 = vmatprep.subr.bf16.mxu1 %v1214_v8 }
  0x20   : > { %1133 = vmatpush3.bf16.msra.mxu0 %v1214_v8  ;;  %1182 = vmatpush3.bf16.msra.mxu1 %v1214_v8 }
  0x21   : > { %1134 = vmatprep.subr.bf16.mxu0 %v1215_v9  ;;  %1175 = vmatprep.subr.bf16.mxu1 %v1215_v9 }
  0x24   : > { %1135 = vmatpush3.bf16.msra.mxu0 %v1215_v9  ;;  %1183 = vmatpush3.bf16.msra.mxu1 %v1215_v9 }
  0x27   : > { %1137 = vmatmul.mubr.bf16.vlgmr.msra.gmra.mrb[0].mxu0 %v1218_v10  ;;  %1153 = vmatmul.mubr.bf16.vlgmr.msra.gmra.mrb[0].mxu1 %v1219_v11 }
  0x28   : > { %1140 = vmatprep.mubr.bf16.mxu0 %v1220_v12  ;;  %1156 = vmatprep.mubr.bf16.mxu1 %v1221_v13 }
  0x2f   : > { %1141 = vmatmul.mubr.bf16.gmra.mrb[4].mxu0 %v1222_v14  ;;  %1157 = vmatmul.mubr.bf16.gmra.mrb[4].mxu1 %v1223_v15 }
  0x30   : > { %1144 = vmatprep.mubr.bf16.mxu0 %v1224_v16  ;;  %1160 = vmatprep.mubr.bf16.mxu1 %v1225_v17 }
  0x37   : > { %1145 = vmatmul.mubr.bf16.gmra.mrb[8].mxu0 %v1226_v18  ;;  %1161 = vmatmul.mubr.bf16.gmra.mrb[8].mxu1 %v1227_v19 }
  0x38   : > { %1148 = vmatprep.mubr.bf16.mxu0 %v1228_v20  ;;  %1164 = vmatprep.mubr.bf16.mxu1 %v1229_v21 }
  0x3f   : > { %1149 = vmatmul.mubr.bf16.gmra.mrb[12].mxu0 %v1230_v22  ;;  %1165 = vmatmul.mubr.bf16.gmra.mrb[12].mxu1 %v1231_v23 }
  0xfa   : > { %v1138_v25 = vpop.f32.mrb[0].mxu0  ;;  %v1154_v26 = vpop.f32.mrb[0].mxu1 }
  0xfb   : > { %v789_v27 = vadd.f32 %v1138_v25, %v1345_v24  ;;  %v805_v28 = vadd.f32 %v1154_v26, %v1345_v24  ;;  %v554_v29 = vpop.f32.mrb[1].mxu0  ;;  %v618_v30 = vpop.f32.mrb[1].mxu1 }
  0xfc   : > { %v787_v31 = vadd.f32 %v1345_v24, %v554_v29  ;;  %v803_v32 = vadd.f32 %v1345_v24, %v618_v30  ;;  %v1139_v33 = vpop.f32.mrb[2].mxu0  ;;  %v1155_v34 = vpop.f32.mrb[2].mxu1 }
  0xfd   : > { %vm821_vm0 = vcmp.ge.f32.partialorder %v789_v27, 0.0  ;;  %v853_v35 = vmul.f32 0.2, %v789_v27  ;;  %vm837_vm1 = vcmp.ge.f32.partialorder %v805_v28, 0.0  ;;  %v869_v36 = vmul.f32 0.2, %v805_v28 }
  0xfe   : > { %vm819_vm2 = vcmp.ge.f32.partialorder %v787_v31, 0.0  ;;  %v851_v37 = vmul.f32 0.2, %v787_v31  ;;  %vm835_vm3 = vcmp.ge.f32.partialorder %v803_v32, 0.0  ;;  %v867_v38 = vmul.f32 0.2, %v803_v32 }
  0xff   : > { %v885_v39 = vsel %vm821_vm0, %v789_v27, %v853_v35  ;;  %v901_v40 = vsel %vm837_vm1, %v805_v28, %v869_v36  ;;  %v790_v41 = vadd.f32 %v1139_v33, %v1345_v24  ;;  %v806_v42 = vadd.f32 %v1155_v34, %v1345_v24  ;;  %v557_v43 = vpop.f32.mrb[3].mxu0  ;;  %v621_v44 = vpop.f32.mrb[3].mxu1 }
 0x100   : > { %917 = vst [vmem:[%s1355_s19 + $0x10] sm:$0xff] %v885_v39  ;;  %933 = vst [vmem:[%s1355_s19 + $0x90] sm:$0xff] %v901_v40  ;;  %v883_v45 = vsel %vm819_vm2, %v787_v31, %v851_v37  ;;  %v899_v46 = vsel %vm835_vm3, %v803_v32, %v867_v38  ;;  %v788_v47 = vadd.f32 %v1345_v24, %v557_v43 }
 0x101   : > { %v804_v48 = vadd.f32 %v1345_v24, %v621_v44  ;;  %915 = vst [vmem:[%s1355_s19] sm:$0xff] %v883_v45  ;;  %931 = vst [vmem:[%s1355_s19 + $0x80] sm:$0xff] %v899_v46  ;;  %vm822_vm4 = vcmp.ge.f32.partialorder %v790_v41, 0.0  ;;  %v854_v49 = vmul.f32 0.2, %v790_v41  ;;  %vm838_vm5 = vcmp.ge.f32.partialorder %v806_v42, 0.0 }
 0x102   : > { %v870_v50 = vmul.f32 0.2, %v806_v42  ;;  %vm820_vm6 = vcmp.ge.f32.partialorder %v788_v47, 0.0  ;;  %v852_v51 = vmul.f32 0.2, %v788_v47  ;;  %v1142_v55 = vpop.f32.mrb[4].mxu0 }
 0x103   : > { %vm836_vm7 = vcmp.ge.f32.partialorder %v804_v48, 0.0  ;;  %v868_v52 = vmul.f32 0.2, %v804_v48  ;;  %v886_v53 = vsel %vm822_vm4, %v790_v41, %v854_v49  ;;  %v1158_v56 = vpop.f32.mrb[4].mxu1  ;;  %v793_v59 = vadd.f32 %v1142_v55, %v1345_v24  ;;  %v570_v61 = vpop.f32.mrb[5].mxu0 }
 0x104   : > { %v902_v54 = vsel %vm838_vm5, %v806_v42, %v870_v50  ;;  %918 = vst [vmem:[%s1355_s19 + $0x18] sm:$0xff] %v886_v53  ;;  %v884_v57 = vsel %vm820_vm6, %v788_v47, %v852_v51  ;;  %v809_v60 = vadd.f32 %v1158_v56, %v1345_v24  ;;  %v634_v62 = vpop.f32.mrb[5].mxu1  ;;  %v791_v63 = vadd.f32 %v1345_v24, %v570_v61  ;;  %v1143_v1 = vpop.f32.mrb[6].mxu0 }
 0x105   : > { %934 = vst [vmem:[%s1355_s19 + $0x98] sm:$0xff] %v902_v54  ;;  %v900_v58 = vsel %vm836_vm7, %v804_v48, %v868_v52  ;;  %916 = vst [vmem:[%s1355_s19 + $0x8] sm:$0xff] %v884_v57  ;;  %v807_v0 = vadd.f32 %v1345_v24, %v634_v62  ;;  %v1159_v2 = vpop.f32.mrb[6].mxu1  ;;  %vm825_vm8 = vcmp.ge.f32.partialorder %v793_v59, 0.0  ;;  %v857_v3 = vmul.f32 0.2, %v793_v59 }
 0x106   : > { %932 = vst [vmem:[%s1355_s19 + $0x88] sm:$0xff] %v900_v58  ;;  %vm841_vm9 = vcmp.ge.f32.partialorder %v809_v60, 0.0  ;;  %v873_v4 = vmul.f32 0.2, %v809_v60  ;;  %vm823_vm10 = vcmp.ge.f32.partialorder %v791_v63, 0.0  ;;  %v794_v9 = vadd.f32 %v1143_v1, %v1345_v24  ;;  %v573_v11 = vpop.f32.mrb[7].mxu0 }
 0x107   : > { %v855_v5 = vmul.f32 0.2, %v791_v63  ;;  %vm839_vm11 = vcmp.ge.f32.partialorder %v807_v0, 0.0  ;;  %v871_v6 = vmul.f32 0.2, %v807_v0  ;;  %v889_v7 = vsel %vm825_vm8, %v793_v59, %v857_v3  ;;  %v637_v12 = vpop.f32.mrb[7].mxu1 }
 0x108   : > { %v905_v8 = vsel %vm841_vm9, %v809_v60, %v873_v4  ;;  %v810_v10 = vadd.f32 %v1159_v2, %v1345_v24  ;;  %921 = vst [vmem:[%s1355_s19 + $0x30] sm:$0xff] %v889_v7  ;;  %v792_v15 = vadd.f32 %v1345_v24, %v573_v11  ;;  %v808_v16 = vadd.f32 %v1345_v24, %v637_v12 }
 0x109   : > { %937 = vst [vmem:[%s1355_s19 + $0xb0] sm:$0xff] %v905_v8  ;;  %v887_v13 = vsel %vm823_vm10, %v791_v63, %v855_v5  ;;  %v903_v14 = vsel %vm839_vm11, %v807_v0, %v871_v6  ;;  %vm826_vm12 = vcmp.ge.f32.partialorder %v794_v9, 0.0  ;;  %v858_v17 = vmul.f32 0.2, %v794_v9 }
 0x10a   : > { %919 = vst [vmem:[%s1355_s19 + $0x20] sm:$0xff] %v887_v13  ;;  %935 = vst [vmem:[%s1355_s19 + $0xa0] sm:$0xff] %v903_v14  ;;  %vm842_vm13 = vcmp.ge.f32.partialorder %v810_v10, 0.0  ;;  %v874_v18 = vmul.f32 0.2, %v810_v10  ;;  %vm824_vm14 = vcmp.ge.f32.partialorder %v792_v15, 0.0 }
 0x10b   : > { %v856_v19 = vmul.f32 0.2, %v792_v15  ;;  %vm840_vm15 = vcmp.ge.f32.partialorder %v808_v16, 0.0  ;;  %v872_v20 = vmul.f32 0.2, %v808_v16  ;;  %v890_v21 = vsel %vm826_vm12, %v794_v9, %v858_v17  ;;  %v1146_v23 = vpop.f32.mrb[8].mxu0 }
 0x10c   : > { %v906_v22 = vsel %vm842_vm13, %v810_v10, %v874_v18  ;;  %v1162_v25 = vpop.f32.mrb[8].mxu1  ;;  %922 = vst [vmem:[%s1355_s19 + $0x38] sm:$0xff] %v890_v21  ;;  %v797_v28 = vadd.f32 %v1146_v23, %v1345_v24  ;;  %v586_v30 = vpop.f32.mrb[9].mxu0 }
 0x10d   : > { %938 = vst [vmem:[%s1355_s19 + $0xb8] sm:$0xff] %v906_v22  ;;  %v888_v26 = vsel %vm824_vm14, %v792_v15, %v856_v19  ;;  %v904_v27 = vsel %vm840_vm15, %v808_v16, %v872_v20  ;;  %v813_v29 = vadd.f32 %v1162_v25, %v1345_v24  ;;  %v650_v31 = vpop.f32.mrb[9].mxu1  ;;  %v795_v32 = vadd.f32 %v1345_v24, %v586_v30  ;;  %v1147_v34 = vpop.f32.mrb[10].mxu0 }
 0x10e   : > { %920 = vst [vmem:[%s1355_s19 + $0x28] sm:$0xff] %v888_v26  ;;  %936 = vst [vmem:[%s1355_s19 + $0xa8] sm:$0xff] %v904_v27  ;;  %v811_v33 = vadd.f32 %v1345_v24, %v650_v31  ;;  %v1163_v35 = vpop.f32.mrb[10].mxu1  ;;  %vm829_vm0 = vcmp.ge.f32.partialorder %v797_v28, 0.0  ;;  %v861_v36 = vmul.f32 0.2, %v797_v28  ;;  %v798_v42 = vadd.f32 %v1147_v34, %v1345_v24 }
 0x10f   : > { %vm845_vm1 = vcmp.ge.f32.partialorder %v813_v29, 0.0  ;;  %v877_v37 = vmul.f32 0.2, %v813_v29  ;;  %vm827_vm2 = vcmp.ge.f32.partialorder %v795_v32, 0.0  ;;  %v859_v38 = vmul.f32 0.2, %v795_v32 }
 0x110   : > { %vm843_vm3 = vcmp.ge.f32.partialorder %v811_v33, 0.0  ;;  %v875_v39 = vmul.f32 0.2, %v811_v33  ;;  %v893_v40 = vsel %vm829_vm0, %v797_v28, %v861_v36  ;;  %v814_v43 = vadd.f32 %v1163_v35, %v1345_v24  ;;  %v589_v44 = vpop.f32.mrb[11].mxu0  ;;  %v653_v45 = vpop.f32.mrb[11].mxu1 }
 0x111   : > { %v909_v41 = vsel %vm845_vm1, %v813_v29, %v877_v37  ;;  %925 = vst [vmem:[%s1355_s19 + $0x50] sm:$0xff] %v893_v40  ;;  %v891_v46 = vsel %vm827_vm2, %v795_v32, %v859_v38  ;;  %v796_v48 = vadd.f32 %v1345_v24, %v589_v44  ;;  %v812_v49 = vadd.f32 %v1345_v24, %v653_v45 }
 0x112   : > { %941 = vst [vmem:[%s1355_s19 + $0xd0] sm:$0xff] %v909_v41  ;;  %v907_v47 = vsel %vm843_vm3, %v811_v33, %v875_v39  ;;  %v1150_v50 = vpop.f32.mrb[12].mxu0  ;;  %v1166_v51 = vpop.f32.mrb[12].mxu1  ;;  %923 = vst [vmem:[%s1355_s19 + $0x40] sm:$0xff] %v891_v46  ;;  %vm830_vm4 = vcmp.ge.f32.partialorder %v798_v42, 0.0  ;;  %vm846_vm5 = vcmp.ge.f32.partialorder %v814_v43, 0.0 }
 0x113   : > { %939 = vst [vmem:[%s1355_s19 + $0xc0] sm:$0xff] %v907_v47  ;;  %v862_v52 = vmul.f32 0.2, %v798_v42  ;;  %v878_v53 = vmul.f32 0.2, %v814_v43  ;;  %vm828_vm6 = vcmp.ge.f32.partialorder %v796_v48, 0.0  ;;  %v801_v58 = vadd.f32 %v1150_v50, %v1345_v24 }
 0x114   : > { %v860_v54 = vmul.f32 0.2, %v796_v48  ;;  %vm844_vm7 = vcmp.ge.f32.partialorder %v812_v49, 0.0  ;;  %v876_v55 = vmul.f32 0.2, %v812_v49  ;;  %v817_v59 = vadd.f32 %v1166_v51, %v1345_v24  ;;  %v602_v60 = vpop.f32.mrb[13].mxu0 }
 0x115   : > { %v894_v56 = vsel %vm830_vm4, %v798_v42, %v862_v52  ;;  %v910_v57 = vsel %vm846_vm5, %v814_v43, %v878_v53  ;;  %v666_v61 = vpop.f32.mrb[13].mxu1  ;;  %v799_v0 = vadd.f32 %v1345_v24, %v602_v60  ;;  %v1151_v2 = vpop.f32.mrb[14].mxu0  ;;  %vm833_vm8 = vcmp.ge.f32.partialorder %v801_v58, 0.0 }
 0x116   : > { %926 = vst [vmem:[%s1355_s19 + $0x58] sm:$0xff] %v894_v56  ;;  %942 = vst [vmem:[%s1355_s19 + $0xd8] sm:$0xff] %v910_v57  ;;  %v892_v62 = vsel %vm828_vm6, %v796_v48, %v860_v54  ;;  %v908_v63 = vsel %vm844_vm7, %v812_v49, %v876_v55  ;;  %v815_v1 = vadd.f32 %v1345_v24, %v666_v61  ;;  %v1167_v3 = vpop.f32.mrb[14].mxu1  ;;  %v865_v4 = vmul.f32 0.2, %v801_v58  ;;  %v605_v12 = vpop.f32.mrb[15].mxu0 }
 0x117   : > { %924 = vst [vmem:[%s1355_s19 + $0x48] sm:$0xff] %v892_v62  ;;  %940 = vst [vmem:[%s1355_s19 + $0xc8] sm:$0xff] %v908_v63  ;;  %vm849_vm9 = vcmp.ge.f32.partialorder %v817_v59, 0.0  ;;  %v881_v5 = vmul.f32 0.2, %v817_v59  ;;  %vm831_vm10 = vcmp.ge.f32.partialorder %v799_v0, 0.0  ;;  %v802_v10 = vadd.f32 %v1151_v2, %v1345_v24 }
 0x118   : > { %v863_v6 = vmul.f32 0.2, %v799_v0  ;;  %vm847_vm11 = vcmp.ge.f32.partialorder %v815_v1, 0.0  ;;  %v879_v7 = vmul.f32 0.2, %v815_v1  ;;  %v897_v8 = vsel %vm833_vm8, %v801_v58, %v865_v4  ;;  %v669_v13 = vpop.f32.mrb[15].mxu1 }
 0x119   : > { %v913_v9 = vsel %vm849_vm9, %v817_v59, %v881_v5  ;;  %v818_v11 = vadd.f32 %v1167_v3, %v1345_v24  ;;  %929 = vst [vmem:[%s1355_s19 + $0x70] sm:$0xff] %v897_v8  ;;  %v800_v16 = vadd.f32 %v1345_v24, %v605_v12  ;;  %v816_v17 = vadd.f32 %v1345_v24, %v669_v13 }
 0x11a   : > { %945 = vst [vmem:[%s1355_s19 + $0xf0] sm:$0xff] %v913_v9  ;;  %v895_v14 = vsel %vm831_vm10, %v799_v0, %v863_v6  ;;  %v911_v15 = vsel %vm847_vm11, %v815_v1, %v879_v7  ;;  %vm834_vm12 = vcmp.ge.f32.partialorder %v802_v10, 0.0  ;;  %v866_v18 = vmul.f32 0.2, %v802_v10 }
 0x11b   : > { %927 = vst [vmem:[%s1355_s19 + $0x60] sm:$0xff] %v895_v14  ;;  %943 = vst [vmem:[%s1355_s19 + $0xe0] sm:$0xff] %v911_v15  ;;  %vm850_vm13 = vcmp.ge.f32.partialorder %v818_v11, 0.0  ;;  %v882_v19 = vmul.f32 0.2, %v818_v11  ;;  %vm832_vm14 = vcmp.ge.f32.partialorder %v800_v16, 0.0 }
 0x11c   : > { %v864_v20 = vmul.f32 0.2, %v800_v16  ;;  %vm848_vm15 = vcmp.ge.f32.partialorder %v816_v17, 0.0  ;;  %v880_v21 = vmul.f32 0.2, %v816_v17  ;;  %v898_v22 = vsel %vm834_vm12, %v802_v10, %v866_v18 }
 0x11d   : > { %v914_v23 = vsel %vm850_vm13, %v818_v11, %v882_v19  ;;  %930 = vst [vmem:[%s1355_s19 + $0x78] sm:$0xff] %v898_v22 }
 0x11e   : > { %946 = vst [vmem:[%s1355_s19 + $0xf8] sm:$0xff] %v914_v23  ;;  %v896_v25 = vsel %vm832_vm14, %v800_v16, %v864_v20  ;;  %v912_v26 = vsel %vm848_vm15, %v816_v17, %v880_v21 }
 0x11f   : > { %928 = vst [vmem:[%s1355_s19 + $0x68] sm:$0xff] %v896_v25  ;;  %944 = vst [vmem:[%s1355_s19 + $0xe8] sm:$0xff] %v912_v26 }
 0x120 PF: > { %s13_s14 = sadd.s32 1, %s1254_s14   ;;  %s1430_s12 = smov %s1250_s13 }
 0x121   : > { %p10_p5 = scmp.ge.s32.totalorder %s13_s14, 4   ;;  %s1431_s13 = smov %s1433_s15 }
 0x123   :  { %12 = sbr.rel (!%p10_p5) target bundleno = 2 (0x2), region = 76 }

// kernel: discriminator_forward.9
= control target key start
LH: loop header
LB: loop body
LE: loop exit
PB: predicated region body
PF: predicated region fallthrough
CT: control target
= control target key end

     0   :  { %s1609_s12 = smov 0   ;;  %s1611_s13 = smov 0   ;;  %s1863_s0 = inlined_call_operand.vmem [shape: bf16[128,1024], index: 0, kind: input, shape index: {}]   ;;  %s1864_s1 = inlined_call_operand.vmem [shape: bf16[1024,128], index: 1, kind: input, shape index: {}]   ;;  %s1865_s2 = inlined_call_operand.vmem [shape: f32[1,128], index: 2, kind: input, shape index: {}]   ;;  %s1866_s3 = inlined_call_operand.vmem [shape: f32[128,128], index: 3, kind: output, shape index: {}]  }
   0x1   :  { %s1613_s14 = smov 0   ;;  %s1615_s15 = smov 0  }
   0x2   :  { %s1617_s16 = smov 0  }
   0x3 LB: > { %s25_s17 = sadd.s32 1, %s1582_s15  ;;  %p48_p1 = scmp.ne.s32.totalorder %s1574_s13, %s1570_s12  ;;  %s1586_s16 = sphi %s1617_s16, %s13_s16   ;;  %s1582_s15 = sphi %s1615_s15, %s1870_s15   ;;  %s1578_s14 = sphi %s1613_s14, %s1869_s14   ;;  %s1574_s13 = sphi %s1611_s13, %s1868_s13   ;;  %s1570_s12 = sphi %s1609_s12, %s1867_s12  }
   0x4   : > { %p26_p0 = scmp.ge.s32.totalorder %s25_s17, 2  ;;  %p49_p2 = scmp.eq.s32.totalorder %s1586_s16, 0 }
   0x5   : > { %s41_s19 = sadd.s32 1, %s1574_s13  ;;  %p1219_p5 = scmp.ge.s32.totalorder %s1586_s16, 2 }
   0x6   : > { %s1872_s17 = smov (%p26_p0, %s25_s17), 0  ;;  %p50_p3 = por %p49_p2, %p48_p1 }
   0x7   : > { %s37_s18 = ssub.s32 %s1582_s15, %s1872_s17  ;;  %162 = sbr.rel (%p1219_p5) target bundleno = 34 (0x22), region = 20 }
   0x8   : > { %p39_p4 = scmp.eq.s32.totalorder %s37_s18, 0 }
   0xa   : > { %s1644_s20 = scalar_select %p39_p4, %s1574_s13, %s41_s19  }
   0xe   : > { %165 = sbr.rel (!%p50_p3) target bundleno = 34 (0x22), region = 24  ;;  %s167_s21 = sand.u32 (%p50_p3), 1, %s1574_s13  }
   0xf   : > { %s1298_s22 = sshll.u32 (%p50_p3), %s1582_s15, 4  ;;  %s1220_s23 = sshll.u32 (%p50_p3), %s167_s21, 8 }
  0x10   : > { %s1652_s26 = scalar_lea.vmem (%p50_p3), %s1863_s0, %s1298_s22  ;;  %s1657_s27 = scalar_lea.vmem (%p50_p3), [#allocation3], %s1220_s23 }
  0x11   : > { %v188_v0 = vld [vmem:[%s1652_s26] sm:$0xff] (%p50_p3)  ;;  %v190_v1 = vld [vmem:[%s1652_s26 + $0x8] sm:$0xff] (%p50_p3) }
  0x12   : > { %v192_v2 = vld [vmem:[%s1652_s26 + $0x20] sm:$0xff] (%p50_p3)  ;;  %189 = vst [vmem:[%s1657_s27] sm:$0xff] (%p50_p3), %v188_v0  ;;  %191 = vst [vmem:[%s1657_s27 + $0x8] sm:$0xff] (%p50_p3), %v190_v1  ;;  %v194_v3 = vld [vmem:[%s1652_s26 + $0x28] sm:$0xff] (%p50_p3) }
  0x13   : > { %193 = vst [vmem:[%s1657_s27 + $0x10] sm:$0xff] (%p50_p3), %v192_v2  ;;  %v196_v4 = vld [vmem:[%s1652_s26 + $0x40] sm:$0xff] (%p50_p3)  ;;  %v198_v5 = vld [vmem:[%s1652_s26 + $0x48] sm:$0xff] (%p50_p3)  ;;  %195 = vst [vmem:[%s1657_s27 + $0x18] sm:$0xff] (%p50_p3), %v194_v3 }
  0x14   : > { %197 = vst [vmem:[%s1657_s27 + $0x20] sm:$0xff] (%p50_p3), %v196_v4  ;;  %199 = vst [vmem:[%s1657_s27 + $0x28] sm:$0xff] (%p50_p3), %v198_v5  ;;  %v200_v6 = vld [vmem:[%s1652_s26 + $0x60] sm:$0xff] (%p50_p3)  ;;  %v202_v7 = vld [vmem:[%s1652_s26 + $0x68] sm:$0xff] (%p50_p3) }
  0x15   : > { %v204_v8 = vld [vmem:[%s1652_s26 + $0x80] sm:$0xff]  ;;  %201 = vst [vmem:[%s1657_s27 + $0x30] sm:$0xff] %v200_v6  ;;  %203 = vst [vmem:[%s1657_s27 + $0x38] sm:$0xff] %v202_v7  ;;  %v206_v9 = vld [vmem:[%s1652_s26 + $0x88] sm:$0xff] }
  0x16   : > { %205 = vst [vmem:[%s1657_s27 + $0x40] sm:$0xff] %v204_v8  ;;  %v208_v10 = vld [vmem:[%s1652_s26 + $0xa0] sm:$0xff]  ;;  %v210_v11 = vld [vmem:[%s1652_s26 + $0xa8] sm:$0xff]  ;;  %207 = vst [vmem:[%s1657_s27 + $0x48] sm:$0xff] %v206_v9 }
  0x17   : > { %209 = vst [vmem:[%s1657_s27 + $0x50] sm:$0xff] %v208_v10  ;;  %211 = vst [vmem:[%s1657_s27 + $0x58] sm:$0xff] %v210_v11  ;;  %v212_v12 = vld [vmem:[%s1652_s26 + $0xc0] sm:$0xff]  ;;  %v214_v13 = vld [vmem:[%s1652_s26 + $0xc8] sm:$0xff] }
  0x18   : > { %v216_v14 = vld [vmem:[%s1652_s26 + $0xe0] sm:$0xff]  ;;  %213 = vst [vmem:[%s1657_s27 + $0x60] sm:$0xff] %v212_v12  ;;  %215 = vst [vmem:[%s1657_s27 + $0x68] sm:$0xff] %v214_v13  ;;  %v218_v15 = vld [vmem:[%s1652_s26 + $0xe8] sm:$0xff] }
  0x19   : > { %217 = vst [vmem:[%s1657_s27 + $0x70] sm:$0xff] %v216_v14  ;;  %v220_v16 = vld [vmem:[%s1652_s26 + $0x100] sm:$0xff]  ;;  %v222_v17 = vld [vmem:[%s1652_s26 + $0x108] sm:$0xff]  ;;  %219 = vst [vmem:[%s1657_s27 + $0x78] sm:$0xff] %v218_v15 }
  0x1a   : > { %221 = vst [vmem:[%s1657_s27 + $0x80] sm:$0xff] %v220_v16  ;;  %223 = vst [vmem:[%s1657_s27 + $0x88] sm:$0xff] %v222_v17  ;;  %v224_v18 = vld [vmem:[%s1652_s26 + $0x120] sm:$0xff]  ;;  %v226_v19 = vld [vmem:[%s1652_s26 + $0x128] sm:$0xff] }
  0x1b   : > { %v228_v20 = vld [vmem:[%s1652_s26 + $0x140] sm:$0xff]  ;;  %225 = vst [vmem:[%s1657_s27 + $0x90] sm:$0xff] %v224_v18  ;;  %227 = vst [vmem:[%s1657_s27 + $0x98] sm:$0xff] %v226_v19  ;;  %v230_v21 = vld [vmem:[%s1652_s26 + $0x148] sm:$0xff] }
  0x1c   : > { %229 = vst [vmem:[%s1657_s27 + $0xa0] sm:$0xff] %v228_v20  ;;  %v232_v22 = vld [vmem:[%s1652_s26 + $0x160] sm:$0xff]  ;;  %v234_v23 = vld [vmem:[%s1652_s26 + $0x168] sm:$0xff]  ;;  %231 = vst [vmem:[%s1657_s27 + $0xa8] sm:$0xff] %v230_v21 }
  0x1d   : > { %233 = vst [vmem:[%s1657_s27 + $0xb0] sm:$0xff] %v232_v22  ;;  %235 = vst [vmem:[%s1657_s27 + $0xb8] sm:$0xff] %v234_v23  ;;  %v236_v24 = vld [vmem:[%s1652_s26 + $0x180] sm:$0xff]  ;;  %v238_v25 = vld [vmem:[%s1652_s26 + $0x188] sm:$0xff] }
  0x1e   : > { %v240_v26 = vld [vmem:[%s1652_s26 + $0x1a0] sm:$0xff]  ;;  %237 = vst [vmem:[%s1657_s27 + $0xc0] sm:$0xff] %v236_v24  ;;  %239 = vst [vmem:[%s1657_s27 + $0xc8] sm:$0xff] %v238_v25  ;;  %v242_v27 = vld [vmem:[%s1652_s26 + $0x1a8] sm:$0xff] }
  0x1f   : > { %241 = vst [vmem:[%s1657_s27 + $0xd0] sm:$0xff] %v240_v26  ;;  %v244_v28 = vld [vmem:[%s1652_s26 + $0x1c0] sm:$0xff]  ;;  %v246_v29 = vld [vmem:[%s1652_s26 + $0x1c8] sm:$0xff]  ;;  %243 = vst [vmem:[%s1657_s27 + $0xd8] sm:$0xff] %v242_v27 }
  0x20   : > { %245 = vst [vmem:[%s1657_s27 + $0xe0] sm:$0xff] %v244_v28  ;;  %247 = vst [vmem:[%s1657_s27 + $0xe8] sm:$0xff] %v246_v29  ;;  %v248_v30 = vld [vmem:[%s1652_s26 + $0x1e0] sm:$0xff]  ;;  %v250_v31 = vld [vmem:[%s1652_s26 + $0x1e8] sm:$0xff] }
  0x21   : > { %249 = vst [vmem:[%s1657_s27 + $0xf0] sm:$0xff] %v248_v30  ;;  %251 = vst [vmem:[%s1657_s27 + $0xf8] sm:$0xff] %v250_v31 }
  0x22 PF: > { %p1223_p6 = scmp.ge.s32.totalorder %s1586_s16, 1  ;;  %p268_p7 = scmp.lt.s32.totalorder %s1586_s16, 3 }
  0x24   : > { %p269_p8 = pnand %p1223_p6, %p268_p7 }
  0x25   : > { %s275_s28 = sand.u32 (!%p269_p8), 1, %s1570_s12   ;;  %s1225_s29 = sshll.u32 (!%p269_p8), %s1578_s14, 6 }
  0x26   : > { %272 = sbr.rel (%p269_p8) target bundleno = 378 (0x17a), region = 51  ;;  %s1224_s30 = sshll.u32 (!%p269_p8), %s275_s28, 8 }
  0x27   : > { %p315_p9 = scmp.lt.s32.totalorder (!%p269_p8), %s1225_s29, 127  ;;  %s1729_s8 = scalar_lea.vmem (!%p269_p8), [#allocation3], %s1224_s30 }
  0x28   : > { %p1227_p10 = scmp.ne.s32.totalorder (!%p269_p8), %s1578_s14, 0 }
  0x2d   : > { %s1874_s29 = smov (!%p315_p9, %s1225_s29), 127  ;;  %339 = sbr.rel (%p1227_p10) target bundleno = 55 (0x37), region = 59 }
  0x2e   : > { %s1226_s4 = sshll.u32 %s1874_s29, 2  ;;  %v1588_v32 = vmov (!%p1227_p10), 0.0  }
  0x2f   : > { %s1727_s7 = scalar_lea.vmem %s1864_s1, %s1226_s4  ;;  %340 = vst [vmem:[#allocation2] sm:$0xff] (!%p1227_p10), %v1588_v32  ;;  %341 = vst [vmem:[#allocation2 + $0x8] sm:$0xff] (!%p1227_p10), %v1588_v32 }
  0x30   : > { %342 = vst [vmem:[#allocation2 + $0x10] sm:$0xff] (!%p1227_p10), %v1588_v32  ;;  %343 = vst [vmem:[#allocation2 + $0x18] sm:$0xff] (!%p1227_p10), %v1588_v32 }
  0x31   : > { %344 = vst [vmem:[#allocation2 + $0x20] sm:$0xff] (!%p1227_p10), %v1588_v32  ;;  %345 = vst [vmem:[#allocation2 + $0x28] sm:$0xff] (!%p1227_p10), %v1588_v32 }
  0x32   : > { %346 = vst [vmem:[#allocation2 + $0x30] sm:$0xff] (!%p1227_p10), %v1588_v32  ;;  %347 = vst [vmem:[#allocation2 + $0x38] sm:$0xff] (!%p1227_p10), %v1588_v32 }
  0x33   : > { %348 = vst [vmem:[#allocation2 + $0x40] sm:$0xff] (!%p1227_p10), %v1588_v32  ;;  %349 = vst [vmem:[#allocation2 + $0x48] sm:$0xff] (!%p1227_p10), %v1588_v32 }
  0x34   : > { %350 = vst [vmem:[#allocation2 + $0x50] sm:$0xff] %v1588_v32  ;;  %351 = vst [vmem:[#allocation2 + $0x58] sm:$0xff] %v1588_v32 }
  0x35   : > { %352 = vst [vmem:[#allocation2 + $0x60] sm:$0xff] %v1588_v32  ;;  %353 = vst [vmem:[#allocation2 + $0x68] sm:$0xff] %v1588_v32 }
  0x36   : > { %354 = vst [vmem:[#allocation2 + $0x70] sm:$0xff] %v1588_v32  ;;  %355 = vst [vmem:[#allocation2 + $0x78] sm:$0xff] %v1588_v32 }
  0x37 PF: > { %v1468_v33 = vld [vmem:[%s1727_s7 + $0x40] sm:$0xff]   ;;  %v1472_v37 = vld [vmem:[%s1727_s7 + $0x48] sm:$0xff]   ;;  %v1476_v41 = vld [vmem:[%s1727_s7 + $0x50] sm:$0xff]   ;;  %p1292_p11 = scmp.ne.s32.totalorder %s1578_s14, 1 }
  0x38   : > { %v1469_v34 = vld [vmem:[%s1727_s7 + $0xc0] sm:$0xff]   ;;  %1299 = vmatprep.subr.bf16.mxu0 %v1468_v33  ;;  %v1473_v38 = vld [vmem:[%s1727_s7 + $0xc8] sm:$0xff]   ;;  %v1477_v42 = vld [vmem:[%s1727_s7 + $0xd0] sm:$0xff]  }
  0x39   : > { %v1470_v35 = vld [vmem:[%s1727_s7] sm:$0xff]   ;;  %1363 = vmatprep.subr.bf16.mxu1 %v1469_v34  ;;  %v1474_v39 = vld [vmem:[%s1727_s7 + $0x8] sm:$0xff]   ;;  %v1478_v43 = vld [vmem:[%s1727_s7 + $0x10] sm:$0xff]  }
  0x3a   : > { %v1471_v36 = vld [vmem:[%s1727_s7 + $0x80] sm:$0xff]   ;;  %1300 = vmatpush3.bf16.msra.mxu0 %v1470_v35  ;;  %v1475_v40 = vld [vmem:[%s1727_s7 + $0x88] sm:$0xff]   ;;  %v1479_v44 = vld [vmem:[%s1727_s7 + $0x90] sm:$0xff]  }
  0x3b   : > { %1364 = vmatpush3.bf16.msra.mxu1 %v1471_v36  ;;  %1301 = vmatprep.subr.bf16.mxu0 %v1472_v37  ;;  %v1480_v45 = vld [vmem:[%s1727_s7 + $0x58] sm:$0xff]   ;;  %v1484_v49 = vld [vmem:[%s1727_s7 + $0x60] sm:$0xff]   ;;  %v1488_v53 = vld [vmem:[%s1727_s7 + $0x68] sm:$0xff]  }
  0x3c   : > { %1365 = vmatprep.subr.bf16.mxu1 %v1473_v38  ;;  %v1481_v46 = vld [vmem:[%s1727_s7 + $0xd8] sm:$0xff]   ;;  %v1485_v50 = vld [vmem:[%s1727_s7 + $0xe0] sm:$0xff]   ;;  %v1489_v54 = vld [vmem:[%s1727_s7 + $0xe8] sm:$0xff]  }
  0x3d   : > { %v1482_v47 = vld [vmem:[%s1727_s7 + $0x18] sm:$0xff]   ;;  %v1486_v51 = vld [vmem:[%s1727_s7 + $0x20] sm:$0xff]   ;;  %v1490_v55 = vld [vmem:[%s1727_s7 + $0x28] sm:$0xff]  }
  0x3e   : > { %1302 = vmatpush3.bf16.msra.mxu0 %v1474_v39  ;;  %v1483_v48 = vld [vmem:[%s1727_s7 + $0x98] sm:$0xff]   ;;  %v1487_v52 = vld [vmem:[%s1727_s7 + $0xa0] sm:$0xff]   ;;  %v1491_v56 = vld [vmem:[%s1727_s7 + $0xa8] sm:$0xff]  }
  0x3f   : > { %1366 = vmatpush3.bf16.msra.mxu1 %v1475_v40  ;;  %1303 = vmatprep.subr.bf16.mxu0 %v1476_v41  ;;  %v1492_v57 = vld [vmem:[%s1727_s7 + $0x70] sm:$0xff]   ;;  %v1496_v61 = vld [vmem:[%s1727_s7 + $0x78] sm:$0xff]  }
  0x40   : > { %1367 = vmatprep.subr.bf16.mxu1 %v1477_v42  ;;  %v1493_v58 = vld [vmem:[%s1727_s7 + $0xf0] sm:$0xff]   ;;  %v1497_v62 = vld [vmem:[%s1727_s7 + $0xf8] sm:$0xff]   ;;  %v356_v42 = vld [vmem:[#allocation2] sm:$0xff] }
  0x41   : > { %v1494_v59 = vld [vmem:[%s1727_s7 + $0x30] sm:$0xff]   ;;  %v1498_v63 = vld [vmem:[%s1727_s7 + $0x38] sm:$0xff]  }
  0x42   : > { %1304 = vmatpush3.bf16.msra.mxu0 %v1478_v43  ;;  %v1495_v60 = vld [vmem:[%s1727_s7 + $0xb0] sm:$0xff]   ;;  %v1499_v0 = vld [vmem:[%s1727_s7 + $0xb8] sm:$0xff]  }
  0x43   : > { %1368 = vmatpush3.bf16.msra.mxu1 %v1479_v44  ;;  %1305 = vmatprep.subr.bf16.mxu0 %v1480_v45  ;;  %v1500_v1 = vld [vmem:[%s1729_s8] ss:$16 sps:$4 sm:$0xff]   ;;  %v1502_v2 = vld [vmem:[%s1729_s8 + $0x4] ss:$16 sps:$4 sm:$0xff]   ;;  %v1503_v3 = vld [vmem:[%s1729_s8 + $0x8] ss:$16 sps:$4 sm:$0xff]  }
  0x44   : > { %1369 = vmatprep.subr.bf16.mxu1 %v1481_v46  ;;  %v1505_v4 = vld [vmem:[%s1729_s8 + $0xc] ss:$16 sps:$4 sm:$0xff]   ;;  %852 = vmatprep.mubr.bf16.mxu0 %v1502_v2  ;;  %v1506_v5 = vld [vmem:[%s1729_s8 + $0x24] ss:$16 sps:$4 sm:$0xff]   ;;  %v1510_v7 = vld [vmem:[%s1729_s8 + $0x20] ss:$16 sps:$4 sm:$0xff]  }
  0x45   : > { %949 = vmatprep.mubr.bf16.mxu1 %v1505_v4  ;;  %v1508_v6 = vld [vmem:[%s1729_s8 + $0x2c] ss:$16 sps:$4 sm:$0xff]   ;;  %v1511_v8 = vld [vmem:[%s1729_s8 + $0x28] ss:$16 sps:$4 sm:$0xff]   ;;  %v1512_v9 = vld [vmem:[%s1729_s8 + $0x44] ss:$16 sps:$4 sm:$0xff]  }
  0x46   : > { %1306 = vmatpush3.bf16.msra.mxu0 %v1482_v47  ;;  %v1514_v10 = vld [vmem:[%s1729_s8 + $0x4c] ss:$16 sps:$4 sm:$0xff]   ;;  %v1516_v11 = vld [vmem:[%s1729_s8 + $0x40] ss:$16 sps:$4 sm:$0xff]   ;;  %v1517_v12 = vld [vmem:[%s1729_s8 + $0x48] ss:$16 sps:$4 sm:$0xff]  }
  0x47   : > { %1370 = vmatpush3.bf16.msra.mxu1 %v1483_v48  ;;  %1307 = vmatprep.subr.bf16.mxu0 %v1484_v49  ;;  %v1518_v13 = vld [vmem:[%s1729_s8 + $0x64] ss:$16 sps:$4 sm:$0xff]   ;;  %v1520_v14 = vld [vmem:[%s1729_s8 + $0x6c] ss:$16 sps:$4 sm:$0xff]   ;;  %v1522_v15 = vld [vmem:[%s1729_s8 + $0x60] ss:$16 sps:$4 sm:$0xff]  }
  0x48   : > { %1371 = vmatprep.subr.bf16.mxu1 %v1485_v50  ;;  %v1523_v16 = vld [vmem:[%s1729_s8 + $0x68] ss:$16 sps:$4 sm:$0xff]   ;;  %v1524_v17 = vld [vmem:[%s1729_s8 + $0x84] ss:$16 sps:$4 sm:$0xff]   ;;  %v1526_v18 = vld [vmem:[%s1729_s8 + $0x8c] ss:$16 sps:$4 sm:$0xff]  }
  0x49   : > { %v1528_v19 = vld [vmem:[%s1729_s8 + $0x80] ss:$16 sps:$4 sm:$0xff]   ;;  %v1529_v20 = vld [vmem:[%s1729_s8 + $0x88] ss:$16 sps:$4 sm:$0xff]   ;;  %v1530_v21 = vld [vmem:[%s1729_s8 + $0xa4] ss:$16 sps:$4 sm:$0xff]  }
  0x4a   : > { %1308 = vmatpush3.bf16.msra.mxu0 %v1486_v51  ;;  %v1532_v22 = vld [vmem:[%s1729_s8 + $0xac] ss:$16 sps:$4 sm:$0xff]   ;;  %v1534_v23 = vld [vmem:[%s1729_s8 + $0xa0] ss:$16 sps:$4 sm:$0xff]   ;;  %v1535_v24 = vld [vmem:[%s1729_s8 + $0xa8] ss:$16 sps:$4 sm:$0xff]  }
  0x4b   : > { %1372 = vmatpush3.bf16.msra.mxu1 %v1487_v52  ;;  %1309 = vmatprep.subr.bf16.mxu0 %v1488_v53  ;;  %v1536_v25 = vld [vmem:[%s1729_s8 + $0xc4] ss:$16 sps:$4 sm:$0xff]   ;;  %v1538_v26 = vld [vmem:[%s1729_s8 + $0xcc] ss:$16 sps:$4 sm:$0xff]   ;;  %v1540_v27 = vld [vmem:[%s1729_s8 + $0xc0] ss:$16 sps:$4 sm:$0xff]  }
  0x4c   : > { %1373 = vmatprep.subr.bf16.mxu1 %v1489_v54  ;;  %v1541_v28 = vld [vmem:[%s1729_s8 + $0xc8] ss:$16 sps:$4 sm:$0xff]   ;;  %v1542_v29 = vld [vmem:[%s1729_s8 + $0xe4] ss:$16 sps:$4 sm:$0xff]   ;;  %v1544_v30 = vld [vmem:[%s1729_s8 + $0xec] ss:$16 sps:$4 sm:$0xff]  }
  0x4d   : > { %v1546_v31 = vld [vmem:[%s1729_s8 + $0xe0] ss:$16 sps:$4 sm:$0xff]   ;;  %v1547_v32 = vld [vmem:[%s1729_s8 + $0xe8] ss:$16 sps:$4 sm:$0xff]  }
  0x4e   : > { %1310 = vmatpush3.bf16.msra.mxu0 %v1490_v55  ;;  %v357_v47 = vld [vmem:[#allocation2 + $0x8] sm:$0xff] }
  0x4f   : > { %1374 = vmatpush3.bf16.msra.mxu1 %v1491_v56  ;;  %1311 = vmatprep.subr.bf16.mxu0 %v1492_v57 }
  0x50   : > { %1375 = vmatprep.subr.bf16.mxu1 %v1493_v58 }
  0x52   : > { %1312 = vmatpush3.bf16.msra.mxu0 %v1494_v59 }
  0x53   : > { %1376 = vmatpush3.bf16.msra.mxu1 %v1495_v60  ;;  %1313 = vmatprep.subr.bf16.mxu0 %v1496_v61  ;;  %v358_v60 = vld [vmem:[#allocation2 + $0x10] sm:$0xff] }
  0x54   : > { %1377 = vmatprep.subr.bf16.mxu1 %v1497_v62 }
  0x56   : > { %1314 = vmatpush3.bf16.msra.mxu0 %v1498_v63 }
  0x57   : > { %1378 = vmatpush3.bf16.msra.mxu1 %v1499_v0 }
  0x59   : > { %853 = vmatmul.mubr.bf16.vlgmr.msra.gmra.mrb[0].mxu0 %v1500_v1  ;;  %v359_v1 = vld [vmem:[#allocation2 + $0x18] sm:$0xff] }
  0x5a   : > { %950 = vmatmul.mubr.bf16.vlgmr.msra.gmra.mrb[0].mxu1 %v1503_v3  ;;  %860 = vmatprep.mubr.bf16.mxu0 %v1506_v5 }
  0x5b   : > { %957 = vmatprep.mubr.bf16.mxu1 %v1508_v6 }
  0x61   : > { %861 = vmatmul.mubr.bf16.gmra.mrb[4].mxu0 %v1510_v7 }
  0x62   : > { %958 = vmatmul.mubr.bf16.gmra.mrb[4].mxu1 %v1511_v8  ;;  %868 = vmatprep.mubr.bf16.mxu0 %v1512_v9 }
  0x63   : > { %965 = vmatprep.mubr.bf16.mxu1 %v1514_v10 }
  0x69   : > { %869 = vmatmul.mubr.bf16.gmra.mrb[8].mxu0 %v1516_v11 }
  0x6a   : > { %966 = vmatmul.mubr.bf16.gmra.mrb[8].mxu1 %v1517_v12  ;;  %876 = vmatprep.mubr.bf16.mxu0 %v1518_v13 }
  0x6b   : > { %973 = vmatprep.mubr.bf16.mxu1 %v1520_v14  ;;  %v360_v14 = vld [vmem:[#allocation2 + $0x20] sm:$0xff] }
  0x71   : > { %877 = vmatmul.mubr.bf16.gmra.mrb[12].mxu0 %v1522_v15 }
  0x72   : > { %974 = vmatmul.mubr.bf16.gmra.mrb[12].mxu1 %v1523_v16  ;;  %884 = vmatprep.mubr.bf16.mxu0 %v1524_v17 }
  0x73   : > { %981 = vmatprep.mubr.bf16.mxu1 %v1526_v18 }
  0x79   : > { %885 = vmatmul.mubr.bf16.gmra.mrb[16].mxu0 %v1528_v19  ;;  %v361_v19 = vld [vmem:[#allocation2 + $0x28] sm:$0xff] }
  0x7a   : > { %982 = vmatmul.mubr.bf16.gmra.mrb[16].mxu1 %v1529_v20  ;;  %892 = vmatprep.mubr.bf16.mxu0 %v1530_v21 }
  0x7b   : > { %989 = vmatprep.mubr.bf16.mxu1 %v1532_v22 }
  0x81   : > { %893 = vmatmul.mubr.bf16.gmra.mrb[20].mxu0 %v1534_v23 }
  0x82   : > { %990 = vmatmul.mubr.bf16.gmra.mrb[20].mxu1 %v1535_v24  ;;  %900 = vmatprep.mubr.bf16.mxu0 %v1536_v25 }
  0x83   : > { %997 = vmatprep.mubr.bf16.mxu1 %v1538_v26 }
  0x89   : > { %901 = vmatmul.mubr.bf16.gmra.mrb[24].mxu0 %v1540_v27 }
  0x8a   : > { %998 = vmatmul.mubr.bf16.gmra.mrb[24].mxu1 %v1541_v28  ;;  %908 = vmatprep.mubr.bf16.mxu0 %v1542_v29 }
  0x8b   : > { %1005 = vmatprep.mubr.bf16.mxu1 %v1544_v30 }
  0x91   : > { %909 = vmatmul.mubr.bf16.gmra.mrb[28].mxu0 %v1546_v31 }
  0x92   : > { %1006 = vmatmul.mubr.bf16.gmra.mrb[28].mxu1 %v1547_v32  ;;  %v362_v32 = vld [vmem:[#allocation2 + $0x30] sm:$0xff] }
 0x12c   : > { %v1315_v33 = vpop.f32.mrb[0].mxu0 }
 0x12d   : > { %v1379_v34 = vpop.f32.mrb[0].mxu1  ;;  %v1316_v35 = vpop.f32.mrb[1].mxu0 }
 0x12e   : > { %v1317_v36 = vadd.f32 %v1316_v35, %v1315_v33  ;;  %v1380_v37 = vpop.f32.mrb[1].mxu1  ;;  %v1318_v38 = vpop.f32.mrb[2].mxu0 }
 0x12f   : > { %v1381_v39 = vadd.f32 %v1380_v37, %v1379_v34  ;;  %v1382_v40 = vpop.f32.mrb[2].mxu1  ;;  %v1319_v41 = vpop.f32.mrb[3].mxu0  ;;  %v363_v37 = vld [vmem:[#allocation2 + $0x38] sm:$0xff] }
 0x130   : > { %v1320_v43 = vadd.f32 %v1319_v41, %v1318_v38  ;;  %v1383_v44 = vpop.f32.mrb[3].mxu1 }
 0x131   : > { %v952_v45 = vadd.f32 %v1381_v39, %v1317_v36  ;;  %v1384_v46 = vadd.f32 %v1383_v44, %v1382_v40 }
 0x133   : > { %v1014_v48 = vadd.f32 %v952_v45, %v356_v42  ;;  %v955_v49 = vadd.f32 %v1384_v46, %v1320_v43 }
 0x134   : > { %v1321_v50 = vpop.f32.mrb[4].mxu0 }
 0x135   : > { %1030 = vst [vmem:[#allocation2] sm:$0xff] %v1014_v48  ;;  %v1015_v51 = vadd.f32 %v955_v49, %v357_v47  ;;  %v1385_v52 = vpop.f32.mrb[4].mxu1  ;;  %v1322_v53 = vpop.f32.mrb[5].mxu0 }
 0x136   : > { %v1323_v54 = vadd.f32 %v1322_v53, %v1321_v50  ;;  %v1386_v55 = vpop.f32.mrb[5].mxu1  ;;  %v1324_v56 = vpop.f32.mrb[6].mxu0  ;;  %v364_v50 = vld [vmem:[#allocation2 + $0x40] sm:$0xff] }
 0x137   : > { %1031 = vst [vmem:[#allocation2 + $0x8] sm:$0xff] %v1015_v51  ;;  %v1387_v57 = vadd.f32 %v1386_v55, %v1385_v52  ;;  %v1388_v58 = vpop.f32.mrb[6].mxu1  ;;  %v1325_v59 = vpop.f32.mrb[7].mxu0  ;;  %v365_v55 = vld [vmem:[#allocation2 + $0x48] sm:$0xff] }
 0x138   : > { %v1326_v61 = vadd.f32 %v1325_v59, %v1324_v56  ;;  %v1389_v62 = vpop.f32.mrb[7].mxu1 }
 0x139   : > { %v960_v63 = vadd.f32 %v1387_v57, %v1323_v54  ;;  %v1390_v0 = vadd.f32 %v1389_v62, %v1388_v58 }
 0x13b   : > { %v1016_v2 = vadd.f32 %v960_v63, %v358_v60  ;;  %v963_v3 = vadd.f32 %v1390_v0, %v1326_v61 }
 0x13c   : > { %v1327_v4 = vpop.f32.mrb[8].mxu0 }
 0x13d   : > { %1032 = vst [vmem:[#allocation2 + $0x10] sm:$0xff] %v1016_v2  ;;  %v1017_v5 = vadd.f32 %v963_v3, %v359_v1  ;;  %v1391_v6 = vpop.f32.mrb[8].mxu1  ;;  %v1328_v7 = vpop.f32.mrb[9].mxu0 }
 0x13e   : > { %v1329_v8 = vadd.f32 %v1328_v7, %v1327_v4  ;;  %v1392_v9 = vpop.f32.mrb[9].mxu1  ;;  %v1330_v10 = vpop.f32.mrb[10].mxu0  ;;  %v366_v4 = vld [vmem:[#allocation2 + $0x50] sm:$0xff] }
 0x13f   : > { %1033 = vst [vmem:[#allocation2 + $0x18] sm:$0xff] %v1017_v5  ;;  %v1393_v11 = vadd.f32 %v1392_v9, %v1391_v6  ;;  %v1394_v12 = vpop.f32.mrb[10].mxu1  ;;  %v1331_v13 = vpop.f32.mrb[11].mxu0  ;;  %v367_v9 = vld [vmem:[#allocation2 + $0x58] sm:$0xff] }
 0x140   : > { %v1332_v15 = vadd.f32 %v1331_v13, %v1330_v10  ;;  %v1395_v16 = vpop.f32.mrb[11].mxu1 }
 0x141   : > { %v968_v17 = vadd.f32 %v1393_v11, %v1329_v8  ;;  %v1396_v18 = vadd.f32 %v1395_v16, %v1394_v12 }
 0x143   : > { %v1018_v20 = vadd.f32 %v968_v17, %v360_v14  ;;  %v971_v21 = vadd.f32 %v1396_v18, %v1332_v15 }
 0x144   : > { %v1333_v22 = vpop.f32.mrb[12].mxu0 }
 0x145   : > { %1034 = vst [vmem:[#allocation2 + $0x20] sm:$0xff] %v1018_v20  ;;  %v1019_v23 = vadd.f32 %v971_v21, %v361_v19  ;;  %v1397_v24 = vpop.f32.mrb[12].mxu1  ;;  %v1334_v25 = vpop.f32.mrb[13].mxu0 }
 0x146   : > { %v1335_v26 = vadd.f32 %v1334_v25, %v1333_v22  ;;  %v1398_v27 = vpop.f32.mrb[13].mxu1  ;;  %v1336_v28 = vpop.f32.mrb[14].mxu0  ;;  %v368_v22 = vld [vmem:[#allocation2 + $0x60] sm:$0xff] }
 0x147   : > { %1035 = vst [vmem:[#allocation2 + $0x28] sm:$0xff] %v1019_v23  ;;  %v1399_v29 = vadd.f32 %v1398_v27, %v1397_v24  ;;  %v1400_v30 = vpop.f32.mrb[14].mxu1  ;;  %v1337_v31 = vpop.f32.mrb[15].mxu0  ;;  %v369_v27 = vld [vmem:[#allocation2 + $0x68] sm:$0xff] }
 0x148   : > { %v1338_v33 = vadd.f32 %v1337_v31, %v1336_v28  ;;  %v1401_v34 = vpop.f32.mrb[15].mxu1 }
 0x149   : > { %v976_v35 = vadd.f32 %v1399_v29, %v1335_v26  ;;  %v1402_v36 = vadd.f32 %v1401_v34, %v1400_v30 }
 0x14b   : > { %v1020_v38 = vadd.f32 %v976_v35, %v362_v32  ;;  %v979_v39 = vadd.f32 %v1402_v36, %v1338_v33 }
 0x14c   : > { %v1339_v40 = vpop.f32.mrb[16].mxu0 }
 0x14d   : > { %1036 = vst [vmem:[#allocation2 + $0x30] sm:$0xff] %v1020_v38  ;;  %v1021_v41 = vadd.f32 %v979_v39, %v363_v37  ;;  %v1403_v42 = vpop.f32.mrb[16].mxu1  ;;  %v1340_v43 = vpop.f32.mrb[17].mxu0 }
 0x14e   : > { %v1341_v44 = vadd.f32 %v1340_v43, %v1339_v40  ;;  %v1404_v45 = vpop.f32.mrb[17].mxu1  ;;  %v1342_v46 = vpop.f32.mrb[18].mxu0  ;;  %v370_v40 = vld [vmem:[#allocation2 + $0x70] sm:$0xff] }
 0x14f   : > { %1037 = vst [vmem:[#allocation2 + $0x38] sm:$0xff] %v1021_v41  ;;  %v1405_v47 = vadd.f32 %v1404_v45, %v1403_v42  ;;  %v1406_v48 = vpop.f32.mrb[18].mxu1  ;;  %v1343_v49 = vpop.f32.mrb[19].mxu0  ;;  %v371_v45 = vld [vmem:[#allocation2 + $0x78] sm:$0xff] }
 0x150   : > { %v1344_v51 = vadd.f32 %v1343_v49, %v1342_v46  ;;  %v1407_v52 = vpop.f32.mrb[19].mxu1  ;;  %v1050_v49 = vld [vmem:[#allocation2] sm:$0xff] (!%p1292_p11) }
 0x151   : > { %v984_v53 = vadd.f32 %v1405_v47, %v1341_v44  ;;  %v1408_v54 = vadd.f32 %v1407_v52, %v1406_v48 }
 0x153   : > { %v1022_v56 = vadd.f32 %v984_v53, %v364_v50  ;;  %v987_v57 = vadd.f32 %v1408_v54, %v1344_v51  ;;  %v1293_v50 = vld [vmem:[%s1865_s2] ss:$0 sm:$0xff] (!%p1292_p11)  ;;  %v1051_v51 = vld [vmem:[#allocation2 + $0x8] sm:$0xff] (!%p1292_p11)  ;;  %v1052_v54 = vld [vmem:[#allocation2 + $0x10] sm:$0xff] (!%p1292_p11) }
 0x154   : > { %v1345_v58 = vpop.f32.mrb[20].mxu0  ;;  %v1073_v52 = vadd.f32 (!%p1292_p11), %v1293_v50, %v1050_v49  ;;  %v1074_v53 = vadd.f32 (!%p1292_p11), %v1293_v50, %v1051_v51 }
 0x155   : > { %1038 = vst [vmem:[#allocation2 + $0x40] sm:$0xff] %v1022_v56  ;;  %v1023_v59 = vadd.f32 %v987_v57, %v365_v55  ;;  %v1409_v60 = vpop.f32.mrb[20].mxu1  ;;  %v1346_v61 = vpop.f32.mrb[21].mxu0  ;;  %v1053_v55 = vld [vmem:[#allocation2 + $0x18] sm:$0xff] (!%p1292_p11)  ;;  %v1054_v56 = vld [vmem:[#allocation2 + $0x20] sm:$0xff] (!%p1292_p11)  ;;  %v1075_v57 = vadd.f32 (!%p1292_p11), %v1293_v50, %v1052_v54 }
 0x156   : > { %v1347_v62 = vadd.f32 %v1346_v61, %v1345_v58  ;;  %v1410_v63 = vpop.f32.mrb[21].mxu1  ;;  %v1348_v0 = vpop.f32.mrb[22].mxu0  ;;  %v1076_v58 = vadd.f32 (!%p1292_p11), %v1293_v50, %v1053_v55  ;;  %v1056_v61 = vld [vmem:[#allocation2 + $0x30] sm:$0xff] (!%p1292_p11)  ;;  %1089 = vst [vmem:[%s1866_s3] sm:$0xff] (!%p1292_p11), %v1073_v52  ;;  %1090 = vst [vmem:[%s1866_s3 + $0x8] sm:$0xff] (!%p1292_p11), %v1074_v53 }
 0x157   : > { %1039 = vst [vmem:[#allocation2 + $0x48] sm:$0xff] %v1023_v59  ;;  %v1411_v1 = vadd.f32 %v1410_v63, %v1409_v60  ;;  %v1412_v2 = vpop.f32.mrb[22].mxu1  ;;  %v1349_v3 = vpop.f32.mrb[23].mxu0  ;;  %v1077_v59 = vadd.f32 (!%p1292_p11), %v1293_v50, %v1054_v56  ;;  %v1055_v60 = vld [vmem:[#allocation2 + $0x28] sm:$0xff] (!%p1292_p11)  ;;  %1091 = vst [vmem:[%s1866_s3 + $0x10] sm:$0xff] (!%p1292_p11), %v1075_v57 }
 0x158   : > { %v1350_v5 = vadd.f32 %v1349_v3, %v1348_v0  ;;  %v1413_v6 = vpop.f32.mrb[23].mxu1  ;;  %v1078_v63 = vadd.f32 (!%p1292_p11), %v1293_v50, %v1055_v60  ;;  %v1079_v0 = vadd.f32 (!%p1292_p11), %v1293_v50, %v1056_v61  ;;  %1092 = vst [vmem:[%s1866_s3 + $0x18] sm:$0xff] (!%p1292_p11), %v1076_v58 }
 0x159   : > { %v992_v7 = vadd.f32 %v1411_v1, %v1347_v62  ;;  %v1414_v8 = vadd.f32 %v1413_v6, %v1412_v2  ;;  %v1057_v62 = vld [vmem:[#allocation2 + $0x38] sm:$0xff] (!%p1292_p11)  ;;  %1093 = vst [vmem:[%s1866_s3 + $0x20] sm:$0xff] (!%p1292_p11), %v1077_v59 }
 0x15a   : > { %v1080_v1 = vadd.f32 (!%p1292_p11), %v1293_v50, %v1057_v62  ;;  %1094 = vst [vmem:[%s1866_s3 + $0x28] sm:$0xff] (!%p1292_p11), %v1078_v63  ;;  %1095 = vst [vmem:[%s1866_s3 + $0x30] sm:$0xff] (!%p1292_p11), %v1079_v0 }
 0x15b   : > { %v1024_v10 = vadd.f32 %v992_v7, %v366_v4  ;;  %v995_v11 = vadd.f32 %v1414_v8, %v1350_v5 }
 0x15c   : > { %v1351_v12 = vpop.f32.mrb[24].mxu0  ;;  %v1058_v2 = vld [vmem:[#allocation2 + $0x40] sm:$0xff] (!%p1292_p11)  ;;  %1096 = vst [vmem:[%s1866_s3 + $0x38] sm:$0xff] (!%p1292_p11), %v1080_v1 }
 0x15d   : > { %1040 = vst [vmem:[#allocation2 + $0x50] sm:$0xff] %v1024_v10  ;;  %v1025_v13 = vadd.f32 %v995_v11, %v367_v9  ;;  %v1415_v14 = vpop.f32.mrb[24].mxu1  ;;  %v1352_v15 = vpop.f32.mrb[25].mxu0  ;;  %v1081_v5 = vadd.f32 (!%p1292_p11), %v1293_v50, %v1058_v2 }
 0x15e   : > { %v1353_v16 = vadd.f32 %v1352_v15, %v1351_v12  ;;  %v1416_v17 = vpop.f32.mrb[25].mxu1  ;;  %v1354_v18 = vpop.f32.mrb[26].mxu0  ;;  %v1059_v3 = vld [vmem:[#allocation2 + $0x48] sm:$0xff] (!%p1292_p11) }
 0x15f   : > { %1041 = vst [vmem:[#allocation2 + $0x58] sm:$0xff] %v1025_v13  ;;  %v1417_v19 = vadd.f32 %v1416_v17, %v1415_v14  ;;  %v1418_v20 = vpop.f32.mrb[26].mxu1  ;;  %v1355_v21 = vpop.f32.mrb[27].mxu0  ;;  %v1082_v6 = vadd.f32 (!%p1292_p11), %v1293_v50, %v1059_v3  ;;  %1097 = vst [vmem:[%s1866_s3 + $0x40] sm:$0xff] (!%p1292_p11), %v1081_v5 }
 0x160   : > { %v1356_v23 = vadd.f32 %v1355_v21, %v1354_v18  ;;  %v1419_v24 = vpop.f32.mrb[27].mxu1 }
 0x161   : > { %v1000_v25 = vadd.f32 %v1417_v19, %v1353_v16  ;;  %v1420_v26 = vadd.f32 %v1419_v24, %v1418_v20  ;;  %1098 = vst [vmem:[%s1866_s3 + $0x48] sm:$0xff] (!%p1292_p11), %v1082_v6 }
 0x163   : > { %v1026_v28 = vadd.f32 %v1000_v25, %v368_v22  ;;  %v1003_v29 = vadd.f32 %v1420_v26, %v1356_v23 }
 0x164   : > { %v1357_v30 = vpop.f32.mrb[28].mxu0  ;;  %v1060_v4 = vld [vmem:[#allocation2 + $0x50] sm:$0xff] (!%p1292_p11) }
 0x165   : > { %1042 = vst [vmem:[#allocation2 + $0x60] sm:$0xff] %v1026_v28  ;;  %v1027_v31 = vadd.f32 %v1003_v29, %v369_v27  ;;  %v1421_v32 = vpop.f32.mrb[28].mxu1  ;;  %v1358_v33 = vpop.f32.mrb[29].mxu0  ;;  %v1083_v7 = vadd.f32 (!%p1292_p11), %v1293_v50, %v1060_v4 }
 0x166   : > { %v1359_v34 = vadd.f32 %v1358_v33, %v1357_v30  ;;  %v1422_v35 = vpop.f32.mrb[29].mxu1  ;;  %v1360_v36 = vpop.f32.mrb[30].mxu0  ;;  %v1061_v8 = vld [vmem:[#allocation2 + $0x58] sm:$0xff] (!%p1292_p11) }
 0x167   : > { %1043 = vst [vmem:[#allocation2 + $0x68] sm:$0xff] %v1027_v31  ;;  %v1423_v37 = vadd.f32 %v1422_v35, %v1421_v32  ;;  %v1424_v38 = vpop.f32.mrb[30].mxu1  ;;  %v1361_v39 = vpop.f32.mrb[31].mxu0  ;;  %v1084_v11 = vadd.f32 (!%p1292_p11), %v1293_v50, %v1061_v8  ;;  %1099 = vst [vmem:[%s1866_s3 + $0x50] sm:$0xff] (!%p1292_p11), %v1083_v7 }
 0x168   : > { %v1362_v41 = vadd.f32 %v1361_v39, %v1360_v36  ;;  %v1425_v42 = vpop.f32.mrb[31].mxu1 }
 0x169   : > { %v1008_v43 = vadd.f32 %v1423_v37, %v1359_v34  ;;  %v1426_v44 = vadd.f32 %v1425_v42, %v1424_v38  ;;  %1049 = sbr.rel (%p1292_p11) target bundleno = 378 (0x17a), region = 63  ;;  %1100 = vst [vmem:[%s1866_s3 + $0x58] sm:$0xff] (!%p1292_p11), %v1084_v11 }
 0x16b   : > { %v1028_v46 = vadd.f32 %v1008_v43, %v370_v40  ;;  %v1011_v47 = vadd.f32 %v1426_v44, %v1362_v41 }
 0x16c   : > { %v1062_v9 = vld [vmem:[#allocation2 + $0x60] sm:$0xff] (!%p1292_p11) }
 0x16d   : > { %1044 = vst [vmem:[#allocation2 + $0x70] sm:$0xff] %v1028_v46  ;;  %v1029_v48 = vadd.f32 %v1011_v47, %v371_v45  ;;  %v1085_v12 = vadd.f32 (!%p1292_p11), %v1293_v50, %v1062_v9 }
 0x16e   : > { %v1063_v10 = vld [vmem:[#allocation2 + $0x68] sm:$0xff] (!%p1292_p11) }
 0x16f   : > { %1045 = vst [vmem:[#allocation2 + $0x78] sm:$0xff] %v1029_v48  ;;  %v1086_v13 = vadd.f32 (!%p1292_p11), %v1293_v50, %v1063_v10  ;;  %1101 = vst [vmem:[%s1866_s3 + $0x60] sm:$0xff] (!%p1292_p11), %v1085_v12 }
 0x171   : > { %1102 = vst [vmem:[%s1866_s3 + $0x68] sm:$0xff] %v1086_v13 }
 0x174   : > { %v1064_v14 = vld [vmem:[#allocation2 + $0x70] sm:$0xff] }
 0x175   : > { %v1087_v16 = vadd.f32 %v1293_v50, %v1064_v14 }
 0x176   : > { %v1065_v15 = vld [vmem:[#allocation2 + $0x78] sm:$0xff] }
 0x177   : > { %v1088_v17 = vadd.f32 %v1293_v50, %v1065_v15  ;;  %1103 = vst [vmem:[%s1866_s3 + $0x70] sm:$0xff] %v1087_v16 }
 0x179   : > { %1104 = vst [vmem:[%s1866_s3 + $0x78] sm:$0xff] %v1088_v17 }
 0x17a PF: > { %s13_s16 = sadd.s32 1, %s1586_s16   ;;  %s1867_s12 = smov %s1574_s13 }
 0x17b   : > { %p10_p12 = scmp.ge.s32.totalorder %s13_s16, 4   ;;  %s1868_s13 = smov %s1644_s20 }
 0x17c   : > { %s1869_s14 = smov %s1582_s15  ;;  %s1870_s15 = smov %s1872_s17 }
 0x17d   :  { %12 = sbr.rel (!%p10_p12) target bundleno = 3 (0x3), region = 104 }

// kernel: discriminator_forward.10
= control target key start
LH: loop header
LB: loop body
LE: loop exit
PB: predicated region body
PF: predicated region fallthrough
CT: control target
= control target key end

     0   :  { %s399_s6 = smov 0   ;;  %s401_s7 = smov 0   ;;  %s449_s0 = inlined_call_operand.vmem [shape: f32[2,64,128], index: 0, kind: input, shape index: {}]   ;;  %s450_s1 = inlined_call_operand.vmem [shape: f32[2,64,128], index: 1, kind: output, shape index: {}]  }
   0x1   :  { %s403_s8 = smov 0  }
   0x2 LB: > { %s23_s9 = sadd.s32 1, %s383_s7  ;;  %p330_p0 = scmp.ge.s32.totalorder %s387_s8, 1  ;;  %s387_s8 = sphi %s403_s8, %s11_s8   ;;  %s383_s7 = sphi %s401_s7, %s452_s7   ;;  %s379_s6 = sphi %s399_s6, %s451_s6  }
   0x3   : > { %p25_p1 = scmp.ge.s32.totalorder %s23_s9, 2  ;;  %p106_p2 = scmp.lt.s32.totalorder %s387_s8, 3 }
   0x5   : > { %s454_s9 = smov (%p25_p1, %s23_s9), 0  ;;  %p107_p3 = pnand %p330_p0, %p106_p2 }
   0x6   : > { %p132_p4 = scmp.lt.s32.totalorder (!%p107_p3), %s379_s6, 1 }
   0x7   : > { %110 = sbr.rel (%p107_p3) target bundleno = 102 (0x66), region = 24 }
   0xe   : > { %s456_s6 = smov (!%p132_p4, %s379_s6), 1 }
   0xf   : > { %s337_s10 = sshll.u32 %s456_s6, 6 }
  0x10   : > { %s139_s13 = scalar_lea.vmem %s449_s0, %s337_s10  ;;  %s430_s16 = scalar_lea.vmem %s450_s1, %s337_s10 }
  0x11   : > { %v148_v0 = vld [vmem:[%s139_s13] sm:$0xff]  ;;  %v149_v1 = vld [vmem:[%s139_s13 + $0x8] sm:$0xff]  ;;  %v150_v2 = vld [vmem:[%s139_s13 + $0x10] sm:$0xff] }
  0x12   : > { %v156_v3 = vadd.f32 %v149_v1, %v148_v0  ;;  %v151_v4 = vld [vmem:[%s139_s13 + $0x18] sm:$0xff]  ;;  %v152_v6 = vld [vmem:[%s139_s13 + $0x20] sm:$0xff]  ;;  %v153_v8 = vld [vmem:[%s139_s13 + $0x28] sm:$0xff] }
  0x13   : > { %v154_v10 = vld [vmem:[%s139_s13 + $0x30] sm:$0xff]  ;;  %v155_v12 = vld [vmem:[%s139_s13 + $0x38] sm:$0xff] }
  0x14   : > { %v157_v5 = vadd.f32 %v156_v3, %v150_v2 }
  0x16   : > { %v158_v7 = vadd.f32 %v157_v5, %v151_v4 }
  0x18   : > { %v159_v9 = vadd.f32 %v158_v7, %v152_v6 }
  0x1a   : > { %v160_v11 = vadd.f32 %v159_v9, %v153_v8 }
  0x1c   : > { %v161_v13 = vadd.f32 %v160_v11, %v154_v10 }
  0x1e   : > { %v162_v14 = vadd.f32 %v161_v13, %v155_v12 }
  0x20   : > { %v163_v15 = vrot.slane %v162_v14, 4 }
  0x22   : > { %v164_v16 = vadd.f32 %v163_v15, %v162_v14 }
  0x24   : > { %v165_v17 = vrot.slane %v164_v16, 2 }
  0x26   : > { %v166_v18 = vadd.f32 %v165_v17, %v164_v16 }
  0x28   : > { %v167_v19 = vrot.slane %v166_v18, 1 }
  0x2a   : > { %v168_v20 = vadd.f32 %v167_v19, %v166_v18 }
  0x2c   : > { %v170_v21 = vmul.f32 0.015625, %v168_v20 }
  0x2e   : > { %v171_v22 = vsub.f32 %v148_v0, %v170_v21  ;;  %v172_v23 = vsub.f32 %v149_v1, %v170_v21  ;;  %v173_v24 = vsub.f32 %v150_v2, %v170_v21  ;;  %v174_v25 = vsub.f32 %v151_v4, %v170_v21 }
  0x2f   : > { %v175_v26 = vsub.f32 %v152_v6, %v170_v21  ;;  %v176_v30 = vsub.f32 %v153_v8, %v170_v21  ;;  %v177_v33 = vsub.f32 %v154_v10, %v170_v21  ;;  %v178_v36 = vsub.f32 %v155_v12, %v170_v21 }
  0x30   : > { %v179_v27 = vmul.f32 %v171_v22, %v171_v22  ;;  %v180_v28 = vmul.f32 %v172_v23, %v172_v23  ;;  %v181_v29 = vmul.f32 %v173_v24, %v173_v24  ;;  %v182_v31 = vmul.f32 %v174_v25, %v174_v25 }
  0x31   : > { %v183_v34 = vmul.f32 %v175_v26, %v175_v26  ;;  %v184_v37 = vmul.f32 %v176_v30, %v176_v30  ;;  %v185_v39 = vmul.f32 %v177_v33, %v177_v33  ;;  %v186_v41 = vmul.f32 %v178_v36, %v178_v36 }
  0x32   : > { %v187_v32 = vadd.f32 %v180_v28, %v179_v27 }
  0x34   : > { %v188_v35 = vadd.f32 %v187_v32, %v181_v29 }
  0x36   : > { %v189_v38 = vadd.f32 %v188_v35, %v182_v31 }
  0x38   : > { %v190_v40 = vadd.f32 %v189_v38, %v183_v34 }
  0x3a   : > { %v191_v42 = vadd.f32 %v190_v40, %v184_v37 }
  0x3c   : > { %v192_v43 = vadd.f32 %v191_v42, %v185_v39 }
  0x3e   : > { %v193_v44 = vadd.f32 %v192_v43, %v186_v41 }
  0x40   : > { %v194_v45 = vrot.slane %v193_v44, 4 }
  0x42   : > { %v195_v46 = vadd.f32 %v194_v45, %v193_v44 }
  0x44   : > { %v196_v47 = vrot.slane %v195_v46, 2 }
  0x46   : > { %v197_v48 = vadd.f32 %v196_v47, %v195_v46 }
  0x48   : > { %v198_v49 = vrot.slane %v197_v48, 1 }
  0x4a   : > { %v199_v50 = vadd.f32 %v198_v49, %v197_v48 }
  0x4c   : > { %v200_v51 = vmul.f32 0.015625, %v199_v50 }
  0x4e   : > { %v201_v52 = vadd.f32 1e-05, %v200_v51 }
  0x50   : > { %363 = vrsqrt.f32 %v201_v52 }
  0x5a   : > { %v364_v53 = vpop.eup %363 }
  0x5b   : > { %v203_v54 = vmul.f32 %v364_v53, %v171_v22  ;;  %v204_v55 = vmul.f32 %v364_v53, %v172_v23  ;;  %v205_v56 = vmul.f32 %v364_v53, %v173_v24  ;;  %v206_v57 = vmul.f32 %v364_v53, %v174_v25 }
  0x5c   : > { %v207_v58 = vmul.f32 %v364_v53, %v175_v26  ;;  %v208_v59 = vmul.f32 %v364_v53, %v176_v30  ;;  %v209_v60 = vmul.f32 %v364_v53, %v177_v33  ;;  %v210_v61 = vmul.f32 %v364_v53, %v178_v36 }
  0x5d   : > { %vm211_vm0 = vcmp.ge.f32.partialorder %v203_v54, 0.0  ;;  %v219_v62 = vmul.f32 0.2, %v203_v54  ;;  %vm212_vm1 = vcmp.ge.f32.partialorder %v204_v55, 0.0  ;;  %v220_v63 = vmul.f32 0.2, %v204_v55 }
  0x5e   : > { %vm213_vm2 = vcmp.ge.f32.partialorder %v205_v56, 0.0  ;;  %v221_v0 = vmul.f32 0.2, %v205_v56  ;;  %vm214_vm3 = vcmp.ge.f32.partialorder %v206_v57, 0.0  ;;  %v222_v1 = vmul.f32 0.2, %v206_v57 }
  0x5f   : > { %v227_v2 = vsel %vm211_vm0, %v203_v54, %v219_v62  ;;  %v228_v3 = vsel %vm212_vm1, %v204_v55, %v220_v63  ;;  %vm215_vm4 = vcmp.ge.f32.partialorder %v207_v58, 0.0  ;;  %v223_v4 = vmul.f32 0.2, %v207_v58 }
  0x60   : > { %235 = vst [vmem:[%s430_s16] sm:$0xff] %v227_v2  ;;  %236 = vst [vmem:[%s430_s16 + $0x8] sm:$0xff] %v228_v3  ;;  %v229_v5 = vsel %vm213_vm2, %v205_v56, %v221_v0  ;;  %v230_v6 = vsel %vm214_vm3, %v206_v57, %v222_v1  ;;  %vm216_vm5 = vcmp.ge.f32.partialorder %v208_v59, 0.0  ;;  %v224_v7 = vmul.f32 0.2, %v208_v59 }
  0x61   : > { %237 = vst [vmem:[%s430_s16 + $0x10] sm:$0xff] %v229_v5  ;;  %238 = vst [vmem:[%s430_s16 + $0x18] sm:$0xff] %v230_v6  ;;  %v231_v8 = vsel %vm215_vm4, %v207_v58, %v223_v4  ;;  %vm217_vm6 = vcmp.ge.f32.partialorder %v209_v60, 0.0  ;;  %v225_v9 = vmul.f32 0.2, %v209_v60  ;;  %vm218_vm7 = vcmp.ge.f32.partialorder %v210_v61, 0.0 }
  0x62   : > { %239 = vst [vmem:[%s430_s16 + $0x20] sm:$0xff] %v231_v8  ;;  %v232_v10 = vsel %vm216_vm5, %v208_v59, %v224_v7  ;;  %v226_v11 = vmul.f32 0.2, %v210_v61 }
  0x63   : > { %240 = vst [vmem:[%s430_s16 + $0x28] sm:$0xff] %v232_v10  ;;  %v233_v12 = vsel %vm217_vm6, %v209_v60, %v225_v9 }
  0x64   : > { %241 = vst [vmem:[%s430_s16 + $0x30] sm:$0xff] %v233_v12  ;;  %v234_v13 = vsel %vm218_vm7, %v210_v61, %v226_v11 }
  0x65   : > { %242 = vst [vmem:[%s430_s16 + $0x38] sm:$0xff] %v234_v13 }
  0x66 PF: > { %s11_s8 = sadd.s32 1, %s387_s8   ;;  %s451_s6 = smov %s383_s7 }
  0x67   : > { %p8_p5 = scmp.ge.s32.totalorder %s11_s8, 4   ;;  %s452_s7 = smov %s454_s9 }
  0x69   :  { %10 = sbr.rel (!%p8_p5) target bundleno = 2 (0x2), region = 54 }

// kernel: discriminator_forward.11
= control target key start
LH: loop header
LB: loop body
LE: loop exit
PB: predicated region body
PF: predicated region fallthrough
CT: control target
= control target key end

     0   :  { %s1352_s12 = smov 0   ;;  %s1354_s13 = smov 0   ;;  %s1522_s0 = inlined_call_operand.vmem [shape: bf16[32,2048], index: 0, kind: input, shape index: {}]   ;;  %s1523_s1 = inlined_call_operand.vmem [shape: bf16[2048,256], index: 1, kind: input, shape index: {}]   ;;  %s1524_s2 = inlined_call_operand.vmem [shape: f32[1,256], index: 2, kind: input, shape index: {}]   ;;  %s1525_s3 = inlined_call_operand.vmem [shape: f32[32,256], index: 3, kind: output, shape index: {}]  }
   0x1   :  { %s1356_s14 = smov 0   ;;  %s1358_s15 = smov 0  }
   0x2   :  { %s1360_s16 = smov 0  }
   0x3 LB: > { %s25_s17 = sadd.s32 1, %s1325_s15  ;;  %p48_p1 = scmp.ne.s32.totalorder %s1317_s13, %s1313_s12  ;;  %s1329_s16 = sphi %s1360_s16, %s13_s16   ;;  %s1325_s15 = sphi %s1358_s15, %s1529_s15   ;;  %s1321_s14 = sphi %s1356_s14, %s1528_s14   ;;  %s1317_s13 = sphi %s1354_s13, %s1527_s13   ;;  %s1313_s12 = sphi %s1352_s12, %s1526_s12  }
   0x4   : > { %p26_p0 = scmp.ge.s32.totalorder %s25_s17, 4  ;;  %p49_p2 = scmp.eq.s32.totalorder %s1329_s16, 0 }
   0x5   : > { %s41_s19 = sadd.s32 1, %s1317_s13  ;;  %p1045_p5 = scmp.ge.s32.totalorder %s1329_s16, 4 }
   0x6   : > { %s1531_s17 = smov (%p26_p0, %s25_s17), 0  ;;  %p50_p3 = por %p49_p2, %p48_p1 }
   0x7   : > { %s37_s18 = ssub.s32 %s1325_s15, %s1531_s17  ;;  %164 = sbr.rel (%p1045_p5) target bundleno = 22 (0x16), region = 20 }
   0x8   : > { %p39_p4 = scmp.eq.s32.totalorder %s37_s18, 0 }
   0xa   : > { %s1387_s20 = scalar_select %p39_p4, %s1317_s13, %s41_s19  }
   0xe   : > { %167 = sbr.rel (!%p50_p3) target bundleno = 22 (0x16), region = 24  ;;  %s169_s21 = sand.u32 (%p50_p3), 1, %s1317_s13  }
   0xf   : > { %s1132_s22 = sshll.u32 (%p50_p3), %s1325_s15, 4  ;;  %s1046_s23 = sshll.u32 (%p50_p3), %s169_s21, 6 }
  0x10   : > { %s177_s26 = scalar_lea.vmem (%p50_p3), %s1522_s0, %s1132_s22  ;;  %s171_s27 = scalar_lea.vmem (%p50_p3), [#allocation3], %s1046_s23 }
  0x11   : > { %v190_v0 = vld [vmem:[%s177_s26] sm:$0xff] (%p50_p3)  ;;  %v192_v1 = vld [vmem:[%s177_s26 + $0x8] sm:$0xff] (%p50_p3) }
  0x12   : > { %v194_v2 = vld [vmem:[%s177_s26 + $0x40] sm:$0xff] (%p50_p3)  ;;  %191 = vst [vmem:[%s171_s27] sm:$0xff] (%p50_p3), %v190_v0  ;;  %193 = vst [vmem:[%s171_s27 + $0x8] sm:$0xff] (%p50_p3), %v192_v1  ;;  %v196_v3 = vld [vmem:[%s177_s26 + $0x48] sm:$0xff] (%p50_p3) }
  0x13   : > { %195 = vst [vmem:[%s171_s27 + $0x10] sm:$0xff] (%p50_p3), %v194_v2  ;;  %v198_v4 = vld [vmem:[%s177_s26 + $0x80] sm:$0xff] (%p50_p3)  ;;  %v200_v5 = vld [vmem:[%s177_s26 + $0x88] sm:$0xff] (%p50_p3)  ;;  %197 = vst [vmem:[%s171_s27 + $0x18] sm:$0xff] (%p50_p3), %v196_v3 }
  0x14   : > { %199 = vst [vmem:[%s171_s27 + $0x20] sm:$0xff] (%p50_p3), %v198_v4  ;;  %201 = vst [vmem:[%s171_s27 + $0x28] sm:$0xff] (%p50_p3), %v200_v5  ;;  %v202_v6 = vld [vmem:[%s177_s26 + $0xc0] sm:$0xff] (%p50_p3)  ;;  %v204_v7 = vld [vmem:[%s177_s26 + $0xc8] sm:$0xff] (%p50_p3) }
  0x15   : > { %203 = vst [vmem:[%s171_s27 + $0x30] sm:$0xff] %v202_v6  ;;  %205 = vst [vmem:[%s171_s27 + $0x38] sm:$0xff] %v204_v7 }
  0x16 PF: > { %p1049_p6 = scmp.ge.s32.totalorder %s1329_s16, 1  ;;  %p225_p7 = scmp.lt.s32.totalorder %s1329_s16, 5 }
  0x18   : > { %p226_p8 = pnand %p1049_p6, %p225_p7 }
  0x19   : > { %s232_s28 = sand.u32 (!%p226_p8), 1, %s1313_s12   ;;  %s1051_s29 = sshll.u32 (!%p226_p8), %s1321_s14, 6 }
  0x1a   : > { %229 = sbr.rel (%p226_p8) target bundleno = 344 (0x158), region = 51  ;;  %s1050_s30 = sshll.u32 (!%p226_p8), %s232_s28, 6 }
  0x1b   : > { %p278_p9 = scmp.lt.s32.totalorder (!%p226_p8), %s1051_s29, 255  ;;  %s1404_s8 = scalar_lea.vmem (!%p226_p8), [#allocation3], %s1050_s30 }
  0x1c   : > { %p1054_p10 = scmp.ne.s32.totalorder (!%p226_p8), %s1321_s14, 0 }
  0x21   : > { %s1533_s29 = smov (!%p278_p9, %s1051_s29), 255  ;;  %308 = sbr.rel (%p1054_p10) target bundleno = 40 (0x28), region = 59 }
  0x22   : > { %s1133_s4 = sshll.u32 %s1533_s29, 3  ;;  %v1331_v8 = vmov (!%p1054_p10), 0.0  }
  0x23   : > { %s1402_s7 = scalar_lea.vmem %s1523_s1, %s1133_s4  ;;  %309 = vst [vmem:[#allocation2] sm:$0xff] (!%p1054_p10), %v1331_v8  ;;  %310 = vst [vmem:[#allocation2 + $0x8] sm:$0xff] (!%p1054_p10), %v1331_v8 }
  0x24   : > { %311 = vst [vmem:[#allocation2 + $0x10] sm:$0xff] (!%p1054_p10), %v1331_v8  ;;  %312 = vst [vmem:[#allocation2 + $0x18] sm:$0xff] (!%p1054_p10), %v1331_v8 }
  0x25   : > { %313 = vst [vmem:[#allocation2 + $0x20] sm:$0xff] (!%p1054_p10), %v1331_v8  ;;  %314 = vst [vmem:[#allocation2 + $0x28] sm:$0xff] (!%p1054_p10), %v1331_v8 }
  0x26   : > { %315 = vst [vmem:[#allocation2 + $0x30] sm:$0xff] (!%p1054_p10), %v1331_v8  ;;  %316 = vst [vmem:[#allocation2 + $0x38] sm:$0xff] (!%p1054_p10), %v1331_v8 }
  0x28 PF: > { %v1183_v9 = vld [vmem:[%s1402_s7 + $0x4] ss:$8 sps:$4 sm:$0xff]   ;;  %v1187_v11 = vld [vmem:[%s1402_s7] ss:$8 sps:$4 sm:$0xff]   ;;  %v1189_v13 = vld [vmem:[%s1402_s7 + $0x14] ss:$8 sps:$4 sm:$0xff]  }
  0x29   : > { %v1185_v10 = vld [vmem:[%s1402_s7 + $0x104] ss:$8 sps:$4 sm:$0xff]   ;;  %757 = vmatprep.subr.bf16.mxu1 %v1183_v9  ;;  %v1188_v12 = vld [vmem:[%s1402_s7 + $0x100] ss:$8 sps:$4 sm:$0xff]   ;;  %v1191_v14 = vld [vmem:[%s1402_s7 + $0x114] ss:$8 sps:$4 sm:$0xff]  }
  0x2a   : > { %810 = vmatprep.subr.bf16.mxu0 %v1185_v10  ;;  %758 = vmatpush1.bf16.msra.mxu1 %v1187_v11  ;;  %v1193_v15 = vld [vmem:[%s1402_s7 + $0x10] ss:$8 sps:$4 sm:$0xff]   ;;  %v1195_v17 = vld [vmem:[%s1402_s7 + $0x24] ss:$8 sps:$4 sm:$0xff]   ;;  %v1199_v19 = vld [vmem:[%s1402_s7 + $0x20] ss:$8 sps:$4 sm:$0xff]  }
  0x2b   : > { %811 = vmatpush1.bf16.msra.mxu0 %v1188_v12  ;;  %759 = vmatprep.subr.bf16.mxu1 %v1189_v13  ;;  %v1194_v16 = vld [vmem:[%s1402_s7 + $0x110] ss:$8 sps:$4 sm:$0xff]   ;;  %v1197_v18 = vld [vmem:[%s1402_s7 + $0x124] ss:$8 sps:$4 sm:$0xff]   ;;  %v1200_v20 = vld [vmem:[%s1402_s7 + $0x120] ss:$8 sps:$4 sm:$0xff]  }
  0x2c   : > { %812 = vmatprep.subr.bf16.mxu0 %v1191_v14  ;;  %v1201_v21 = vld [vmem:[%s1402_s7 + $0x34] ss:$8 sps:$4 sm:$0xff]   ;;  %v1205_v23 = vld [vmem:[%s1402_s7 + $0x30] ss:$8 sps:$4 sm:$0xff]   ;;  %v1207_v25 = vld [vmem:[%s1402_s7 + $0x44] ss:$8 sps:$4 sm:$0xff]  }
  0x2d   : > { %v1203_v22 = vld [vmem:[%s1402_s7 + $0x134] ss:$8 sps:$4 sm:$0xff]   ;;  %v1206_v24 = vld [vmem:[%s1402_s7 + $0x130] ss:$8 sps:$4 sm:$0xff]   ;;  %v1209_v26 = vld [vmem:[%s1402_s7 + $0x144] ss:$8 sps:$4 sm:$0xff]  }
  0x2e   : > { %760 = vmatpush1.bf16.msra.mxu1 %v1193_v15  ;;  %v1211_v27 = vld [vmem:[%s1402_s7 + $0x40] ss:$8 sps:$4 sm:$0xff]   ;;  %v1213_v29 = vld [vmem:[%s1402_s7 + $0x54] ss:$8 sps:$4 sm:$0xff]   ;;  %v1217_v31 = vld [vmem:[%s1402_s7 + $0x50] ss:$8 sps:$4 sm:$0xff]  }
  0x2f   : > { %813 = vmatpush1.bf16.msra.mxu0 %v1194_v16  ;;  %761 = vmatprep.subr.bf16.mxu1 %v1195_v17  ;;  %v1212_v28 = vld [vmem:[%s1402_s7 + $0x140] ss:$8 sps:$4 sm:$0xff]   ;;  %v1215_v30 = vld [vmem:[%s1402_s7 + $0x154] ss:$8 sps:$4 sm:$0xff]   ;;  %v1218_v32 = vld [vmem:[%s1402_s7 + $0x150] ss:$8 sps:$4 sm:$0xff]  }
  0x30   : > { %814 = vmatprep.subr.bf16.mxu0 %v1197_v18  ;;  %v1219_v33 = vld [vmem:[%s1402_s7 + $0x64] ss:$8 sps:$4 sm:$0xff]   ;;  %v1223_v35 = vld [vmem:[%s1402_s7 + $0x60] ss:$8 sps:$4 sm:$0xff]   ;;  %v1225_v37 = vld [vmem:[%s1402_s7 + $0x74] ss:$8 sps:$4 sm:$0xff]  }
  0x31   : > { %v1221_v34 = vld [vmem:[%s1402_s7 + $0x164] ss:$8 sps:$4 sm:$0xff]   ;;  %v1224_v36 = vld [vmem:[%s1402_s7 + $0x160] ss:$8 sps:$4 sm:$0xff]   ;;  %v1227_v38 = vld [vmem:[%s1402_s7 + $0x174] ss:$8 sps:$4 sm:$0xff]  }
  0x32   : > { %762 = vmatpush1.bf16.msra.mxu1 %v1199_v19  ;;  %v1229_v39 = vld [vmem:[%s1402_s7 + $0x70] ss:$8 sps:$4 sm:$0xff]   ;;  %v1231_v41 = vld [vmem:[%s1402_s7 + $0x84] ss:$8 sps:$4 sm:$0xff]   ;;  %v1235_v43 = vld [vmem:[%s1402_s7 + $0x80] ss:$8 sps:$4 sm:$0xff]  }
  0x33   : > { %815 = vmatpush1.bf16.msra.mxu0 %v1200_v20  ;;  %763 = vmatprep.subr.bf16.mxu1 %v1201_v21  ;;  %v1230_v40 = vld [vmem:[%s1402_s7 + $0x170] ss:$8 sps:$4 sm:$0xff]   ;;  %v1233_v42 = vld [vmem:[%s1402_s7 + $0x184] ss:$8 sps:$4 sm:$0xff]   ;;  %v1236_v44 = vld [vmem:[%s1402_s7 + $0x180] ss:$8 sps:$4 sm:$0xff]  }
  0x34   : > { %816 = vmatprep.subr.bf16.mxu0 %v1203_v22  ;;  %v1237_v45 = vld [vmem:[%s1402_s7 + $0x94] ss:$8 sps:$4 sm:$0xff]   ;;  %v1241_v47 = vld [vmem:[%s1402_s7 + $0x90] ss:$8 sps:$4 sm:$0xff]   ;;  %v1243_v49 = vld [vmem:[%s1402_s7 + $0xa4] ss:$8 sps:$4 sm:$0xff]  }
  0x35   : > { %v1239_v46 = vld [vmem:[%s1402_s7 + $0x194] ss:$8 sps:$4 sm:$0xff]   ;;  %v1242_v48 = vld [vmem:[%s1402_s7 + $0x190] ss:$8 sps:$4 sm:$0xff]   ;;  %v1245_v50 = vld [vmem:[%s1402_s7 + $0x1a4] ss:$8 sps:$4 sm:$0xff]  }
  0x36   : > { %764 = vmatpush1.bf16.msra.mxu1 %v1205_v23  ;;  %v1247_v51 = vld [vmem:[%s1402_s7 + $0xa0] ss:$8 sps:$4 sm:$0xff]   ;;  %v1249_v53 = vld [vmem:[%s1402_s7 + $0xb4] ss:$8 sps:$4 sm:$0xff]   ;;  %v1253_v55 = vld [vmem:[%s1402_s7 + $0xb0] ss:$8 sps:$4 sm:$0xff]  }
  0x37   : > { %817 = vmatpush1.bf16.msra.mxu0 %v1206_v24  ;;  %765 = vmatprep.subr.bf16.mxu1 %v1207_v25  ;;  %v1248_v52 = vld [vmem:[%s1402_s7 + $0x1a0] ss:$8 sps:$4 sm:$0xff]   ;;  %v1251_v54 = vld [vmem:[%s1402_s7 + $0x1b4] ss:$8 sps:$4 sm:$0xff]   ;;  %v1254_v56 = vld [vmem:[%s1402_s7 + $0x1b0] ss:$8 sps:$4 sm:$0xff]  }
  0x38   : > { %818 = vmatprep.subr.bf16.mxu0 %v1209_v26  ;;  %v1255_v57 = vld [vmem:[%s1402_s7 + $0xc4] ss:$8 sps:$4 sm:$0xff]   ;;  %v1259_v61 = vld [vmem:[%s1402_s7 + $0xc0] ss:$8 sps:$4 sm:$0xff]   ;;  %v1261_v63 = vld [vmem:[%s1402_s7 + $0xd4] ss:$8 sps:$4 sm:$0xff]  }
  0x39   : > { %v1281_v58 = vld [vmem:[%s1404_s8 + $0x4] ss:$16 sps:$4 sm:$0xff]   ;;  %v1284_v60 = vld [vmem:[%s1404_s8 + $0xc] ss:$16 sps:$4 sm:$0xff]   ;;  %v1260_v62 = vld [vmem:[%s1402_s7 + $0x1c0] ss:$8 sps:$4 sm:$0xff]  }
  0x3a   : > { %766 = vmatpush1.bf16.msra.mxu1 %v1211_v27  ;;  %v1257_v59 = vld [vmem:[%s1402_s7 + $0x1c4] ss:$8 sps:$4 sm:$0xff]   ;;  %789 = vmatprep.mubr.bf16.mxu1 %v1281_v58  ;;  %v1263_v0 = vld [vmem:[%s1402_s7 + $0x1d4] ss:$8 sps:$4 sm:$0xff]   ;;  %v1265_v1 = vld [vmem:[%s1402_s7 + $0xd0] ss:$8 sps:$4 sm:$0xff]  }
  0x3b   : > { %819 = vmatpush1.bf16.msra.mxu0 %v1212_v28  ;;  %767 = vmatprep.subr.bf16.mxu1 %v1213_v29  ;;  %v1266_v2 = vld [vmem:[%s1402_s7 + $0x1d0] ss:$8 sps:$4 sm:$0xff]   ;;  %v1267_v3 = vld [vmem:[%s1402_s7 + $0xe4] ss:$8 sps:$4 sm:$0xff]   ;;  %v1271_v5 = vld [vmem:[%s1402_s7 + $0xe0] ss:$8 sps:$4 sm:$0xff]  }
  0x3c   : > { %820 = vmatprep.subr.bf16.mxu0 %v1215_v30  ;;  %842 = vmatprep.mubr.bf16.mxu0 %v1284_v60  ;;  %v1269_v4 = vld [vmem:[%s1402_s7 + $0x1e4] ss:$8 sps:$4 sm:$0xff]   ;;  %v1272_v6 = vld [vmem:[%s1402_s7 + $0x1e0] ss:$8 sps:$4 sm:$0xff]   ;;  %v1273_v7 = vld [vmem:[%s1402_s7 + $0xf4] ss:$8 sps:$4 sm:$0xff]  }
  0x3d   : > { %v1275_v8 = vld [vmem:[%s1402_s7 + $0x1f4] ss:$8 sps:$4 sm:$0xff]   ;;  %v1277_v9 = vld [vmem:[%s1402_s7 + $0xf0] ss:$8 sps:$4 sm:$0xff]   ;;  %v317_v18 = vld [vmem:[#allocation2] sm:$0xff]  ;;  %p1127_p11 = scmp.ne.s32.totalorder %s1321_s14, 3 }
  0x3e   : > { %768 = vmatpush1.bf16.msra.mxu1 %v1217_v31  ;;  %v1278_v10 = vld [vmem:[%s1402_s7 + $0x1f0] ss:$8 sps:$4 sm:$0xff]   ;;  %v1285_v13 = vld [vmem:[%s1404_s8 + $0x24] ss:$16 sps:$4 sm:$0xff]   ;;  %v1287_v14 = vld [vmem:[%s1404_s8 + $0x2c] ss:$16 sps:$4 sm:$0xff]  }
  0x3f   : > { %821 = vmatpush1.bf16.msra.mxu0 %v1218_v32  ;;  %769 = vmatprep.subr.bf16.mxu1 %v1219_v33  ;;  %v1279_v11 = vld [vmem:[%s1404_s8] ss:$16 sps:$4 sm:$0xff]   ;;  %v1282_v12 = vld [vmem:[%s1404_s8 + $0x8] ss:$16 sps:$4 sm:$0xff]  }
  0x40   : > { %822 = vmatprep.subr.bf16.mxu0 %v1221_v34  ;;  %v1289_v15 = vld [vmem:[%s1404_s8 + $0x20] ss:$16 sps:$4 sm:$0xff]   ;;  %v1290_v16 = vld [vmem:[%s1404_s8 + $0x28] ss:$16 sps:$4 sm:$0xff]  }
  0x41   : > { %v318_v22 = vld [vmem:[#allocation2 + $0x8] sm:$0xff]  ;;  %v319_v26 = vld [vmem:[#allocation2 + $0x10] sm:$0xff]  ;;  %v320_v31 = vld [vmem:[#allocation2 + $0x18] sm:$0xff] }
  0x42   : > { %770 = vmatpush1.bf16.msra.mxu1 %v1223_v35 }
  0x43   : > { %823 = vmatpush1.bf16.msra.mxu0 %v1224_v36  ;;  %771 = vmatprep.subr.bf16.mxu1 %v1225_v37 }
  0x44   : > { %824 = vmatprep.subr.bf16.mxu0 %v1227_v38  ;;  %v321_v38 = vld [vmem:[#allocation2 + $0x20] sm:$0xff] }
  0x46   : > { %772 = vmatpush1.bf16.msra.mxu1 %v1229_v39 }
  0x47   : > { %825 = vmatpush1.bf16.msra.mxu0 %v1230_v40  ;;  %773 = vmatprep.subr.bf16.mxu1 %v1231_v41 }
  0x48   : > { %826 = vmatprep.subr.bf16.mxu0 %v1233_v42  ;;  %v322_v42 = vld [vmem:[#allocation2 + $0x28] sm:$0xff] }
  0x4a   : > { %774 = vmatpush1.bf16.msra.mxu1 %v1235_v43 }
  0x4b   : > { %827 = vmatpush1.bf16.msra.mxu0 %v1236_v44  ;;  %775 = vmatprep.subr.bf16.mxu1 %v1237_v45 }
  0x4c   : > { %828 = vmatprep.subr.bf16.mxu0 %v1239_v46  ;;  %v323_v46 = vld [vmem:[#allocation2 + $0x30] sm:$0xff] }
  0x4e   : > { %776 = vmatpush1.bf16.msra.mxu1 %v1241_v47 }
  0x4f   : > { %829 = vmatpush1.bf16.msra.mxu0 %v1242_v48  ;;  %777 = vmatprep.subr.bf16.mxu1 %v1243_v49 }
  0x50   : > { %830 = vmatprep.subr.bf16.mxu0 %v1245_v50 }
  0x52   : > { %778 = vmatpush1.bf16.msra.mxu1 %v1247_v51  ;;  %v324_v51 = vld [vmem:[#allocation2 + $0x38] sm:$0xff] }
  0x53   : > { %831 = vmatpush1.bf16.msra.mxu0 %v1248_v52  ;;  %779 = vmatprep.subr.bf16.mxu1 %v1249_v53 }
  0x54   : > { %832 = vmatprep.subr.bf16.mxu0 %v1251_v54 }
  0x56   : > { %780 = vmatpush1.bf16.msra.mxu1 %v1253_v55 }
  0x57   : > { %833 = vmatpush1.bf16.msra.mxu0 %v1254_v56  ;;  %781 = vmatprep.subr.bf16.mxu1 %v1255_v57  ;;  %v893_v57 = vlaneseq (!%p1127_p11) }
  0x58   : > { %834 = vmatprep.subr.bf16.mxu0 %v1257_v59  ;;  %v891_v59 = vld [vmem:[%s1524_s2] sm:$0x3] (!%p1127_p11) }
  0x59   : > { %v894_v58 = vshrl.u32 (!%p1127_p11), %v893_v57, 7 }
  0x5a   : > { %782 = vmatpush1.bf16.msra.mxu1 %v1259_v61 }
  0x5b   : > { %835 = vmatpush1.bf16.msra.mxu0 %v1260_v62  ;;  %783 = vmatprep.subr.bf16.mxu1 %v1261_v63  ;;  %v895_v61 = vsub.s32 (!%p1127_p11), 0, %v894_v58  ;;  %v899_v63 = vsub.s32 (!%p1127_p11), 1, %v894_v58 }
  0x5c   : > { %836 = vmatprep.subr.bf16.mxu0 %v1263_v0 }
  0x5e   : > { %784 = vmatpush1.bf16.msra.mxu1 %v1265_v1 }
  0x5f   : > { %837 = vmatpush1.bf16.msra.mxu0 %v1266_v2  ;;  %785 = vmatprep.subr.bf16.mxu1 %v1267_v3  ;;  %v896_v3 = vrot.slane (!%p1127_p11), %v891_v59, %v895_v61 }
  0x60   : > { %838 = vmatprep.subr.bf16.mxu0 %v1269_v4  ;;  %v900_v4 = vrot.slane (!%p1127_p11), %v891_v59, %v899_v63 }
  0x62   : > { %786 = vmatpush1.bf16.msra.mxu1 %v1271_v5 }
  0x63   : > { %839 = vmatpush1.bf16.msra.mxu0 %v1272_v6  ;;  %787 = vmatprep.subr.bf16.mxu1 %v1273_v7 }
  0x64   : > { %840 = vmatprep.subr.bf16.mxu0 %v1275_v8 }
  0x66   : > { %788 = vmatpush1.bf16.msra.mxu1 %v1277_v9 }
  0x67   : > { %841 = vmatpush1.bf16.msra.mxu0 %v1278_v10 }
  0x69   : > { %790 = vmatmul.mubr.bf16.vlgmr.msra.gmra.mrb[0].mxu1 %v1279_v11 }
  0x6a   : > { %843 = vmatmul.mubr.bf16.vlgmr.msra.gmra.mrb[0].mxu0 %v1282_v12  ;;  %799 = vmatprep.mubr.bf16.mxu1 %v1285_v13 }
  0x6b   : > { %852 = vmatprep.mubr.bf16.mxu0 %v1287_v14 }
  0x71   : > { %800 = vmatmul.mubr.bf16.gmra.mrb[4].mxu1 %v1289_v15 }
  0x72   : > { %853 = vmatmul.mubr.bf16.gmra.mrb[4].mxu0 %v1290_v16 }
 0x13c   : > { %v791_v17 = vpop.f32.mrb[0].mxu1 }
 0x13d   : > { %v844_v19 = vpop.f32.mrb[0].mxu0  ;;  %v793_v21 = vpop.f32.mrb[1].mxu1 }
 0x13e   : > { %v845_v20 = vadd.f32 %v844_v19, %v791_v17  ;;  %v846_v23 = vpop.f32.mrb[1].mxu0  ;;  %v795_v25 = vpop.f32.mrb[2].mxu1 }
 0x13f   : > { %v847_v24 = vadd.f32 %v846_v23, %v793_v21  ;;  %v848_v27 = vpop.f32.mrb[2].mxu0  ;;  %v797_v30 = vpop.f32.mrb[3].mxu1 }
 0x140   : > { %v863_v28 = vadd.f32 %v845_v20, %v317_v18  ;;  %v849_v29 = vadd.f32 %v848_v27, %v795_v25  ;;  %v850_v32 = vpop.f32.mrb[3].mxu0 }
 0x141   : > { %v864_v33 = vadd.f32 %v847_v24, %v318_v22  ;;  %v851_v34 = vadd.f32 %v850_v32, %v797_v30 }
 0x142   : > { %871 = vst [vmem:[#allocation2] sm:$0xff] %v863_v28  ;;  %v865_v35 = vadd.f32 %v849_v29, %v319_v26 }
 0x143   : > { %872 = vst [vmem:[#allocation2 + $0x8] sm:$0xff] %v864_v33  ;;  %v866_v36 = vadd.f32 %v851_v34, %v320_v31 }
 0x144   : > { %873 = vst [vmem:[#allocation2 + $0x10] sm:$0xff] %v865_v35  ;;  %v801_v37 = vpop.f32.mrb[4].mxu1 }
 0x145   : > { %874 = vst [vmem:[#allocation2 + $0x18] sm:$0xff] %v866_v36  ;;  %v854_v39 = vpop.f32.mrb[4].mxu0  ;;  %v803_v41 = vpop.f32.mrb[5].mxu1 }
 0x146   : > { %v855_v40 = vadd.f32 %v854_v39, %v801_v37  ;;  %v856_v43 = vpop.f32.mrb[5].mxu0  ;;  %v805_v45 = vpop.f32.mrb[6].mxu1 }
 0x147   : > { %v857_v44 = vadd.f32 %v856_v43, %v803_v41  ;;  %v858_v47 = vpop.f32.mrb[6].mxu0  ;;  %v807_v50 = vpop.f32.mrb[7].mxu1  ;;  %882 = sbr.rel (%p1127_p11) target bundleno = 344 (0x158), region = 63 }
 0x148   : > { %v867_v48 = vadd.f32 %v855_v40, %v321_v38  ;;  %v859_v49 = vadd.f32 %v858_v47, %v805_v45  ;;  %v860_v52 = vpop.f32.mrb[7].mxu0 }
 0x149   : > { %v868_v53 = vadd.f32 %v857_v44, %v322_v42  ;;  %v861_v54 = vadd.f32 %v860_v52, %v807_v50  ;;  %v883_v60 = vld [vmem:[#allocation2] sm:$0xff] (!%p1127_p11) }
 0x14a   : > { %875 = vst [vmem:[#allocation2 + $0x20] sm:$0xff] %v867_v48  ;;  %v869_v55 = vadd.f32 %v859_v49, %v323_v46  ;;  %v884_v62 = vld [vmem:[#allocation2 + $0x8] sm:$0xff] (!%p1127_p11)  ;;  %v903_v8 = vadd.f32 (!%p1127_p11), %v896_v3, %v883_v60 }
 0x14b   : > { %876 = vst [vmem:[#allocation2 + $0x28] sm:$0xff] %v868_v53  ;;  %v870_v56 = vadd.f32 %v861_v54, %v324_v51  ;;  %v885_v0 = vld [vmem:[#allocation2 + $0x10] sm:$0xff] (!%p1127_p11)  ;;  %v904_v9 = vadd.f32 (!%p1127_p11), %v900_v4, %v884_v62 }
 0x14c   : > { %877 = vst [vmem:[#allocation2 + $0x30] sm:$0xff] %v869_v55  ;;  %v886_v1 = vld [vmem:[#allocation2 + $0x18] sm:$0xff] (!%p1127_p11)  ;;  %v905_v10 = vadd.f32 (!%p1127_p11), %v896_v3, %v885_v0  ;;  %911 = vst [vmem:[%s1525_s3] sm:$0xff] (!%p1127_p11), %v903_v8 }
 0x14d   : > { %878 = vst [vmem:[#allocation2 + $0x38] sm:$0xff] %v870_v56  ;;  %v906_v11 = vadd.f32 (!%p1127_p11), %v900_v4, %v886_v1  ;;  %912 = vst [vmem:[%s1525_s3 + $0x8] sm:$0xff] (!%p1127_p11), %v904_v9 }
 0x14e   : > { %913 = vst [vmem:[%s1525_s3 + $0x10] sm:$0xff] %v905_v10 }
 0x14f   : > { %914 = vst [vmem:[%s1525_s3 + $0x18] sm:$0xff] %v906_v11 }
 0x151   : > { %v887_v2 = vld [vmem:[#allocation2 + $0x20] sm:$0xff] }
 0x152   : > { %v888_v5 = vld [vmem:[#allocation2 + $0x28] sm:$0xff]  ;;  %v907_v12 = vadd.f32 %v896_v3, %v887_v2 }
 0x153   : > { %v889_v6 = vld [vmem:[#allocation2 + $0x30] sm:$0xff]  ;;  %v908_v13 = vadd.f32 %v900_v4, %v888_v5 }
 0x154   : > { %v890_v7 = vld [vmem:[#allocation2 + $0x38] sm:$0xff]  ;;  %v909_v14 = vadd.f32 %v896_v3, %v889_v6  ;;  %915 = vst [vmem:[%s1525_s3 + $0x20] sm:$0xff] %v907_v12 }
 0x155   : > { %v910_v15 = vadd.f32 %v900_v4, %v890_v7  ;;  %916 = vst [vmem:[%s1525_s3 + $0x28] sm:$0xff] %v908_v13 }
 0x156   : > { %917 = vst [vmem:[%s1525_s3 + $0x30] sm:$0xff] %v909_v14 }
 0x157   : > { %918 = vst [vmem:[%s1525_s3 + $0x38] sm:$0xff] %v910_v15 }
 0x158 PF: > { %s13_s16 = sadd.s32 1, %s1329_s16   ;;  %s1526_s12 = smov %s1317_s13 }
 0x159   : > { %p10_p12 = scmp.ge.s32.totalorder %s13_s16, 6   ;;  %s1527_s13 = smov %s1387_s20 }
 0x15a   : > { %s1528_s14 = smov %s1325_s15  ;;  %s1529_s15 = smov %s1531_s17 }
 0x15b   :  { %12 = sbr.rel (!%p10_p12) target bundleno = 3 (0x3), region = 104 }

// kernel: discriminator_forward.12
= control target key start
LH: loop header
LB: loop body
LE: loop exit
PB: predicated region body
PF: predicated region fallthrough
CT: control target
= control target key end

     0   :  { %s460_s6 = smov 0   ;;  %s462_s7 = smov 0   ;;  %s560_s0 = inlined_call_operand.vmem [shape: f32[2,16,256], index: 0, kind: input, shape index: {}]   ;;  %s561_s1 = inlined_call_operand.vmem [shape: f32[2,16,256], index: 1, kind: output, shape index: {}]  }
   0x1   :  { %s464_s8 = smov 0   ;;  %s466_s9 = smov 0  }
   0x2   :  { %s468_s10 = smov 0   ;;  %s470_s11 = smov 0  }
   0x3   :  { %s472_s12 = smov 0  }
   0x4 LB: > { %s20_s13 = sadd.s32 1, %s440_s10  ;;  %s23_s14 = sadd.s32 1, %s444_s11  ;;  %s448_s12 = sphi %s472_s12, %s11_s12   ;;  %s444_s11 = sphi %s470_s11, %s568_s11   ;;  %s440_s10 = sphi %s468_s10, %s567_s10   ;;  %s436_s9 = sphi %s466_s9, %s566_s9   ;;  %s432_s8 = sphi %s464_s8, %s565_s8   ;;  %s428_s7 = sphi %s462_s7, %s564_s7   ;;  %s424_s6 = sphi %s460_s6, %s563_s6  }
   0x5   : > { %p21_p0 = scmp.ge.s32.totalorder %s20_s13, 2  ;;  %s321_s15 = sadd.s32 4294967295, %s448_s12  }
   0x6   : > { %p39_p1 = scmp.ne.s32.totalorder %s428_s7, %s424_s6  ;;  %p40_p2 = scmp.eq.s32.totalorder %s448_s12, 0 }
   0x7   : > { %s570_s13 = smov (%p21_p0, %s20_s13), 0  ;;  %s572_s14 = smov (!%p21_p0, %s23_s14), %s444_s11 }
   0x8   : > { %p25_p3 = scmp.ge.s32.totalorder %s572_s14, 2  ;;  %p71_p4 = scmp.eq.s32.totalorder %s321_s15, 3 }
   0x9   : > { %s28_s16 = ssub.s32 %s440_s10, %s570_s13  ;;  %p41_p5 = por %p40_p2, %p39_p1 }
   0xa   : > { %s574_s14 = smov (%p25_p3, %s572_s14), 0  ;;  %p508_p6 = por %p71_p4, %p39_p1 }
   0xb   : > { %s27_s18 = ssub.s32 %s444_s11, %s574_s14  ;;  %s32_s20 = sadd.s32 1, %s428_s7 }
   0xc   : > { %s29_s19 = sor.u32 %s28_s16, %s27_s18  ;;  %p324_p8 = scmp.ge.s32.totalorder %s448_s12, 4 }
   0xd   : > { %p30_p7 = scmp.eq.s32.totalorder %s29_s19, 0 }
   0xe   : > { %93 = sbr.rel (%p324_p8) target bundleno = 28 (0x1c), region = 16 }
   0xf   : > { %s516_s21 = scalar_select %p30_p7, %s428_s7, %s32_s20  }
  0x15   : > { %96 = sbr.rel (!%p41_p5) target bundleno = 28 (0x1c), region = 20  ;;  %s98_s22 = sand.u32 (%p41_p5), 1, %s428_s7  }
  0x16   : > { %s326_s23 = sshll.u32 (%p41_p5), %s444_s11, 2  ;;  %s325_s24 = sshll.u32 (%p41_p5), %s98_s22, 4 }
  0x17   : > { %s102_s25 = sadd.s32 (%p41_p5), %s440_s10, %s326_s23  ;;  %s100_s30 = scalar_lea.vmem (%p41_p5), [#allocation2], %s325_s24 }
  0x18   : > { %s327_s26 = sshll.u32 (%p41_p5), %s102_s25, 3 }
  0x19   : > { %s104_s29 = scalar_lea.vmem (%p41_p5), %s560_s0, %s327_s26 }
  0x1a   : > { %v134_v0 = vld [vmem:[%s104_s29] sm:$0xff] (%p41_p5)  ;;  %v136_v1 = vld [vmem:[%s104_s29 + $0x10] sm:$0xff] (%p41_p5) }
  0x1b   : > { %135 = vst [vmem:[%s100_s30] sm:$0xff] (%p41_p5), %v134_v0  ;;  %137 = vst [vmem:[%s100_s30 + $0x8] sm:$0xff] (%p41_p5), %v136_v1 }
  0x1c PF: > { %p328_p9 = scmp.ge.s32.totalorder %s448_s12, 1  ;;  %p142_p10 = scmp.lt.s32.totalorder %s448_s12, 5 }
  0x1e   : > { %p143_p11 = pnand %p328_p9, %p142_p10 }
  0x1f   : > { %s149_s2 = sand.u32 (!%p143_p11), 1, %s424_s6  }
  0x20   : > { %146 = sbr.rel (%p143_p11) target bundleno = 98 (0x62), region = 58  ;;  %s528_s3 = sshll.u32 (!%p143_p11), %s149_s2, 4 }
  0x21   : > { %s151_s4 = scalar_lea.vmem (!%p143_p11), [#allocation2], %s528_s3  ;;  %s166_s5 = scalar_lea.vmem (!%p143_p11), [#allocation3], %s528_s3 }
  0x22   : > { %v167_v2 = vld [vmem:[%s151_s4] sm:$0xff] (!%p143_p11)  ;;  %v168_v3 = vld [vmem:[%s151_s4 + $0x8] sm:$0xff] (!%p143_p11) }
  0x23   : > { %v169_v4 = vadd.f32 (!%p143_p11), %v168_v3, %v167_v2 }
  0x25   : > { %v170_v5 = vrot.slane (!%p143_p11), %v169_v4, 4 }
  0x27   : > { %v171_v6 = vadd.f32 %v170_v5, %v169_v4  ;;  %s332_s6 = sshll.u32 (%p508_p6), %s436_s9, 2 }
  0x28   : > { %s210_s15 = sadd.s32 (%p508_p6), %s432_s8, %s332_s6 }
  0x29   : > { %v172_v7 = vrot.slane %v171_v6, 2  ;;  %s333_s16 = sshll.u32 (%p508_p6), %s210_s15, 3 }
  0x2a   : > { %s212_s20 = scalar_lea.vmem (%p508_p6), %s561_s1, %s333_s16 }
  0x2b   : > { %v173_v8 = vadd.f32 %v172_v7, %v171_v6 }
  0x2d   : > { %v174_v9 = vrot.slane %v173_v8, 1 }
  0x2f   : > { %v175_v10 = vadd.f32 %v174_v9, %v173_v8 }
  0x31   : > { %v177_v11 = vmul.f32 0.0625, %v175_v10 }
  0x33   : > { %v178_v12 = vsub.f32 %v167_v2, %v177_v11  ;;  %v179_v13 = vsub.f32 %v168_v3, %v177_v11 }
  0x35   : > { %v180_v14 = vmul.f32 %v178_v12, %v178_v12  ;;  %v181_v15 = vmul.f32 %v179_v13, %v179_v13 }
  0x37   : > { %v182_v16 = vadd.f32 %v181_v15, %v180_v14 }
  0x39   : > { %v183_v17 = vrot.slane %v182_v16, 4 }
  0x3b   : > { %v184_v18 = vadd.f32 %v183_v17, %v182_v16 }
  0x3d   : > { %v185_v19 = vrot.slane %v184_v18, 2 }
  0x3f   : > { %v186_v20 = vadd.f32 %v185_v19, %v184_v18 }
  0x41   : > { %v187_v21 = vrot.slane %v186_v20, 1 }
  0x43   : > { %v188_v22 = vadd.f32 %v187_v21, %v186_v20 }
  0x45   : > { %v189_v23 = vmul.f32 0.0625, %v188_v22 }
  0x47   : > { %v190_v24 = vadd.f32 1e-05, %v189_v23 }
  0x49   : > { %392 = vrsqrt.f32 %v190_v24 }
  0x53   : > { %v393_v25 = vpop.eup %392  ;;  %208 = sbr.rel (!%p508_p6) target bundleno = 98 (0x62), region = 66 }
  0x54   : > { %v192_v26 = vmul.f32 %v393_v25, %v178_v12  ;;  %v193_v27 = vmul.f32 %v393_v25, %v179_v13 }
  0x56   : > { %vm194_vm0 = vcmp.ge.f32.partialorder %v192_v26, 0.0  ;;  %v196_v28 = vmul.f32 0.2, %v192_v26  ;;  %vm195_vm1 = vcmp.ge.f32.partialorder %v193_v27, 0.0  ;;  %v197_v29 = vmul.f32 0.2, %v193_v27 }
  0x58   : > { %v198_v30 = vsel %vm194_vm0, %v192_v26, %v196_v28  ;;  %v199_v31 = vsel %vm195_vm1, %v193_v27, %v197_v29 }
  0x59   : > { %200 = vst [vmem:[%s166_s5] sm:$0xff] %v198_v30  ;;  %201 = vst [vmem:[%s166_s5 + $0x8] sm:$0xff] %v199_v31 }
  0x60   : > { %v242_v32 = vld [vmem:[%s166_s5] sm:$0xff]  ;;  %v244_v33 = vld [vmem:[%s166_s5 + $0x8] sm:$0xff] }
  0x61   : > { %243 = vst [vmem:[%s212_s20] sm:$0xff] %v242_v32  ;;  %245 = vst [vmem:[%s212_s20 + $0x10] sm:$0xff] %v244_v33 }
  0x62 PF: > { %s11_s12 = sadd.s32 1, %s448_s12   ;;  %s563_s6 = smov %s428_s7 }
  0x63   : > { %p8_p12 = scmp.ge.s32.totalorder %s11_s12, 6   ;;  %s564_s7 = smov %s516_s21 }
  0x64   : > { %s565_s8 = smov %s440_s10  ;;  %s566_s9 = smov %s444_s11 }
  0x65   : > { %s567_s10 = smov %s570_s13  ;;  %s568_s11 = smov %s574_s14 }
  0x66   :  { %10 = sbr.rel (!%p8_p12) target bundleno = 4 (0x4), region = 135 }

// kernel: discriminator_forward.13
= control target key start
LH: loop header
LB: loop body
LE: loop exit
PB: predicated region body
PF: predicated region fallthrough
CT: control target
= control target key end

     0   :  { %s2091_s0 = inlined_call_operand.vmem [shape: bf16[24,4096], index: 0, kind: input, shape index: {}]   ;;  %s2092_s1 = inlined_call_operand.vmem [shape: bf16[4096,512], index: 1, kind: input, shape index: {}]   ;;  %s2093_s2 = inlined_call_operand.vmem [shape: f32[1,512], index: 2, kind: input, shape index: {}]   ;;  %s2094_s3 = inlined_call_operand.vmem [shape: f32[24,512], index: 3, kind: output, shape index: {}]  }
   0x1   :  { %2096 = sst [smem:[#allocation7_spill]] %s2091_s0 }
   0x2   :  { %2097 = sst [smem:[#allocation8_spill]] %s2092_s1 }
   0x3   :  { %s1699_s12 = smov 0   ;;  %s1701_s13 = smov 0  }
   0x4   :  { %s1703_s14 = smov 0   ;;  %s1705_s15 = smov 0  }
   0x5   :  { %s1707_s16 = smov 0   ;;  %s1709_s17 = smov 0  }
   0x6   :  { %s1711_s18 = smov 0   ;;  %s1713_s19 = smov 0  }
   0x7   :  { %s1715_s20 = smov 0   ;;  %s1717_s21 = smov 0  }
   0x8   :  { %s1719_s22 = smov 0  }
   0x9 LB: > { %s1293_s23 = sadd.s32 4294967295, %s1676_s22   ;;  %s25_s24 = sadd.s32 1, %s1668_s20  ;;  %s1676_s22 = sphi %s1719_s22, %s13_s22   ;;  %s1672_s21 = sphi %s1717_s21, %s2114_s21   ;;  %s1668_s20 = sphi %s1715_s20, %s2113_s20   ;;  %s1664_s19 = sphi %s1713_s19, %s2112_s19   ;;  %s1660_s18 = sphi %s1711_s18, %s2111_s18   ;;  %s1656_s17 = sphi %s1709_s17, %s2110_s17   ;;  %s1652_s16 = sphi %s1707_s16, %s2109_s16   ;;  %s1648_s15 = sphi %s1705_s15, %s2108_s15   ;;  %s1644_s14 = sphi %s1703_s14, %s2107_s14   ;;  %s1640_s13 = sphi %s1701_s13, %s2106_s13   ;;  %s1636_s12 = sphi %s1699_s12, %s2105_s12  }
   0xa   : > { %p26_p0 = scmp.ge.s32.totalorder %s25_s24, 8  ;;  %s28_s25 = sadd.s32 1, %s1672_s21 }
   0xb   : > { %s41_s26 = sadd.s32 1, %s1656_s17  ;;  %p48_p1 = scmp.ne.s32.totalorder %s1656_s17, %s1652_s16 }
   0xc   : > { %s2116_s24 = smov (%p26_p0, %s25_s24), 0  ;;  %s2118_s25 = smov (!%p26_p0, %s28_s25), %s1672_s21 }
   0xd   : > { %s37_s27 = ssub.s32 %s1668_s20, %s2116_s24  ;;  %p49_p2 = scmp.eq.s32.totalorder %s1676_s22, 0 }
   0xe   : > { %p30_p3 = scmp.ge.s32.totalorder %s2118_s25, 2  ;;  %p39_p4 = scmp.eq.s32.totalorder %s37_s27, 0 }
   0xf   : > { %p1766_p5 = por %p49_p2, %p48_p1  ;;  %s69_s29 = sadd.s32 1, %s1648_s15 }
  0x10   : > { %s2120_s25 = smov (%p30_p3, %s2118_s25), 0  ;;  %p76_p6 = scmp.ne.s32.totalorder %s1648_s15, %s1644_s14 }
  0x11   : > { %2099 = sst [smem:[#allocation6_spill]] %s2120_s25  ;;  %s65_s4 = ssub.s32 %s1672_s21, %s2120_s25 }
  0x12   : > { %s1774_s30 = scalar_select %p39_p4, %s1656_s17, %s41_s26  }
  0x13   : > { %s66_s5 = sor.u32 %s65_s4, %s37_s27  ;;  %p121_p7 = scmp.eq.s32.totalorder %s65_s4, 0 }
  0x14   : > { %p67_p8 = scmp.eq.s32.totalorder %s66_s5, 0  ;;  %p1780_p9 = por %p76_p6, %p49_p2 }
  0x15   : > { %s123_s7 = sadd.s32 1, %s1640_s13  ;;  %p133_p10 = scmp.ne.s32.totalorder %s1640_s13, %s1636_s12 }
  0x16   : > { %s1788_s8 = scalar_select %p67_p8, %s1648_s15, %s69_s29  }
  0x17   : > { %s1791_s9 = scalar_select %p121_p7, %s1640_s13, %s123_s7  }
  0x18   : > { %p134_p11 = scmp.eq.s32.totalorder %s1293_s23, 15  ;;  %p1296_p13 = scmp.ge.s32.totalorder %s1676_s22, 16 }
  0x1a   : > { %p1793_p12 = por %p134_p11, %p133_p10  ;;  %156 = sbr.rel (%p1296_p13) target bundleno = 88 (0x58), region = 16 }
  0x21   : > { %159 = sbr.rel (!%p1766_p5) target bundleno = 46 (0x2e), region = 20  ;;  %s161_s11 = sand.u32 (%p1766_p5), 1, %s1656_s17  }
  0x22   : > { %s1385_s26 = sshll.u32 (%p1766_p5), %s1668_s20, 4  ;;  %s1392_s27 = smul.u32 (%p1766_p5), 48, %s161_s11 }
  0x23   : > { %s2102_s0 = sld [smem:[#allocation7_spill]] (%p1766_p5) }
  0x24   : > { %s163_s23 = scalar_lea.vmem (%p1766_p5), [#allocation3], %s1392_s27 }
  0x29   : > { %s169_s5 = scalar_lea.vmem %s2102_s0, %s1385_s26 }
  0x2a   : > { %v182_v0 = vld [vmem:[%s169_s5] sm:$0xff]  ;;  %v184_v1 = vld [vmem:[%s169_s5 + $0x8] sm:$0xff] }
  0x2b   : > { %v186_v2 = vld [vmem:[%s169_s5 + $0x80] sm:$0xff]  ;;  %v188_v3 = vld [vmem:[%s169_s5 + $0x88] sm:$0xff]  ;;  %183 = vst [vmem:[%s163_s23] sm:$0xff] %v182_v0  ;;  %185 = vst [vmem:[%s163_s23 + $0x8] sm:$0xff] %v184_v1 }
  0x2c   : > { %v190_v4 = vld [vmem:[%s169_s5 + $0x100] sm:$0xff]  ;;  %v192_v5 = vld [vmem:[%s169_s5 + $0x108] sm:$0xff]  ;;  %187 = vst [vmem:[%s163_s23 + $0x10] sm:$0xff] %v186_v2  ;;  %189 = vst [vmem:[%s163_s23 + $0x18] sm:$0xff] %v188_v3 }
  0x2d   : > { %191 = vst [vmem:[%s163_s23 + $0x20] sm:$0xff] %v190_v4  ;;  %193 = vst [vmem:[%s163_s23 + $0x28] sm:$0xff] %v192_v5 }
  0x2e PF: > { %199 = sbr.rel (!%p1780_p9) target bundleno = 88 (0x58), region = 43  ;;  %s201_s28 = sand.u32 (%p1780_p9), 1, %s1648_s15  }
  0x2f   : > { %s1301_s7 = sshll.u32 (%p1780_p9), %s1672_s21, 1  ;;  %s1299_s11 = sshll.u32 (%p1780_p9), %s201_s28, 9 }
  0x30   : > { %s1386_s26 = sshll.u32 (%p1780_p9), %s1668_s20, 8  ;;  %s2103_s1 = sld [smem:[#allocation8_spill]] (%p1780_p9) }
  0x31   : > { %s207_s29 = sadd.s32 (%p1780_p9), %s1386_s26, %s1301_s7  ;;  %s1818_s6 = scalar_lea.vmem (%p1780_p9), [#allocation4], %s1299_s11 }
  0x32   : > { %s1303_s4 = sshll.u32 (%p1780_p9), %s207_s29, 2 }
  0x36   : > { %s1813_s0 = scalar_lea.vmem %s2103_s1, %s1303_s4 }
  0x37   : > { %v363_v6 = vld [vmem:[%s1813_s0] sm:$0xff]  ;;  %v365_v7 = vld [vmem:[%s1813_s0 + $0x10] sm:$0xff] }
  0x38   : > { %v367_v8 = vld [vmem:[%s1813_s0 + $0x20] sm:$0xff]  ;;  %364 = vst [vmem:[%s1818_s6] sm:$0xff] %v363_v6  ;;  %366 = vst [vmem:[%s1818_s6 + $0x8] sm:$0xff] %v365_v7  ;;  %v369_v9 = vld [vmem:[%s1813_s0 + $0x30] sm:$0xff] }
  0x39   : > { %368 = vst [vmem:[%s1818_s6 + $0x10] sm:$0xff] %v367_v8  ;;  %v371_v10 = vld [vmem:[%s1813_s0 + $0x40] sm:$0xff]  ;;  %v373_v11 = vld [vmem:[%s1813_s0 + $0x50] sm:$0xff]  ;;  %370 = vst [vmem:[%s1818_s6 + $0x18] sm:$0xff] %v369_v9 }
  0x3a   : > { %372 = vst [vmem:[%s1818_s6 + $0x20] sm:$0xff] %v371_v10  ;;  %374 = vst [vmem:[%s1818_s6 + $0x28] sm:$0xff] %v373_v11  ;;  %v375_v12 = vld [vmem:[%s1813_s0 + $0x60] sm:$0xff]  ;;  %v377_v13 = vld [vmem:[%s1813_s0 + $0x70] sm:$0xff] }
  0x3b   : > { %v379_v14 = vld [vmem:[%s1813_s0 + $0x80] sm:$0xff]  ;;  %376 = vst [vmem:[%s1818_s6 + $0x30] sm:$0xff] %v375_v12  ;;  %378 = vst [vmem:[%s1818_s6 + $0x38] sm:$0xff] %v377_v13  ;;  %v381_v15 = vld [vmem:[%s1813_s0 + $0x90] sm:$0xff] }
  0x3c   : > { %380 = vst [vmem:[%s1818_s6 + $0x40] sm:$0xff] %v379_v14  ;;  %v383_v16 = vld [vmem:[%s1813_s0 + $0xa0] sm:$0xff]  ;;  %v385_v17 = vld [vmem:[%s1813_s0 + $0xb0] sm:$0xff]  ;;  %382 = vst [vmem:[%s1818_s6 + $0x48] sm:$0xff] %v381_v15 }
  0x3d   : > { %384 = vst [vmem:[%s1818_s6 + $0x50] sm:$0xff] %v383_v16  ;;  %386 = vst [vmem:[%s1818_s6 + $0x58] sm:$0xff] %v385_v17  ;;  %v387_v18 = vld [vmem:[%s1813_s0 + $0xc0] sm:$0xff]  ;;  %v389_v19 = vld [vmem:[%s1813_s0 + $0xd0] sm:$0xff] }
  0x3e   : > { %v391_v20 = vld [vmem:[%s1813_s0 + $0xe0] sm:$0xff]  ;;  %388 = vst [vmem:[%s1818_s6 + $0x60] sm:$0xff] %v387_v18  ;;  %390 = vst [vmem:[%s1818_s6 + $0x68] sm:$0xff] %v389_v19  ;;  %v393_v21 = vld [vmem:[%s1813_s0 + $0xf0] sm:$0xff] }
  0x3f   : > { %392 = vst [vmem:[%s1818_s6 + $0x70] sm:$0xff] %v391_v20  ;;  %v395_v22 = vld [vmem:[%s1813_s0 + $0x100] sm:$0xff]  ;;  %v397_v23 = vld [vmem:[%s1813_s0 + $0x110] sm:$0xff]  ;;  %394 = vst [vmem:[%s1818_s6 + $0x78] sm:$0xff] %v393_v21 }
  0x40   : > { %396 = vst [vmem:[%s1818_s6 + $0x80] sm:$0xff] %v395_v22  ;;  %398 = vst [vmem:[%s1818_s6 + $0x88] sm:$0xff] %v397_v23  ;;  %v399_v24 = vld [vmem:[%s1813_s0 + $0x120] sm:$0xff]  ;;  %v401_v25 = vld [vmem:[%s1813_s0 + $0x130] sm:$0xff] }
  0x41   : > { %v403_v26 = vld [vmem:[%s1813_s0 + $0x140] sm:$0xff]  ;;  %400 = vst [vmem:[%s1818_s6 + $0x90] sm:$0xff] %v399_v24  ;;  %402 = vst [vmem:[%s1818_s6 + $0x98] sm:$0xff] %v401_v25  ;;  %v405_v27 = vld [vmem:[%s1813_s0 + $0x150] sm:$0xff] }
  0x42   : > { %404 = vst [vmem:[%s1818_s6 + $0xa0] sm:$0xff] %v403_v26  ;;  %v407_v28 = vld [vmem:[%s1813_s0 + $0x160] sm:$0xff]  ;;  %v409_v29 = vld [vmem:[%s1813_s0 + $0x170] sm:$0xff]  ;;  %406 = vst [vmem:[%s1818_s6 + $0xa8] sm:$0xff] %v405_v27 }
  0x43   : > { %408 = vst [vmem:[%s1818_s6 + $0xb0] sm:$0xff] %v407_v28  ;;  %410 = vst [vmem:[%s1818_s6 + $0xb8] sm:$0xff] %v409_v29  ;;  %v411_v30 = vld [vmem:[%s1813_s0 + $0x180] sm:$0xff]  ;;  %v413_v31 = vld [vmem:[%s1813_s0 + $0x190] sm:$0xff] }
  0x44   : > { %v415_v32 = vld [vmem:[%s1813_s0 + $0x1a0] sm:$0xff]  ;;  %412 = vst [vmem:[%s1818_s6 + $0xc0] sm:$0xff] %v411_v30  ;;  %414 = vst [vmem:[%s1818_s6 + $0xc8] sm:$0xff] %v413_v31  ;;  %v417_v33 = vld [vmem:[%s1813_s0 + $0x1b0] sm:$0xff] }
  0x45   : > { %416 = vst [vmem:[%s1818_s6 + $0xd0] sm:$0xff] %v415_v32  ;;  %v419_v34 = vld [vmem:[%s1813_s0 + $0x1c0] sm:$0xff]  ;;  %v421_v35 = vld [vmem:[%s1813_s0 + $0x1d0] sm:$0xff]  ;;  %418 = vst [vmem:[%s1818_s6 + $0xd8] sm:$0xff] %v417_v33 }
  0x46   : > { %420 = vst [vmem:[%s1818_s6 + $0xe0] sm:$0xff] %v419_v34  ;;  %422 = vst [vmem:[%s1818_s6 + $0xe8] sm:$0xff] %v421_v35  ;;  %v423_v36 = vld [vmem:[%s1813_s0 + $0x1e0] sm:$0xff]  ;;  %v425_v37 = vld [vmem:[%s1813_s0 + $0x1f0] sm:$0xff] }
  0x47   : > { %v427_v38 = vld [vmem:[%s1813_s0 + $0x200] sm:$0xff]  ;;  %424 = vst [vmem:[%s1818_s6 + $0xf0] sm:$0xff] %v423_v36  ;;  %426 = vst [vmem:[%s1818_s6 + $0xf8] sm:$0xff] %v425_v37  ;;  %v429_v39 = vld [vmem:[%s1813_s0 + $0x210] sm:$0xff] }
  0x48   : > { %428 = vst [vmem:[%s1818_s6 + $0x100] sm:$0xff] %v427_v38  ;;  %v431_v40 = vld [vmem:[%s1813_s0 + $0x220] sm:$0xff]  ;;  %v433_v41 = vld [vmem:[%s1813_s0 + $0x230] sm:$0xff]  ;;  %430 = vst [vmem:[%s1818_s6 + $0x108] sm:$0xff] %v429_v39 }
  0x49   : > { %432 = vst [vmem:[%s1818_s6 + $0x110] sm:$0xff] %v431_v40  ;;  %434 = vst [vmem:[%s1818_s6 + $0x118] sm:$0xff] %v433_v41  ;;  %v435_v42 = vld [vmem:[%s1813_s0 + $0x240] sm:$0xff]  ;;  %v437_v43 = vld [vmem:[%s1813_s0 + $0x250] sm:$0xff] }
  0x4a   : > { %v439_v44 = vld [vmem:[%s1813_s0 + $0x260] sm:$0xff]  ;;  %436 = vst [vmem:[%s1818_s6 + $0x120] sm:$0xff] %v435_v42  ;;  %438 = vst [vmem:[%s1818_s6 + $0x128] sm:$0xff] %v437_v43  ;;  %v441_v45 = vld [vmem:[%s1813_s0 + $0x270] sm:$0xff] }
  0x4b   : > { %440 = vst [vmem:[%s1818_s6 + $0x130] sm:$0xff] %v439_v44  ;;  %v443_v46 = vld [vmem:[%s1813_s0 + $0x280] sm:$0xff]  ;;  %v445_v47 = vld [vmem:[%s1813_s0 + $0x290] sm:$0xff]  ;;  %442 = vst [vmem:[%s1818_s6 + $0x138] sm:$0xff] %v441_v45 }
  0x4c   : > { %444 = vst [vmem:[%s1818_s6 + $0x140] sm:$0xff] %v443_v46  ;;  %446 = vst [vmem:[%s1818_s6 + $0x148] sm:$0xff] %v445_v47  ;;  %v447_v48 = vld [vmem:[%s1813_s0 + $0x2a0] sm:$0xff]  ;;  %v449_v49 = vld [vmem:[%s1813_s0 + $0x2b0] sm:$0xff] }
  0x4d   : > { %v451_v50 = vld [vmem:[%s1813_s0 + $0x2c0] sm:$0xff]  ;;  %448 = vst [vmem:[%s1818_s6 + $0x150] sm:$0xff] %v447_v48  ;;  %450 = vst [vmem:[%s1818_s6 + $0x158] sm:$0xff] %v449_v49  ;;  %v453_v51 = vld [vmem:[%s1813_s0 + $0x2d0] sm:$0xff] }
  0x4e   : > { %452 = vst [vmem:[%s1818_s6 + $0x160] sm:$0xff] %v451_v50  ;;  %v455_v52 = vld [vmem:[%s1813_s0 + $0x2e0] sm:$0xff]  ;;  %v457_v53 = vld [vmem:[%s1813_s0 + $0x2f0] sm:$0xff]  ;;  %454 = vst [vmem:[%s1818_s6 + $0x168] sm:$0xff] %v453_v51 }
  0x4f   : > { %456 = vst [vmem:[%s1818_s6 + $0x170] sm:$0xff] %v455_v52  ;;  %458 = vst [vmem:[%s1818_s6 + $0x178] sm:$0xff] %v457_v53  ;;  %v459_v54 = vld [vmem:[%s1813_s0 + $0x300] sm:$0xff]  ;;  %v461_v55 = vld [vmem:[%s1813_s0 + $0x310] sm:$0xff] }
  0x50   : > { %v463_v56 = vld [vmem:[%s1813_s0 + $0x320] sm:$0xff]  ;;  %460 = vst [vmem:[%s1818_s6 + $0x180] sm:$0xff] %v459_v54  ;;  %462 = vst [vmem:[%s1818_s6 + $0x188] sm:$0xff] %v461_v55  ;;  %v465_v57 = vld [vmem:[%s1813_s0 + $0x330] sm:$0xff] }
  0x51   : > { %464 = vst [vmem:[%s1818_s6 + $0x190] sm:$0xff] %v463_v56  ;;  %v467_v58 = vld [vmem:[%s1813_s0 + $0x340] sm:$0xff]  ;;  %v469_v59 = vld [vmem:[%s1813_s0 + $0x350] sm:$0xff]  ;;  %466 = vst [vmem:[%s1818_s6 + $0x198] sm:$0xff] %v465_v57 }
  0x52   : > { %468 = vst [vmem:[%s1818_s6 + $0x1a0] sm:$0xff] %v467_v58  ;;  %470 = vst [vmem:[%s1818_s6 + $0x1a8] sm:$0xff] %v469_v59  ;;  %v471_v60 = vld [vmem:[%s1813_s0 + $0x360] sm:$0xff]  ;;  %v473_v61 = vld [vmem:[%s1813_s0 + $0x370] sm:$0xff] }
  0x53   : > { %v475_v62 = vld [vmem:[%s1813_s0 + $0x380] sm:$0xff]  ;;  %472 = vst [vmem:[%s1818_s6 + $0x1b0] sm:$0xff] %v471_v60  ;;  %474 = vst [vmem:[%s1818_s6 + $0x1b8] sm:$0xff] %v473_v61  ;;  %v477_v63 = vld [vmem:[%s1813_s0 + $0x390] sm:$0xff] }
  0x54   : > { %476 = vst [vmem:[%s1818_s6 + $0x1c0] sm:$0xff] %v475_v62  ;;  %v479_v0 = vld [vmem:[%s1813_s0 + $0x3a0] sm:$0xff]  ;;  %v481_v1 = vld [vmem:[%s1813_s0 + $0x3b0] sm:$0xff]  ;;  %478 = vst [vmem:[%s1818_s6 + $0x1c8] sm:$0xff] %v477_v63 }
  0x55   : > { %480 = vst [vmem:[%s1818_s6 + $0x1d0] sm:$0xff] %v479_v0  ;;  %482 = vst [vmem:[%s1818_s6 + $0x1d8] sm:$0xff] %v481_v1  ;;  %v483_v2 = vld [vmem:[%s1813_s0 + $0x3c0] sm:$0xff]  ;;  %v485_v3 = vld [vmem:[%s1813_s0 + $0x3d0] sm:$0xff] }
  0x56   : > { %v487_v4 = vld [vmem:[%s1813_s0 + $0x3e0] sm:$0xff]  ;;  %484 = vst [vmem:[%s1818_s6 + $0x1e0] sm:$0xff] %v483_v2  ;;  %486 = vst [vmem:[%s1818_s6 + $0x1e8] sm:$0xff] %v485_v3  ;;  %v489_v5 = vld [vmem:[%s1813_s0 + $0x3f0] sm:$0xff] }
  0x57   : > { %488 = vst [vmem:[%s1818_s6 + $0x1f0] sm:$0xff] %v487_v4  ;;  %490 = vst [vmem:[%s1818_s6 + $0x1f8] sm:$0xff] %v489_v5 }
  0x58 PF: > { %p1304_p0 = scmp.ge.s32.totalorder %s1676_s22, 1  ;;  %p503_p1 = scmp.lt.s32.totalorder %s1676_s22, 17 }
  0x5a   : > { %p504_p2 = pnand %p1304_p0, %p503_p1 }
  0x5b   : > { %s510_s23 = sand.u32 (!%p504_p2), 1, %s1652_s16   ;;  %s517_s28 = sand.u32 (!%p504_p2), 1, %s1644_s14  }
  0x5c   : > { %507 = sbr.rel (%p504_p2) target bundleno = 417 (0x1a1), region = 85  ;;  %s1305_s11 = sshll.u32 (!%p504_p2), %s517_s28, 9 }
  0x5d   : > { %s1393_s7 = smul.u32 (!%p504_p2), 48, %s510_s23  ;;  %s544_s26 = sand.u32 (!%p504_p2), 1, %s1636_s12  }
  0x5e   : > { %s1394_s29 = smul.u32 (!%p504_p2), 48, %s544_s26  ;;  %s1306_s0 = sshll.u32 (!%p504_p2), %s1664_s19, 1 }
  0x5f   : > { %p552_p3 = scmp.lt.s32.totalorder (!%p504_p2), %s1306_s0, 3  ;;  %s1957_s6 = scalar_lea.vmem (!%p504_p2), [#allocation3], %s1393_s7 }
  0x60   : > { %s1959_s1 = scalar_lea.vmem (!%p504_p2), [#allocation4], %s1305_s11  ;;  %s1961_s25 = scalar_lea.vmem (!%p504_p2), [#allocation5], %s1394_s29 }
  0x61   : > { %p1307_p4 = scmp.ne.s32.totalorder (!%p504_p2), %s1660_s18, 0 }
  0x63   : > { %s2122_s0 = smov (!%p552_p3, %s1306_s0), 3  ;;  %561 = sbr.rel (%p1307_p4) target bundleno = 106 (0x6a), region = 97 }
  0x64   : > { %s554_s5 = scalar_lea.vmem %s2093_s2, %s2122_s0  ;;  %v1678_v6 = vmov (!%p1307_p4), 0.0  }
  0x65   : > { %562 = vst [vmem:[#allocation2] sm:$0xff] (!%p1307_p4), %v1678_v6  ;;  %563 = vst [vmem:[#allocation2 + $0x8] sm:$0xff] (!%p1307_p4), %v1678_v6 }
  0x66   : > { %564 = vst [vmem:[#allocation2 + $0x10] sm:$0xff] (!%p1307_p4), %v1678_v6  ;;  %565 = vst [vmem:[#allocation2 + $0x18] sm:$0xff] (!%p1307_p4), %v1678_v6 }
  0x67   : > { %566 = vst [vmem:[#allocation2 + $0x20] sm:$0xff] (!%p1307_p4), %v1678_v6  ;;  %567 = vst [vmem:[#allocation2 + $0x28] sm:$0xff] (!%p1307_p4), %v1678_v6 }
  0x6a PF: > { %v1484_v7 = vld [vmem:[%s1959_s1 + $0x4] ss:$8 sps:$4 sm:$0xff]   ;;  %v1488_v9 = vld [vmem:[%s1959_s1] ss:$8 sps:$4 sm:$0xff]   ;;  %v1490_v11 = vld [vmem:[%s1959_s1 + $0x14] ss:$8 sps:$4 sm:$0xff]  }
  0x6b   : > { %v1486_v8 = vld [vmem:[%s1959_s1 + $0x104] ss:$8 sps:$4 sm:$0xff]   ;;  %998 = vmatprep.subr.bf16.mxu1 %v1484_v7  ;;  %v1489_v10 = vld [vmem:[%s1959_s1 + $0x100] ss:$8 sps:$4 sm:$0xff]   ;;  %v1492_v12 = vld [vmem:[%s1959_s1 + $0x114] ss:$8 sps:$4 sm:$0xff]  }
  0x6c   : > { %1049 = vmatprep.subr.bf16.mxu0 %v1486_v8  ;;  %999 = vmatpush1.bf16.msra.mxu1 %v1488_v9  ;;  %v1494_v13 = vld [vmem:[%s1959_s1 + $0x10] ss:$8 sps:$4 sm:$0xff]   ;;  %v1496_v15 = vld [vmem:[%s1959_s1 + $0x24] ss:$8 sps:$4 sm:$0xff]   ;;  %v1500_v17 = vld [vmem:[%s1959_s1 + $0x20] ss:$8 sps:$4 sm:$0xff]  }
  0x6d   : > { %1050 = vmatpush1.bf16.msra.mxu0 %v1489_v10  ;;  %1000 = vmatprep.subr.bf16.mxu1 %v1490_v11  ;;  %v1495_v14 = vld [vmem:[%s1959_s1 + $0x110] ss:$8 sps:$4 sm:$0xff]   ;;  %v1498_v16 = vld [vmem:[%s1959_s1 + $0x124] ss:$8 sps:$4 sm:$0xff]   ;;  %v1501_v18 = vld [vmem:[%s1959_s1 + $0x120] ss:$8 sps:$4 sm:$0xff]  }
  0x6e   : > { %1051 = vmatprep.subr.bf16.mxu0 %v1492_v12  ;;  %v1502_v19 = vld [vmem:[%s1959_s1 + $0x34] ss:$8 sps:$4 sm:$0xff]   ;;  %v1506_v21 = vld [vmem:[%s1959_s1 + $0x30] ss:$8 sps:$4 sm:$0xff]   ;;  %v1508_v23 = vld [vmem:[%s1959_s1 + $0x44] ss:$8 sps:$4 sm:$0xff]  }
  0x6f   : > { %v1504_v20 = vld [vmem:[%s1959_s1 + $0x134] ss:$8 sps:$4 sm:$0xff]   ;;  %v1507_v22 = vld [vmem:[%s1959_s1 + $0x130] ss:$8 sps:$4 sm:$0xff]   ;;  %v1510_v24 = vld [vmem:[%s1959_s1 + $0x144] ss:$8 sps:$4 sm:$0xff]  }
  0x70   : > { %1001 = vmatpush1.bf16.msra.mxu1 %v1494_v13  ;;  %v1512_v25 = vld [vmem:[%s1959_s1 + $0x40] ss:$8 sps:$4 sm:$0xff]   ;;  %v1514_v27 = vld [vmem:[%s1959_s1 + $0x54] ss:$8 sps:$4 sm:$0xff]   ;;  %v1518_v29 = vld [vmem:[%s1959_s1 + $0x50] ss:$8 sps:$4 sm:$0xff]  }
  0x71   : > { %1052 = vmatpush1.bf16.msra.mxu0 %v1495_v14  ;;  %1002 = vmatprep.subr.bf16.mxu1 %v1496_v15  ;;  %v1513_v26 = vld [vmem:[%s1959_s1 + $0x140] ss:$8 sps:$4 sm:$0xff]   ;;  %v1516_v28 = vld [vmem:[%s1959_s1 + $0x154] ss:$8 sps:$4 sm:$0xff]   ;;  %v1519_v30 = vld [vmem:[%s1959_s1 + $0x150] ss:$8 sps:$4 sm:$0xff]  }
  0x72   : > { %1053 = vmatprep.subr.bf16.mxu0 %v1498_v16  ;;  %v1520_v31 = vld [vmem:[%s1959_s1 + $0x64] ss:$8 sps:$4 sm:$0xff]   ;;  %v1524_v33 = vld [vmem:[%s1959_s1 + $0x60] ss:$8 sps:$4 sm:$0xff]   ;;  %v1526_v35 = vld [vmem:[%s1959_s1 + $0x74] ss:$8 sps:$4 sm:$0xff]  }
  0x73   : > { %v1522_v32 = vld [vmem:[%s1959_s1 + $0x164] ss:$8 sps:$4 sm:$0xff]   ;;  %v1525_v34 = vld [vmem:[%s1959_s1 + $0x160] ss:$8 sps:$4 sm:$0xff]   ;;  %v1528_v36 = vld [vmem:[%s1959_s1 + $0x174] ss:$8 sps:$4 sm:$0xff]  }
  0x74   : > { %1003 = vmatpush1.bf16.msra.mxu1 %v1500_v17  ;;  %v1530_v37 = vld [vmem:[%s1959_s1 + $0x70] ss:$8 sps:$4 sm:$0xff]   ;;  %v1532_v39 = vld [vmem:[%s1959_s1 + $0x84] ss:$8 sps:$4 sm:$0xff]   ;;  %v1536_v41 = vld [vmem:[%s1959_s1 + $0x80] ss:$8 sps:$4 sm:$0xff]  }
  0x75   : > { %1054 = vmatpush1.bf16.msra.mxu0 %v1501_v18  ;;  %1004 = vmatprep.subr.bf16.mxu1 %v1502_v19  ;;  %v1531_v38 = vld [vmem:[%s1959_s1 + $0x170] ss:$8 sps:$4 sm:$0xff]   ;;  %v1534_v40 = vld [vmem:[%s1959_s1 + $0x184] ss:$8 sps:$4 sm:$0xff]   ;;  %v1537_v42 = vld [vmem:[%s1959_s1 + $0x180] ss:$8 sps:$4 sm:$0xff]  }
  0x76   : > { %1055 = vmatprep.subr.bf16.mxu0 %v1504_v20  ;;  %v1538_v43 = vld [vmem:[%s1959_s1 + $0x94] ss:$8 sps:$4 sm:$0xff]   ;;  %v1542_v45 = vld [vmem:[%s1959_s1 + $0x90] ss:$8 sps:$4 sm:$0xff]   ;;  %v1544_v47 = vld [vmem:[%s1959_s1 + $0xa4] ss:$8 sps:$4 sm:$0xff]  }
  0x77   : > { %v1540_v44 = vld [vmem:[%s1959_s1 + $0x194] ss:$8 sps:$4 sm:$0xff]   ;;  %v1543_v46 = vld [vmem:[%s1959_s1 + $0x190] ss:$8 sps:$4 sm:$0xff]   ;;  %v1546_v48 = vld [vmem:[%s1959_s1 + $0x1a4] ss:$8 sps:$4 sm:$0xff]  }
  0x78   : > { %1005 = vmatpush1.bf16.msra.mxu1 %v1506_v21  ;;  %v1548_v49 = vld [vmem:[%s1959_s1 + $0xa0] ss:$8 sps:$4 sm:$0xff]   ;;  %v1550_v51 = vld [vmem:[%s1959_s1 + $0xb4] ss:$8 sps:$4 sm:$0xff]   ;;  %v1554_v53 = vld [vmem:[%s1959_s1 + $0xb0] ss:$8 sps:$4 sm:$0xff]  }
  0x79   : > { %1056 = vmatpush1.bf16.msra.mxu0 %v1507_v22  ;;  %1006 = vmatprep.subr.bf16.mxu1 %v1508_v23  ;;  %v1549_v50 = vld [vmem:[%s1959_s1 + $0x1a0] ss:$8 sps:$4 sm:$0xff]   ;;  %v1552_v52 = vld [vmem:[%s1959_s1 + $0x1b4] ss:$8 sps:$4 sm:$0xff]   ;;  %v1555_v55 = vld [vmem:[%s1959_s1 + $0x1b0] ss:$8 sps:$4 sm:$0xff]  }
  0x7a   : > { %1057 = vmatprep.subr.bf16.mxu0 %v1510_v24  ;;  %v1582_v54 = vld [vmem:[%s1957_s6 + $0x4] ss:$16 sps:$4 sm:$0xff]   ;;  %v1585_v58 = vld [vmem:[%s1957_s6 + $0xc] ss:$16 sps:$4 sm:$0xff]   ;;  %v1560_v59 = vld [vmem:[%s1959_s1 + $0xc0] ss:$8 sps:$4 sm:$0xff]  }
  0x7b   : > { %v1556_v56 = vld [vmem:[%s1959_s1 + $0xc4] ss:$8 sps:$4 sm:$0xff]   ;;  %1030 = vmatprep.mubr.bf16.mxu1 %v1582_v54  ;;  %1081 = vmatprep.mubr.bf16.mxu0 %v1585_v58  ;;  %v1561_v60 = vld [vmem:[%s1959_s1 + $0x1c0] ss:$8 sps:$4 sm:$0xff]   ;;  %v1562_v61 = vld [vmem:[%s1959_s1 + $0xd4] ss:$8 sps:$4 sm:$0xff]  }
  0x7c   : > { %1007 = vmatpush1.bf16.msra.mxu1 %v1512_v25  ;;  %v1558_v57 = vld [vmem:[%s1959_s1 + $0x1c4] ss:$8 sps:$4 sm:$0xff]   ;;  %v1564_v62 = vld [vmem:[%s1959_s1 + $0x1d4] ss:$8 sps:$4 sm:$0xff]   ;;  %v1566_v63 = vld [vmem:[%s1959_s1 + $0xd0] ss:$8 sps:$4 sm:$0xff]  }
  0x7d   : > { %1058 = vmatpush1.bf16.msra.mxu0 %v1513_v26  ;;  %1008 = vmatprep.subr.bf16.mxu1 %v1514_v27  ;;  %v1567_v0 = vld [vmem:[%s1959_s1 + $0x1d0] ss:$8 sps:$4 sm:$0xff]   ;;  %v1568_v1 = vld [vmem:[%s1959_s1 + $0xe4] ss:$8 sps:$4 sm:$0xff]   ;;  %v1572_v3 = vld [vmem:[%s1959_s1 + $0xe0] ss:$8 sps:$4 sm:$0xff]  }
  0x7e   : > { %1059 = vmatprep.subr.bf16.mxu0 %v1516_v28  ;;  %v1570_v2 = vld [vmem:[%s1959_s1 + $0x1e4] ss:$8 sps:$4 sm:$0xff]   ;;  %v1573_v4 = vld [vmem:[%s1959_s1 + $0x1e0] ss:$8 sps:$4 sm:$0xff]   ;;  %v1574_v5 = vld [vmem:[%s1959_s1 + $0xf4] ss:$8 sps:$4 sm:$0xff]  }
  0x7f   : > { %v1576_v6 = vld [vmem:[%s1959_s1 + $0x1f4] ss:$8 sps:$4 sm:$0xff]   ;;  %v1578_v7 = vld [vmem:[%s1959_s1 + $0xf0] ss:$8 sps:$4 sm:$0xff]   ;;  %v570_v26 = vld [vmem:[#allocation2 + $0x10] sm:$0xff]  ;;  %p1380_p5 = scmp.ne.s32.totalorder %s1660_s18, 7 }
  0x80   : > { %1009 = vmatpush1.bf16.msra.mxu1 %v1518_v29  ;;  %v1579_v8 = vld [vmem:[%s1959_s1 + $0x1f0] ss:$8 sps:$4 sm:$0xff]  }
  0x81   : > { %1060 = vmatpush1.bf16.msra.mxu0 %v1519_v30  ;;  %1010 = vmatprep.subr.bf16.mxu1 %v1520_v31  ;;  %v578_v9 = vld [vmem:[%s1957_s6 + $0x20] sm:$0xff]  ;;  %v579_v10 = vld [vmem:[%s1957_s6 + $0x28] sm:$0xff] }
  0x82   : > { %1061 = vmatprep.subr.bf16.mxu0 %v1522_v32  ;;  %v1580_v11 = vld [vmem:[%s1957_s6] ss:$16 sps:$4 sm:$0xff]   ;;  %v1583_v12 = vld [vmem:[%s1957_s6 + $0x8] ss:$16 sps:$4 sm:$0xff]   ;;  %v1313_v13 = vcombine.high %v578_v9, %v578_v9  ;;  %v1315_v14 = vcombine.high %v579_v10, %v579_v10  ;;  %v1312_v15 = vcombine.low %v578_v9, %v578_v9  ;;  %v1314_v16 = vcombine.low %v579_v10, %v579_v10 }
  0x83   : > { %v568_v18 = vld [vmem:[#allocation2] sm:$0xff]  ;;  %v569_v22 = vld [vmem:[#allocation2 + $0x8] sm:$0xff]  ;;  %v571_v31 = vld [vmem:[#allocation2 + $0x18] sm:$0xff] }
  0x84   : > { %1011 = vmatpush1.bf16.msra.mxu1 %v1524_v33 }
  0x85   : > { %1062 = vmatpush1.bf16.msra.mxu0 %v1525_v34  ;;  %1012 = vmatprep.subr.bf16.mxu1 %v1526_v35 }
  0x86   : > { %1063 = vmatprep.subr.bf16.mxu0 %v1528_v36 }
  0x88   : > { %1013 = vmatpush1.bf16.msra.mxu1 %v1530_v37 }
  0x89   : > { %1064 = vmatpush1.bf16.msra.mxu0 %v1531_v38  ;;  %1014 = vmatprep.subr.bf16.mxu1 %v1532_v39  ;;  %v572_v38 = vld [vmem:[#allocation2 + $0x20] sm:$0xff] }
  0x8a   : > { %1065 = vmatprep.subr.bf16.mxu0 %v1534_v40 }
  0x8c   : > { %1015 = vmatpush1.bf16.msra.mxu1 %v1536_v41 }
  0x8d   : > { %1066 = vmatpush1.bf16.msra.mxu0 %v1537_v42  ;;  %1016 = vmatprep.subr.bf16.mxu1 %v1538_v43  ;;  %v573_v42 = vld [vmem:[#allocation2 + $0x28] sm:$0xff] }
  0x8e   : > { %1067 = vmatprep.subr.bf16.mxu0 %v1540_v44 }
  0x90   : > { %1017 = vmatpush1.bf16.msra.mxu1 %v1542_v45 }
  0x91   : > { %1068 = vmatpush1.bf16.msra.mxu0 %v1543_v46  ;;  %1018 = vmatprep.subr.bf16.mxu1 %v1544_v47 }
  0x92   : > { %1069 = vmatprep.subr.bf16.mxu0 %v1546_v48 }
  0x94   : > { %1019 = vmatpush1.bf16.msra.mxu1 %v1548_v49 }
  0x95   : > { %1070 = vmatpush1.bf16.msra.mxu0 %v1549_v50  ;;  %1020 = vmatprep.subr.bf16.mxu1 %v1550_v51  ;;  %v1124_v51 = vlaneseq (!%p1380_p5) }
  0x96   : > { %1071 = vmatprep.subr.bf16.mxu0 %v1552_v52 }
  0x97   : > { %v1125_v52 = vshrl.u32 (!%p1380_p5), %v1124_v51, 7 }
  0x98   : > { %1021 = vmatpush1.bf16.msra.mxu1 %v1554_v53  ;;  %v1122_v53 = vld [vmem:[%s554_s5] sm:$0x3] (!%p1380_p5) }
  0x99   : > { %1072 = vmatpush1.bf16.msra.mxu0 %v1555_v55  ;;  %1022 = vmatprep.subr.bf16.mxu1 %v1556_v56  ;;  %v1126_v55 = vsub.s32 (!%p1380_p5), 0, %v1125_v52  ;;  %v1130_v56 = vsub.s32 (!%p1380_p5), 1, %v1125_v52 }
  0x9a   : > { %1073 = vmatprep.subr.bf16.mxu0 %v1558_v57 }
  0x9c   : > { %1023 = vmatpush1.bf16.msra.mxu1 %v1560_v59 }
  0x9d   : > { %1074 = vmatpush1.bf16.msra.mxu0 %v1561_v60  ;;  %1024 = vmatprep.subr.bf16.mxu1 %v1562_v61  ;;  %v1127_v60 = vrot.slane (!%p1380_p5), %v1122_v53, %v1126_v55  ;;  %v1131_v61 = vrot.slane (!%p1380_p5), %v1122_v53, %v1130_v56 }
  0x9e   : > { %1075 = vmatprep.subr.bf16.mxu0 %v1564_v62 }
  0xa0   : > { %1025 = vmatpush1.bf16.msra.mxu1 %v1566_v63 }
  0xa1   : > { %1076 = vmatpush1.bf16.msra.mxu0 %v1567_v0  ;;  %1026 = vmatprep.subr.bf16.mxu1 %v1568_v1 }
  0xa2   : > { %1077 = vmatprep.subr.bf16.mxu0 %v1570_v2 }
  0xa4   : > { %1027 = vmatpush1.bf16.msra.mxu1 %v1572_v3 }
  0xa5   : > { %1078 = vmatpush1.bf16.msra.mxu0 %v1573_v4  ;;  %1028 = vmatprep.subr.bf16.mxu1 %v1574_v5 }
  0xa6   : > { %1079 = vmatprep.subr.bf16.mxu0 %v1576_v6 }
  0xa8   : > { %1029 = vmatpush1.bf16.msra.mxu1 %v1578_v7 }
  0xa9   : > { %1080 = vmatpush1.bf16.msra.mxu0 %v1579_v8 }
  0xab   : > { %1031 = vmatmul.mubr.bf16.vlgmr.msra.gmra.mrb[0].mxu1 %v1580_v11 }
  0xac   : > { %1082 = vmatmul.mubr.bf16.vlgmr.msra.gmra.mrb[0].mxu0 %v1583_v12  ;;  %1040 = vmatprep.mubr.bf16.mxu1 %v1313_v13 }
  0xad   : > { %1091 = vmatprep.mubr.bf16.mxu0 %v1315_v14 }
  0xb3   : > { %1041 = vmatmul.mubr.bf16.gmra.mrb[4].mxu1 %v1312_v15 }
  0xb4   : > { %1092 = vmatmul.mubr.bf16.gmra.mrb[4].mxu0 %v1314_v16 }
 0x17e   : > { %v1032_v17 = vpop.f32.mrb[0].mxu1 }
 0x17f   : > { %v1083_v19 = vpop.f32.mrb[0].mxu0  ;;  %v1034_v21 = vpop.f32.mrb[1].mxu1 }
 0x180   : > { %v1084_v20 = vadd.f32 %v1083_v19, %v1032_v17  ;;  %v1085_v23 = vpop.f32.mrb[1].mxu0  ;;  %v1036_v25 = vpop.f32.mrb[2].mxu1 }
 0x181   : > { %v1086_v24 = vadd.f32 %v1085_v23, %v1034_v21  ;;  %v1087_v27 = vpop.f32.mrb[2].mxu0  ;;  %v1038_v30 = vpop.f32.mrb[3].mxu1 }
 0x182   : > { %v1100_v28 = vadd.f32 %v1084_v20, %v568_v18  ;;  %v1088_v29 = vadd.f32 %v1087_v27, %v1036_v25  ;;  %v1089_v32 = vpop.f32.mrb[3].mxu0 }
 0x183   : > { %v1101_v33 = vadd.f32 %v1086_v24, %v569_v22  ;;  %v1090_v34 = vadd.f32 %v1089_v32, %v1038_v30 }
 0x184   : > { %1106 = vst [vmem:[#allocation2] sm:$0xff] %v1100_v28  ;;  %v1102_v35 = vadd.f32 %v1088_v29, %v570_v26 }
 0x185   : > { %1107 = vst [vmem:[#allocation2 + $0x8] sm:$0xff] %v1101_v33  ;;  %v1103_v36 = vadd.f32 %v1090_v34, %v571_v31 }
 0x186   : > { %1108 = vst [vmem:[#allocation2 + $0x10] sm:$0xff] %v1102_v35  ;;  %v1042_v37 = vpop.f32.mrb[4].mxu1 }
 0x187   : > { %1109 = vst [vmem:[#allocation2 + $0x18] sm:$0xff] %v1103_v36  ;;  %v1093_v39 = vpop.f32.mrb[4].mxu0  ;;  %v1044_v41 = vpop.f32.mrb[5].mxu1  ;;  %1115 = sbr.rel (%p1380_p5) target bundleno = 408 (0x198), region = 101 }
 0x188   : > { %v1094_v40 = vadd.f32 %v1093_v39, %v1042_v37  ;;  %v1095_v43 = vpop.f32.mrb[5].mxu0  ;;  %v1046_v45 = vpop.f32.mrb[6].mxu1 }
 0x189   : > { %v1096_v44 = vadd.f32 %v1095_v43, %v1044_v41  ;;  %v1097_v46 = vpop.f32.mrb[6].mxu0  ;;  %v1047_v48 = vpop.f32.mrb[7].mxu1 }
 0x18a   : > { %v1104_v47 = vadd.f32 %v1094_v40, %v572_v38  ;;  %v1098_v49 = vpop.f32.mrb[7].mxu0 }
 0x18b   : > { %v1105_v50 = vadd.f32 %v1096_v44, %v573_v42  ;;  %v1116_v54 = vld [vmem:[#allocation2] sm:$0xff] (!%p1380_p5) }
 0x18c   : > { %1110 = vst [vmem:[#allocation2 + $0x20] sm:$0xff] %v1104_v47  ;;  %v1117_v57 = vld [vmem:[#allocation2 + $0x8] sm:$0xff] (!%p1380_p5)  ;;  %v1134_v0 = vadd.f32 (!%p1380_p5), %v1127_v60, %v1116_v54 }
 0x18d   : > { %1111 = vst [vmem:[#allocation2 + $0x28] sm:$0xff] %v1105_v50  ;;  %v1118_v58 = vld [vmem:[#allocation2 + $0x10] sm:$0xff] (!%p1380_p5)  ;;  %v1135_v1 = vadd.f32 (!%p1380_p5), %v1131_v61, %v1117_v57 }
 0x18e   : > { %v1119_v59 = vld [vmem:[#allocation2 + $0x18] sm:$0xff]  ;;  %v1136_v2 = vadd.f32 %v1127_v60, %v1118_v58  ;;  %1140 = vst [vmem:[%s1961_s25] sm:$0xff] %v1134_v0 }
 0x18f   : > { %v1137_v3 = vadd.f32 %v1131_v61, %v1119_v59  ;;  %1141 = vst [vmem:[%s1961_s25 + $0x8] sm:$0xff] %v1135_v1 }
 0x190   : > { %1142 = vst [vmem:[%s1961_s25 + $0x10] sm:$0xff] %v1136_v2 }
 0x191   : > { %1143 = vst [vmem:[%s1961_s25 + $0x18] sm:$0xff] %v1137_v3 }
 0x193   : > { %v1120_v62 = vld [vmem:[#allocation2 + $0x20] sm:$0xff] }
 0x194   : > { %v1121_v63 = vld [vmem:[#allocation2 + $0x28] sm:$0xff]  ;;  %v1138_v4 = vadd.f32 %v1127_v60, %v1120_v62 }
 0x195   : > { %v1139_v5 = vadd.f32 %v1131_v61, %v1121_v63 }
 0x196   : > { %1144 = vst [vmem:[%s1961_s25 + $0x20] sm:$0xff] %v1138_v4 }
 0x197   : > { %1145 = vst [vmem:[%s1961_s25 + $0x28] sm:$0xff] %v1139_v5 }
 0x198 PF: > { %1152 = sbr.rel (!%p1793_p12) target bundleno = 417 (0x1a1), region = 105  ;;  %s1387_s14 = sshll.u32 (%p1793_p12), %s1664_s19, 4  ;;  %v1173_v7 = vld [vmem:[%s1961_s25 + $0x8] sm:$0xff] (%p1793_p12)  ;;  %v1175_v8 = vld [vmem:[%s1961_s25 + $0x10] sm:$0xff] (%p1793_p12)  ;;  %v1177_v9 = vld [vmem:[%s1961_s25 + $0x18] sm:$0xff] (%p1793_p12) }
 0x199   : > { %s1158_s23 = scalar_lea.vmem (%p1793_p12), %s2094_s3, %s1387_s14 }
 0x19a   : > { %1174 = vst [vmem:[%s1158_s23 + $0x8] sm:$0xff] (%p1793_p12), %v1173_v7  ;;  %1176 = vst [vmem:[%s1158_s23 + $0x20] sm:$0xff] (%p1793_p12), %v1175_v8 }
 0x19b   : > { %1178 = vst [vmem:[%s1158_s23 + $0x28] sm:$0xff] (%p1793_p12), %v1177_v9 }
 0x19d   : > { %v1179_v10 = vld [vmem:[%s1961_s25 + $0x20] sm:$0xff] (%p1793_p12) }
 0x19e   : > { %v1181_v11 = vld [vmem:[%s1961_s25 + $0x28] sm:$0xff] (%p1793_p12)  ;;  %1180 = vst [vmem:[%s1158_s23 + $0x40] sm:$0xff] (%p1793_p12), %v1179_v10 }
 0x19f   : > { %v1171_v6 = vld [vmem:[%s1961_s25] sm:$0xff]  ;;  %1182 = vst [vmem:[%s1158_s23 + $0x48] sm:$0xff] %v1181_v11 }
 0x1a0   : > { %1172 = vst [vmem:[%s1158_s23] sm:$0xff] %v1171_v6 }
 0x1a1 PF: > { %s13_s22 = sadd.s32 1, %s1676_s22   ;;  %s2104_s25 = sld [smem:[#allocation6_spill]] }
 0x1a2   : > { %p10_p6 = scmp.ge.s32.totalorder %s13_s22, 18   ;;  %s2105_s12 = smov %s1640_s13 }
 0x1a3   : > { %s2106_s13 = smov %s1791_s9  ;;  %s2107_s14 = smov %s1648_s15 }
 0x1a4   : > { %s2108_s15 = smov %s1788_s8  ;;  %s2109_s16 = smov %s1656_s17 }
 0x1a5   : > { %s2110_s17 = smov %s1774_s30  ;;  %s2111_s18 = smov %s1668_s20 }
 0x1a6   : > { %s2112_s19 = smov %s1672_s21  ;;  %s2113_s20 = smov %s2116_s24 }
 0x1a7   : > { %s2114_s21 = smov %s2104_s25  ;;  %12 = sbr.rel (!%p10_p6) target bundleno = 9 (0x9), region = 170 }

// kernel: discriminator_forward.14
= control target key start
LH: loop header
LB: loop body
LE: loop exit
PB: predicated region body
PF: predicated region fallthrough
CT: control target
= control target key end

     0   :  { %s463_s6 = smov 0   ;;  %s465_s7 = smov 0   ;;  %s565_s0 = inlined_call_operand.vmem [shape: f32[2,9,512], index: 0, kind: input, shape index: {}]   ;;  %s566_s1 = inlined_call_operand.vmem [shape: f32[2,9,512], index: 1, kind: output, shape index: {}]  }
   0x1   :  { %s467_s8 = smov 0   ;;  %s469_s9 = smov 0  }
   0x2   :  { %s471_s10 = smov 0   ;;  %s473_s11 = smov 0  }
   0x3   :  { %s475_s12 = smov 0  }
   0x4 LB: > { %s20_s13 = sadd.s32 1, %s443_s10  ;;  %s23_s14 = sadd.s32 1, %s447_s11  ;;  %s451_s12 = sphi %s475_s12, %s11_s12   ;;  %s447_s11 = sphi %s473_s11, %s573_s11   ;;  %s443_s10 = sphi %s471_s10, %s572_s10   ;;  %s439_s9 = sphi %s469_s9, %s571_s9   ;;  %s435_s8 = sphi %s467_s8, %s570_s8   ;;  %s431_s7 = sphi %s465_s7, %s569_s7   ;;  %s427_s6 = sphi %s463_s6, %s568_s6  }
   0x5   : > { %p21_p0 = scmp.ge.s32.totalorder %s20_s13, 4  ;;  %s324_s15 = sadd.s32 4294967295, %s451_s12  }
   0x6   : > { %p39_p1 = scmp.ne.s32.totalorder %s431_s7, %s427_s6  ;;  %p40_p2 = scmp.eq.s32.totalorder %s451_s12, 0 }
   0x7   : > { %s575_s13 = smov (%p21_p0, %s20_s13), 0  ;;  %s577_s14 = smov (!%p21_p0, %s23_s14), %s447_s11 }
   0x8   : > { %p25_p3 = scmp.ge.s32.totalorder %s577_s14, 2  ;;  %p71_p4 = scmp.eq.s32.totalorder %s324_s15, 7 }
   0x9   : > { %s28_s16 = ssub.s32 %s443_s10, %s575_s13  ;;  %p41_p5 = por %p40_p2, %p39_p1 }
   0xa   : > { %s579_s14 = smov (%p25_p3, %s577_s14), 0  ;;  %p511_p6 = por %p71_p4, %p39_p1 }
   0xb   : > { %s27_s18 = ssub.s32 %s447_s11, %s579_s14  ;;  %s32_s20 = sadd.s32 1, %s431_s7 }
   0xc   : > { %s29_s19 = sor.u32 %s28_s16, %s27_s18  ;;  %p327_p8 = scmp.ge.s32.totalorder %s451_s12, 8 }
   0xd   : > { %p30_p7 = scmp.eq.s32.totalorder %s29_s19, 0 }
   0xe   : > { %93 = sbr.rel (%p327_p8) target bundleno = 29 (0x1d), region = 16 }
   0xf   : > { %s519_s21 = scalar_select %p30_p7, %s431_s7, %s32_s20  }
  0x15   : > { %96 = sbr.rel (!%p41_p5) target bundleno = 29 (0x1d), region = 20  ;;  %s98_s22 = sand.u32 (%p41_p5), 1, %s431_s7  }
  0x16   : > { %s329_s23 = sshll.u32 (%p41_p5), %s447_s11, 3  ;;  %s328_s24 = sshll.u32 (%p41_p5), %s98_s22, 4 }
  0x17   : > { %s102_s25 = sadd.s32 (%p41_p5), %s443_s10, %s329_s23  ;;  %s100_s30 = scalar_lea.vmem (%p41_p5), [#allocation2], %s328_s24 }
  0x18   : > { %s330_s26 = sshll.u32 (%p41_p5), %s102_s25, 3 }
  0x19   : > { %s104_s29 = scalar_lea.vmem (%p41_p5), %s565_s0, %s330_s26 }
  0x1a   : > { %v134_v0 = vld [vmem:[%s104_s29] sm:$0xff] (%p41_p5) }
  0x1b   : > { %v136_v1 = vld [vmem:[%s104_s29 + $0x20] sm:$0xff] (%p41_p5)  ;;  %135 = vst [vmem:[%s100_s30] sm:$0xff] (%p41_p5), %v134_v0 }
  0x1c   : > { %137 = vst [vmem:[%s100_s30 + $0x8] sm:$0xff] %v136_v1 }
  0x1d PF: > { %p331_p9 = scmp.ge.s32.totalorder %s451_s12, 1  ;;  %p142_p10 = scmp.lt.s32.totalorder %s451_s12, 9 }
  0x1f   : > { %p143_p11 = pnand %p331_p9, %p142_p10 }
  0x20   : > { %s149_s2 = sand.u32 (!%p143_p11), 1, %s427_s6   ;;  %vm169_vm0 = vcmask (!%p143_p11), 1040384  }
  0x21   : > { %146 = sbr.rel (%p143_p11) target bundleno = 101 (0x65), region = 58  ;;  %s531_s3 = sshll.u32 (!%p143_p11), %s149_s2, 4 }
  0x22   : > { %s151_s4 = scalar_lea.vmem (!%p143_p11), [#allocation2], %s531_s3  ;;  %s166_s5 = scalar_lea.vmem (!%p143_p11), [#allocation3], %s531_s3 }
  0x23   : > { %v167_v2 = vld [vmem:[%s151_s4] sm:$0xff] (!%p143_p11)  ;;  %v168_v3 = vld [vmem:[%s151_s4 + $0x8] sm:$0x1] (!%p143_p11) }
  0x24   : > { %v170_v4 = vsel (!%p143_p11), %vm169_vm0, %v168_v3, 0.0 }
  0x25   : > { %v171_v5 = vadd.f32 (!%p143_p11), %v170_v4, %v167_v2 }
  0x27   : > { %v172_v6 = vrot.slane (!%p143_p11), %v171_v5, 4 }
  0x28   : > { %s335_s6 = sshll.u32 (%p511_p6), %s439_s9, 3 }
  0x29   : > { %v173_v7 = vadd.f32 %v172_v6, %v171_v5  ;;  %s213_s15 = sadd.s32 (%p511_p6), %s435_s8, %s335_s6 }
  0x2a   : > { %s336_s16 = sshll.u32 (%p511_p6), %s213_s15, 3 }
  0x2b   : > { %v174_v8 = vrot.slane %v173_v7, 2  ;;  %s215_s20 = scalar_lea.vmem (%p511_p6), %s566_s1, %s336_s16 }
  0x2d   : > { %v175_v9 = vadd.f32 %v174_v8, %v173_v7 }
  0x2f   : > { %v176_v10 = vrot.slane %v175_v9, 1 }
  0x31   : > { %v177_v11 = vadd.f32 %v176_v10, %v175_v9 }
  0x33   : > { %v179_v12 = vmul.f32 0.11111111, %v177_v11 }
  0x35   : > { %v180_v13 = vsub.f32 %v167_v2, %v179_v12  ;;  %v181_v14 = vsub.f32 %v168_v3, %v179_v12 }
  0x37   : > { %v182_v15 = vmul.f32 %v180_v13, %v180_v13  ;;  %v183_v16 = vmul.f32 %v181_v14, %v181_v14 }
  0x39   : > { %v184_v17 = vsel %vm169_vm0, %v183_v16, 0.0 }
  0x3a   : > { %v185_v18 = vadd.f32 %v184_v17, %v182_v15 }
  0x3c   : > { %v186_v19 = vrot.slane %v185_v18, 4 }
  0x3e   : > { %v187_v20 = vadd.f32 %v186_v19, %v185_v18 }
  0x40   : > { %v188_v21 = vrot.slane %v187_v20, 2 }
  0x42   : > { %v189_v22 = vadd.f32 %v188_v21, %v187_v20 }
  0x44   : > { %v190_v23 = vrot.slane %v189_v22, 1 }
  0x46   : > { %v191_v24 = vadd.f32 %v190_v23, %v189_v22 }
  0x48   : > { %v192_v25 = vmul.f32 0.11111111, %v191_v24 }
  0x4a   : > { %v193_v26 = vadd.f32 1e-05, %v192_v25 }
  0x4c   : > { %395 = vrsqrt.f32 %v193_v26 }
  0x56   : > { %v396_v27 = vpop.eup %395  ;;  %211 = sbr.rel (!%p511_p6) target bundleno = 101 (0x65), region = 66 }
  0x57   : > { %v195_v28 = vmul.f32 %v396_v27, %v180_v13  ;;  %v196_v29 = vmul.f32 %v396_v27, %v181_v14 }
  0x59   : > { %vm197_vm1 = vcmp.ge.f32.partialorder %v195_v28, 0.0  ;;  %v199_v30 = vmul.f32 0.2, %v195_v28  ;;  %vm198_vm2 = vcmp.ge.f32.partialorder %v196_v29, 0.0  ;;  %v200_v31 = vmul.f32 0.2, %v196_v29 }
  0x5b   : > { %v201_v32 = vsel %vm197_vm1, %v195_v28, %v199_v30  ;;  %v202_v33 = vsel %vm198_vm2, %v196_v29, %v200_v31 }
  0x5c   : > { %203 = vst [vmem:[%s166_s5] sm:$0xff] %v201_v32  ;;  %204 = vst [vmem:[%s166_s5 + $0x8] sm:$0x1] %v202_v33 }
  0x63   : > { %v245_v34 = vld [vmem:[%s166_s5] sm:$0xff]  ;;  %v247_v35 = vld [vmem:[%s166_s5 + $0x8] sm:$0xff] }
  0x64   : > { %246 = vst [vmem:[%s215_s20] sm:$0xff] %v245_v34  ;;  %248 = vst [vmem:[%s215_s20 + $0x20] sm:$0xff] %v247_v35 }
  0x65 PF: > { %s11_s12 = sadd.s32 1, %s451_s12   ;;  %s568_s6 = smov %s431_s7 }
  0x66   : > { %p8_p12 = scmp.ge.s32.totalorder %s11_s12, 10   ;;  %s569_s7 = smov %s519_s21 }
  0x67   : > { %s570_s8 = smov %s443_s10  ;;  %s571_s9 = smov %s447_s11 }
  0x68   : > { %s572_s10 = smov %s575_s13  ;;  %s573_s11 = smov %s579_s14 }
  0x69   :  { %10 = sbr.rel (!%p8_p12) target bundleno = 4 (0x4), region = 135 }

// kernel: discriminator_forward.15
= control target key start
LH: loop header
LB: loop body
LE: loop exit
PB: predicated region body
PF: predicated region fallthrough
CT: control target
= control target key end

     0   :  { %s954_s12 = smov 0   ;;  %s956_s13 = smov 0   ;;  %s1037_s0 = inlined_call_operand.vmem [shape: bf16[8,8192], index: 0, kind: input, shape index: {}]   ;;  %s1038_s1 = inlined_call_operand.vmem [shape: bf16[8192,128], index: 1, kind: input, shape index: {}]   ;;  %s1039_s2 = inlined_call_operand.vmem [shape: f32[1,128], index: 2, kind: input, shape index: {}]   ;;  %s1040_s3 = inlined_call_operand.vmem [shape: f32[8,128], index: 3, kind: output, shape index: {}]  }
   0x1   :  { %s958_s14 = smov 0  }
   0x2 LB: > { %s25_s15 = sadd.s32 1, %s927_s13  ;;  %p753_p0 = scmp.ge.s32.totalorder %s931_s14, 1  ;;  %s931_s14 = sphi %s958_s14, %s13_s14   ;;  %s927_s13 = sphi %s956_s13, %s1042_s13   ;;  %s923_s12 = sphi %s954_s12, %s1041_s12  }
   0x3   : > { %p26_p1 = scmp.ge.s32.totalorder %s25_s15, 16  ;;  %p189_p2 = scmp.lt.s32.totalorder %s931_s14, 17 }
   0x5   : > { %s1044_s15 = smov (%p26_p1, %s25_s15), 0  ;;  %p190_p3 = pnand %p753_p0, %p189_p2 }
   0x6   : > { %s754_s16 = sshll.u32 (!%p190_p3), %s923_s12, 2  ;;  %s756_s17 = sshll.u32 (!%p190_p3), %s923_s12, 6 }
   0x7   : > { %193 = sbr.rel (%p190_p3) target bundleno = 322 (0x142), region = 32  ;;  %p233_p4 = scmp.lt.s32.totalorder (!%p190_p3), %s754_s16, 63 }
   0x8   : > { %p241_p5 = scmp.lt.s32.totalorder (!%p190_p3), %s756_s17, 1023  ;;  %p758_p6 = scmp.ne.s32.totalorder (!%p190_p3), %s923_s12, 0 }
   0xe   : > { %s1046_s16 = smov (!%p233_p4, %s754_s16), 63  ;;  %s1048_s17 = smov (!%p241_p5, %s756_s17), 1023 }
   0xf   : > { %s755_s18 = sshll.u32 %s1046_s16, 2  ;;  %s757_s22 = sshll.u32 %s1048_s17, 2  ;;  %v933_v0 = vmov (!%p758_p6), 0.0  }
  0x10   : > { %s979_s21 = scalar_lea.vmem %s1037_s0, %s755_s18  ;;  %s984_s25 = scalar_lea.vmem %s1038_s1, %s757_s22  ;;  %264 = vst [vmem:[#allocation2] sm:$0xff] (!%p758_p6), %v933_v0 }
  0x11   : > { %263 = sbr.rel (%p758_p6) target bundleno = 24 (0x18), region = 36 }
  0x18 PF: > { %v869_v1 = vld [vmem:[%s984_s25 + $0x40] sm:$0xff]   ;;  %v873_v5 = vld [vmem:[%s984_s25 + $0x48] sm:$0xff]   ;;  %v877_v9 = vld [vmem:[%s984_s25 + $0x50] sm:$0xff]   ;;  %p795_p7 = scmp.ne.s32.totalorder %s923_s12, 15 }
  0x19   : > { %v870_v2 = vld [vmem:[%s984_s25 + $0xc0] sm:$0xff]   ;;  %800 = vmatprep.subr.bf16.mxu0 %v869_v1  ;;  %v874_v6 = vld [vmem:[%s984_s25 + $0xc8] sm:$0xff]   ;;  %v878_v10 = vld [vmem:[%s984_s25 + $0xd0] sm:$0xff]  }
  0x1a   : > { %v871_v3 = vld [vmem:[%s984_s25] sm:$0xff]   ;;  %822 = vmatprep.subr.bf16.mxu1 %v870_v2  ;;  %v875_v7 = vld [vmem:[%s984_s25 + $0x8] sm:$0xff]   ;;  %v879_v11 = vld [vmem:[%s984_s25 + $0x10] sm:$0xff]  }
  0x1b   : > { %v872_v4 = vld [vmem:[%s984_s25 + $0x80] sm:$0xff]   ;;  %801 = vmatpush3.bf16.msra.mxu0 %v871_v3  ;;  %v876_v8 = vld [vmem:[%s984_s25 + $0x88] sm:$0xff]   ;;  %v880_v12 = vld [vmem:[%s984_s25 + $0x90] sm:$0xff]  }
  0x1c   : > { %823 = vmatpush3.bf16.msra.mxu1 %v872_v4  ;;  %802 = vmatprep.subr.bf16.mxu0 %v873_v5  ;;  %v881_v13 = vld [vmem:[%s984_s25 + $0x58] sm:$0xff]   ;;  %v885_v17 = vld [vmem:[%s984_s25 + $0x60] sm:$0xff]   ;;  %v889_v21 = vld [vmem:[%s984_s25 + $0x68] sm:$0xff]  }
  0x1d   : > { %824 = vmatprep.subr.bf16.mxu1 %v874_v6  ;;  %v882_v14 = vld [vmem:[%s984_s25 + $0xd8] sm:$0xff]   ;;  %v886_v18 = vld [vmem:[%s984_s25 + $0xe0] sm:$0xff]   ;;  %v890_v22 = vld [vmem:[%s984_s25 + $0xe8] sm:$0xff]  }
  0x1e   : > { %v883_v15 = vld [vmem:[%s984_s25 + $0x18] sm:$0xff]   ;;  %v887_v19 = vld [vmem:[%s984_s25 + $0x20] sm:$0xff]   ;;  %v891_v23 = vld [vmem:[%s984_s25 + $0x28] sm:$0xff]  }
  0x1f   : > { %803 = vmatpush3.bf16.msra.mxu0 %v875_v7  ;;  %v884_v16 = vld [vmem:[%s984_s25 + $0x98] sm:$0xff]   ;;  %v888_v20 = vld [vmem:[%s984_s25 + $0xa0] sm:$0xff]   ;;  %v892_v24 = vld [vmem:[%s984_s25 + $0xa8] sm:$0xff]  }
  0x20   : > { %825 = vmatpush3.bf16.msra.mxu1 %v876_v8  ;;  %804 = vmatprep.subr.bf16.mxu0 %v877_v9  ;;  %v893_v25 = vld [vmem:[%s984_s25 + $0x70] sm:$0xff]   ;;  %v897_v29 = vld [vmem:[%s984_s25 + $0x78] sm:$0xff]   ;;  %v266_v33 = vld [vmem:[%s979_s21] sm:$0xff] }
  0x21   : > { %826 = vmatprep.subr.bf16.mxu1 %v878_v10  ;;  %v894_v26 = vld [vmem:[%s984_s25 + $0xf0] sm:$0xff]   ;;  %v898_v30 = vld [vmem:[%s984_s25 + $0xf8] sm:$0xff]   ;;  %v267_v34 = vld [vmem:[%s979_s21 + $0x8] sm:$0xff]  ;;  %v759_v35 = vcombine.low %v266_v33, %v266_v33  ;;  %v760_v36 = vcombine.high %v266_v33, %v266_v33 }
  0x22   : > { %v895_v27 = vld [vmem:[%s984_s25 + $0x30] sm:$0xff]   ;;  %v899_v31 = vld [vmem:[%s984_s25 + $0x38] sm:$0xff]   ;;  %v761_v37 = vcombine.low %v267_v34, %v267_v34  ;;  %v762_v38 = vcombine.high %v267_v34, %v267_v34  ;;  %v265_v47 = vld [vmem:[#allocation2] sm:$0xff] }
  0x23   : > { %805 = vmatpush3.bf16.msra.mxu0 %v879_v11  ;;  %v896_v28 = vld [vmem:[%s984_s25 + $0xb0] sm:$0xff]   ;;  %v900_v32 = vld [vmem:[%s984_s25 + $0xb8] sm:$0xff]   ;;  %570 = vmatprep.mubr.bf16.mxu0 %v760_v36  ;;  %v796_v53 = vld [vmem:[%s1039_s2] ss:$0 sm:$0xff] (!%p795_p7) }
  0x24   : > { %827 = vmatpush3.bf16.msra.mxu1 %v880_v12  ;;  %806 = vmatprep.subr.bf16.mxu0 %v881_v13 }
  0x25   : > { %828 = vmatprep.subr.bf16.mxu1 %v882_v14  ;;  %610 = vmatprep.mubr.bf16.mxu1 %v762_v38 }
  0x27   : > { %807 = vmatpush3.bf16.msra.mxu0 %v883_v15 }
  0x28   : > { %829 = vmatpush3.bf16.msra.mxu1 %v884_v16  ;;  %808 = vmatprep.subr.bf16.mxu0 %v885_v17 }
  0x29   : > { %830 = vmatprep.subr.bf16.mxu1 %v886_v18 }
  0x2b   : > { %809 = vmatpush3.bf16.msra.mxu0 %v887_v19 }
  0x2c   : > { %831 = vmatpush3.bf16.msra.mxu1 %v888_v20  ;;  %810 = vmatprep.subr.bf16.mxu0 %v889_v21 }
  0x2d   : > { %832 = vmatprep.subr.bf16.mxu1 %v890_v22 }
  0x2f   : > { %811 = vmatpush3.bf16.msra.mxu0 %v891_v23 }
  0x30   : > { %833 = vmatpush3.bf16.msra.mxu1 %v892_v24  ;;  %812 = vmatprep.subr.bf16.mxu0 %v893_v25 }
  0x31   : > { %834 = vmatprep.subr.bf16.mxu1 %v894_v26 }
  0x33   : > { %813 = vmatpush3.bf16.msra.mxu0 %v895_v27 }
  0x34   : > { %835 = vmatpush3.bf16.msra.mxu1 %v896_v28  ;;  %814 = vmatprep.subr.bf16.mxu0 %v897_v29 }
  0x35   : > { %836 = vmatprep.subr.bf16.mxu1 %v898_v30 }
  0x37   : > { %815 = vmatpush3.bf16.msra.mxu0 %v899_v31 }
  0x38   : > { %837 = vmatpush3.bf16.msra.mxu1 %v900_v32 }
  0x3a   : > { %571 = vmatmul.mubr.bf16.vlgmr.msra.gmra.mrb[0].mxu0 %v759_v35 }
  0x3b   : > { %611 = vmatmul.mubr.bf16.vlgmr.msra.gmra.mrb[0].mxu1 %v761_v37 }
 0x10d   : > { %v816_v39 = vpop.f32.mrb[0].mxu0 }
 0x10e   : > { %v838_v40 = vpop.f32.mrb[0].mxu1  ;;  %v817_v41 = vpop.f32.mrb[1].mxu0 }
 0x10f   : > { %v839_v42 = vpop.f32.mrb[1].mxu1  ;;  %v818_v43 = vadd.f32 %v817_v41, %v816_v39  ;;  %v819_v45 = vpop.f32.mrb[2].mxu0 }
 0x110   : > { %v840_v44 = vadd.f32 %v839_v42, %v838_v40  ;;  %v841_v46 = vpop.f32.mrb[2].mxu1  ;;  %v820_v48 = vpop.f32.mrb[3].mxu0  ;;  %623 = sbr.rel (%p795_p7) target bundleno = 322 (0x142), region = 40 }
 0x111   : > { %v842_v49 = vpop.f32.mrb[3].mxu1 }
 0x112   : > { %v613_v50 = vadd.f32 %v840_v44, %v818_v43 }
 0x114   : > { %v618_v51 = vadd.f32 %v613_v50, %v265_v47 }
 0x116   : > { %619 = vst [vmem:[#allocation2] sm:$0xff] %v618_v51 }
 0x11d   : > { %v624_v52 = vld [vmem:[#allocation2] sm:$0xff] }
 0x11e   : > { %v632_v54 = vadd.f32 %v796_v53, %v624_v52 }
 0x120   : > { %v633_v55 = vand.u32 2147483647, %v632_v54  ;;  %vm637_vm0 = vcmp.ge.f32.partialorder %v632_v54, 0.0 }
 0x122   : > { %v634_v56 = vsub.f32 0.0, %v633_v55 }
 0x124   : > { %v635_v57 = vmul.f32 1.442695, %v634_v56 }
 0x126   : > { %905 = vpow2.f32 %v635_v57 }
 0x130   : > { %v906_v58 = vpop.eup %905 }
 0x131   : > { %v638_v59 = vadd.f32 1.0, %v906_v58 }
 0x133   : > { %907 = vrcp.f32 %v638_v59 }
 0x13d   : > { %v908_v60 = vpop.eup %907 }
 0x13e   : > { %v641_v61 = vmul.f32 %v908_v60, %v906_v58 }
 0x140   : > { %v642_v62 = vsel %vm637_vm0, %v908_v60, %v641_v61 }
 0x141   : > { %643 = vst [vmem:[%s1040_s3] sm:$0xff] %v642_v62 }
 0x142 PF: > { %s13_s14 = sadd.s32 1, %s931_s14   ;;  %s1041_s12 = smov %s927_s13 }
 0x143   : > { %p10_p8 = scmp.ge.s32.totalorder %s13_s14, 18   ;;  %s1042_s13 = smov %s1044_s15 }
 0x145   :  { %12 = sbr.rel (!%p10_p8) target bundleno = 2 (0x2), region = 76 }

</bundles_post_ra>
